<compile_context>
chip_gen: v5e
topology: v5e:2x2
jax: 0.10.0
libtpu: 0.0.40
codegen_flags: <defaults>
</compile_context>

<pallas_src>
from functools import partial

import jax
import jax.numpy as jnp
from jax import lax
from jax.experimental import pallas as pl
from jax.experimental.pallas import tpu as pltpu

EPS = 1e-8
LANE = 128
SUBLANE_PACK = 16   # pad token axis to a multiple of 16 (bf16 sublane tile)


def _round_up(n, m):
    return ((n + m - 1) // m) * m


# ----------------------------- in-kernel helpers -----------------------------

def _simple_rmsnorm(x, d):
    # SimpleRMSNorm: x / (||x||_2 * d**-0.5 + eps); d is the REAL feature dim
    # (padded lanes are zero so the sum of squares is unchanged).
    norm = jnp.sqrt(jnp.sum(x * x, axis=-1, keepdims=True))
    rms = norm * (float(d) ** -0.5)
    return x * pl.reciprocal(rms + EPS, approx=True)


def _one_plus_elu(x):
    # get_activation_fn('1+elu'): 1 + elu(x)
    return jnp.where(x > 0, x + 1.0, jnp.exp(x))


# --------------------------------- kernel ------------------------------------

def block_kernel(x_ref, wqkv_ref, mask_ref, wout_ref, bout_ref,
                 w1_ref, b1_ref, w2_ref, b2_ref, o_ref, *,
                 batch, rows_per_batch, ip, dim, inner):
    """Fused pre-norm NormLinearAttention + residual, then pre-norm FFN + residual.

    Single grid step over the whole (B*Np, Cp) activation slab.  All channel
    dims are lane-padded to 128 and the token axis to a multiple of 16 in the
    wrapper; the precomputed block-diagonal head mask implements per-head kv
    and keeps padded lanes exactly zero (padded q/k lanes are 1 from 1+elu(0),
    but the corresponding v lanes / kv columns are zero and the mask removes
    the cross-head rows).
    """
    bf16 = jnp.bfloat16
    f32 = jnp.float32

    x = x_ref[...]                                            # (B*Np, Cp) f32

    # ------------------------------ token mixer ------------------------------
    xn = _simple_rmsnorm(x, dim)                              # token_norm
    qkv = jnp.dot(xn.astype(bf16), wqkv_ref[...],
                  preferred_element_type=f32)                 # (B*Np, 3*Ip)
    # 128-aligned lane slices of the fused projection (free, no relayout).
    q = _one_plus_elu(qkv[:, :ip]).astype(bf16)
    k = _one_plus_elu(qkv[:, ip:2 * ip]).astype(bf16)
    v = qkv[:, 2 * ip:].astype(bf16)

    mask = mask_ref[...]                                      # (Ip, Ip) f32
    o_parts = []
    for b in range(batch):                                    # B is tiny (2)
        r0 = b * rows_per_batch
        r1 = r0 + rows_per_batch
        # kv = k^T v for this batch, masked to the per-head block diagonal.
        kv = lax.dot_general(k[r0:r1], v[r0:r1], (((0,), (0,)), ((), ())),
                             preferred_element_type=f32)      # (Ip, Ip)
        kv = (kv * mask).astype(bf16)
        o_parts.append(jnp.dot(q[r0:r1], kv, preferred_element_type=f32))
    o = jnp.concatenate(o_parts, axis=0)                      # (B*Np, Ip) f32

    on = _simple_rmsnorm(o, inner)                            # attn output norm
    x = x + jnp.dot(on.astype(bf16), wout_ref[...],
                    preferred_element_type=f32) + bout_ref[...]

    # --------------------------- feature mixer (FFN) --------------------------
    xn = _simple_rmsnorm(x, dim)                              # feature_norm
    h = jnp.dot(xn.astype(bf16), w1_ref[...],
                preferred_element_type=f32) + b1_ref[...]
    # TODO(synk): nn.GELU default is the exact erf form; the tanh approximation
    # is used for guaranteed Mosaic lowering (deviation < 1e-3 absolute).
    h = jax.nn.gelu(h, approximate=True)
    x = x + jnp.dot(h.astype(bf16), w2_ref[...],
                    preferred_element_type=f32) + b2_ref[...]

    o_ref[...] = x.astype(o_ref.dtype)


# --------------------------------- wrapper -----------------------------------

def block_forward(x, params, *, num_heads, dim_head):
    B, N, C = x.shape
    inner = num_heads * dim_head
    mlp = params["w1"].shape[1]

    Cp = _round_up(C, LANE)
    Ip = _round_up(inner, LANE)
    Mp = _round_up(mlp, LANE)
    Np = _round_up(N, SUBLANE_PACK)
    rows = B * Np

    bf16 = jnp.bfloat16
    f32 = jnp.float32

    def pad2(w, r, c, dtype):
        return jnp.pad(w, ((0, r - w.shape[0]), (0, c - w.shape[1]))).astype(dtype)

    # Fused, lane-padded QKV weight (Cp, 3*Ip); q/k/v blocks start at 128-aligned
    # lane offsets so the kernel can slice the matmul result for free.
    wqkv = params["wqkv"]                                     # (C, 3*inner)
    wqkv_p = jnp.concatenate(
        [pad2(wqkv[:, :inner], Cp, Ip, bf16),
         pad2(wqkv[:, inner:2 * inner], Cp, Ip, bf16),
         pad2(wqkv[:, 2 * inner:], Cp, Ip, bf16)], axis=1)    # (Cp, 3*Ip) bf16
    wout = pad2(params["wout"], Ip, Cp, bf16)
    w1 = pad2(params["w1"], Cp, Mp, bf16)
    w2 = pad2(params["w2"], Mp, Cp, bf16)
    bout = pad2(params["bout"], 1, Cp, f32)
    b1 = pad2(params["b1"], 1, Mp, f32)
    b2 = pad2(params["b2"], 1, Cp, f32)

    # Precomputed block-diagonal per-head mask (hoisted out of the kernel).
    ar = jnp.arange(Ip)
    head_mask = ((ar[:, None] // dim_head == ar[None, :] // dim_head)
                 & (ar[:, None] < inner) & (ar[None, :] < inner)).astype(f32)

    # Zero-pad tokens/channels and fold the batch into the sublane axis.
    xp = jnp.pad(x, ((0, 0), (0, Np - N), (0, Cp - C))).reshape(rows, Cp)

    operands = (xp, wqkv_p, head_mask, wout, bout, w1, b1, w2, b2)

    def full_spec(a):
        nd = a.ndim
        return pl.BlockSpec(a.shape, lambda i, _nd=nd: (0,) * _nd)

    out = pl.pallas_call(
        partial(block_kernel, batch=B, rows_per_batch=Np, ip=Ip,
                dim=C, inner=inner),
        out_shape=jax.ShapeDtypeStruct((rows, Cp), x.dtype),
        grid=(1,),
        in_specs=[full_spec(a) for a in operands],
        out_specs=pl.BlockSpec((rows, Cp), lambda i: (0, 0)),
        compiler_params=pltpu.CompilerParams(
            dimension_semantics=("arbitrary",)),
    )(*operands)

    return out.reshape(B, Np, Cp)[:, :N, :C]


# ------------------------------ pure-JAX reference ---------------------------

def block_reference(x, params, *, num_heads, dim_head):
    HP = lax.Precision.HIGHEST   # full-f32 matmuls -> trustworthy baseline
    B, N, C = x.shape
    inner = num_heads * dim_head

    def rms(t, d):
        n = jnp.sqrt(jnp.sum(t * t, axis=-1, keepdims=True))
        return t / (n * (float(d) ** -0.5) + EPS)

    # token mixer (NormLinearAttention)
    xn = rms(x, C)
    qkv = jnp.dot(xn, params["wqkv"], precision=HP)
    q, k, v = jnp.split(qkv, 3, axis=-1)
    q = jnp.where(q > 0, q + 1.0, jnp.exp(q))
    k = jnp.where(k > 0, k + 1.0, jnp.exp(k))
    q = q.reshape(B, N, num_heads, dim_head).transpose(0, 2, 1, 3)
    k = k.reshape(B, N, num_heads, dim_head).transpose(0, 2, 1, 3)
    v = v.reshape(B, N, num_heads, dim_head).transpose(0, 2, 1, 3)
    kv = jnp.einsum("bhnm,bhnd->bhmd", k, v, precision=HP)
    o = jnp.einsum("bhnm,bhmd->bhnd", q, kv, precision=HP)
    o = o.transpose(0, 2, 1, 3).reshape(B, N, inner)
    o = rms(o, inner)
    x = x + (jnp.dot(o, params["wout"], precision=HP) + params["bout"])

    # feature mixer (FFN)
    xn = rms(x, C)
    h = jax.nn.gelu(jnp.dot(xn, params["w1"], precision=HP) + params["b1"],
                    approximate=True)
    x = x + (jnp.dot(h, params["w2"], precision=HP) + params["b2"])
    return x


# ----------------------------------- main ------------------------------------

if __name__ == "__main__":
    # small config consistent with the module
    B = 2
    num_row_patches = 7
    N = num_row_patches * num_row_patches      # 49 tokens
    dim = 32
    num_heads = 4
    dim_head = 8
    mlp_dim = 64

    key = jax.random.PRNGKey(0)
    ks = jax.random.split(key, 8)
    s = 0.05
    params = {
        "wqkv": jax.random.normal(ks[0], (dim, 3 * num_heads * dim_head), jnp.float32) * s,
        "wout": jax.random.normal(ks[1], (num_heads * dim_head, dim), jnp.float32) * s,
        "bout": jax.random.normal(ks[2], (1, dim), jnp.float32) * s,
        "w1":   jax.random.normal(ks[3], (dim, mlp_dim), jnp.float32) * s,
        "b1":   jax.random.normal(ks[4], (1, mlp_dim), jnp.float32) * s,
        "w2":   jax.random.normal(ks[5], (mlp_dim, dim), jnp.float32) * s,
        "b2":   jax.random.normal(ks[6], (1, dim), jnp.float32) * s,
    }
    x = jax.random.normal(ks[7], (B, N, dim), jnp.float32)

    out = block_forward(x, params, num_heads=num_heads, dim_head=dim_head)
    out = jax.block_until_ready(out)

    ref = block_reference(x, params, num_heads=num_heads, dim_head=dim_head)
    assert out.shape == (B, N, dim)
    assert bool(jnp.all(jnp.isfinite(out)))
    # Error budget vs the HIGHEST-precision f32 reference: bf16 MXU operands in
    # the kernel (~1e-2 abs at these magnitudes) + the approximate EUP
    # reciprocal in the three SimpleRMSNorms (~1e-3).
    err = float(jnp.max(jnp.abs(out - ref)))
    assert err < 5e-2, f"mismatch vs pure-JAX reference: max abs err = {err}"

    print("KERNEL_OK")
</pallas_src>

<mosaic_0001>
module attributes {stable_mosaic.version = 11 : i64} {
  func.func @block_kernel(%arg0: i32, %arg1: memref<128x128xf32, #tpu.memory_space<vmem>>, %arg2: memref<128x384xbf16, #tpu.memory_space<vmem>>, %arg3: memref<128x128xf32, #tpu.memory_space<vmem>>, %arg4: memref<128x128xbf16, #tpu.memory_space<vmem>>, %arg5: memref<1x128xf32, #tpu.memory_space<vmem>>, %arg6: memref<128x128xbf16, #tpu.memory_space<vmem>>, %arg7: memref<1x128xf32, #tpu.memory_space<vmem>>, %arg8: memref<128x128xbf16, #tpu.memory_space<vmem>>, %arg9: memref<1x128xf32, #tpu.memory_space<vmem>>, %arg10: memref<128x128xf32, #tpu.memory_space<vmem>>) attributes {dimension_semantics = [#tpu.dimension_semantics<arbitrary>], iteration_bounds = array<i64: 1>, scalar_prefetch = 0 : i64, scratch_operands = 0 : i64, tpu.core_type = #tpu.core_type<tc>, window_params = [{pipeline_mode = #tpu.pipeline_mode<synchronous>, transform_indices = @transform_0, window_bounds = array<i64: 128, 128>}, {pipeline_mode = #tpu.pipeline_mode<synchronous>, transform_indices = @transform_1, window_bounds = array<i64: 128, 384>}, {pipeline_mode = #tpu.pipeline_mode<synchronous>, transform_indices = @transform_2, window_bounds = array<i64: 128, 128>}, {pipeline_mode = #tpu.pipeline_mode<synchronous>, transform_indices = @transform_3, window_bounds = array<i64: 128, 128>}, {pipeline_mode = #tpu.pipeline_mode<synchronous>, transform_indices = @transform_4, window_bounds = array<i64: 1, 128>}, {pipeline_mode = #tpu.pipeline_mode<synchronous>, transform_indices = @transform_5, window_bounds = array<i64: 128, 128>}, {pipeline_mode = #tpu.pipeline_mode<synchronous>, transform_indices = @transform_6, window_bounds = array<i64: 1, 128>}, {pipeline_mode = #tpu.pipeline_mode<synchronous>, transform_indices = @transform_7, window_bounds = array<i64: 128, 128>}, {pipeline_mode = #tpu.pipeline_mode<synchronous>, transform_indices = @transform_8, window_bounds = array<i64: 1, 128>}, {pipeline_mode = #tpu.pipeline_mode<synchronous>, transform_indices = @transform_9, window_bounds = array<i64: 128, 128>}]} {
    %c0 = arith.constant 0 : index
    %c0_0 = arith.constant 0 : index
    %0 = vector.load %arg1[%c0, %c0_0] : memref<128x128xf32, #tpu.memory_space<vmem>>, vector<128x128xf32>
    %1 = arith.mulf %0, %0 : vector<128x128xf32>
    %cst = arith.constant dense<0.000000e+00> : vector<128xf32>
    %2 = vector.multi_reduction <add>, %1, %cst [1] : vector<128x128xf32> to vector<128xf32>
    %3 = vector.shape_cast %2 : vector<128xf32> to vector<128x1xf32>
    %4 = math.sqrt %3 : vector<128x1xf32>
    %cst_1 = arith.constant 0.176776692 : f32
    %5 = vector.broadcast %cst_1 : f32 to vector<128x1xf32>
    %6 = arith.mulf %4, %5 : vector<128x1xf32>
    %cst_2 = arith.constant 9.99999993E-9 : f32
    %7 = vector.broadcast %cst_2 : f32 to vector<128x1xf32>
    %8 = arith.addf %6, %7 : vector<128x1xf32>
    %9 = tpu.reciprocal %8 {approx = true} : vector<128x1xf32> -> vector<128x1xf32>
    %10 = vector.broadcast %9 : vector<128x1xf32> to vector<128x128xf32>
    %11 = arith.mulf %0, %10 : vector<128x128xf32>
    %12 = arith.truncf %11 : vector<128x128xf32> to vector<128x128xbf16>
    %c0_3 = arith.constant 0 : index
    %c0_4 = arith.constant 0 : index
    %13 = vector.load %arg2[%c0_3, %c0_4] : memref<128x384xbf16, #tpu.memory_space<vmem>>, vector<128x384xbf16>
    %cst_5 = arith.constant dense<0.000000e+00> : vector<128x384xf32>
    %14 = tpu.matmul %12, %13, %cst_5 {dimension_numbers = #tpu.dot_dimension_numbers<[1], [0], [0], [1], [0, 0, 1, 1], [], []>} : vector<128x128xbf16>, vector<128x384xbf16>, vector<128x384xf32> -> vector<128x384xf32>
    %15 = vector.extract_strided_slice %14 {offsets = [0, 0], sizes = [128, 128], strides = [1, 1]} : vector<128x384xf32> to vector<128x128xf32>
    %cst_6 = arith.constant 0.000000e+00 : f32
    %16 = vector.broadcast %cst_6 : f32 to vector<128x128xf32>
    %17 = arith.cmpf ogt, %15, %16 : vector<128x128xf32>
    %cst_7 = arith.constant 1.000000e+00 : f32
    %18 = vector.broadcast %cst_7 : f32 to vector<128x128xf32>
    %19 = arith.addf %15, %18 : vector<128x128xf32>
    %20 = math.exp %15 : vector<128x128xf32>
    %21 = arith.select %17, %19, %20 : vector<128x128xi1>, vector<128x128xf32>
    %22 = arith.truncf %21 : vector<128x128xf32> to vector<128x128xbf16>
    %23 = vector.extract_strided_slice %14 {offsets = [0, 128], sizes = [128, 128], strides = [1, 1]} : vector<128x384xf32> to vector<128x128xf32>
    %cst_8 = arith.constant 0.000000e+00 : f32
    %24 = vector.broadcast %cst_8 : f32 to vector<128x128xf32>
    %25 = arith.cmpf ogt, %23, %24 : vector<128x128xf32>
    %cst_9 = arith.constant 1.000000e+00 : f32
    %26 = vector.broadcast %cst_9 : f32 to vector<128x128xf32>
    %27 = arith.addf %23, %26 : vector<128x128xf32>
    %28 = math.exp %23 : vector<128x128xf32>
    %29 = arith.select %25, %27, %28 : vector<128x128xi1>, vector<128x128xf32>
    %30 = arith.truncf %29 : vector<128x128xf32> to vector<128x128xbf16>
    %31 = vector.extract_strided_slice %14 {offsets = [0, 256], sizes = [128, 128], strides = [1, 1]} : vector<128x384xf32> to vector<128x128xf32>
    %32 = arith.truncf %31 : vector<128x128xf32> to vector<128x128xbf16>
    %c0_10 = arith.constant 0 : index
    %c0_11 = arith.constant 0 : index
    %33 = vector.load %arg3[%c0_10, %c0_11] : memref<128x128xf32, #tpu.memory_space<vmem>>, vector<128x128xf32>
    %34 = vector.extract_strided_slice %30 {offsets = [0, 0], sizes = [64, 128], strides = [1, 1]} : vector<128x128xbf16> to vector<64x128xbf16>
    %35 = vector.extract_strided_slice %32 {offsets = [0, 0], sizes = [64, 128], strides = [1, 1]} : vector<128x128xbf16> to vector<64x128xbf16>
    %cst_12 = arith.constant dense<0.000000e+00> : vector<128x128xf32>
    %36 = tpu.matmul %34, %35, %cst_12 {dimension_numbers = #tpu.dot_dimension_numbers<[0], [0], [1], [1], [0, 1, 1, 1], [], []>} : vector<64x128xbf16>, vector<64x128xbf16>, vector<128x128xf32> -> vector<128x128xf32>
    %37 = arith.mulf %36, %33 : vector<128x128xf32>
    %38 = arith.truncf %37 : vector<128x128xf32> to vector<128x128xbf16>
    %39 = vector.extract_strided_slice %22 {offsets = [0, 0], sizes = [64, 128], strides = [1, 1]} : vector<128x128xbf16> to vector<64x128xbf16>
    %cst_13 = arith.constant dense<0.000000e+00> : vector<64x128xf32>
    %40 = tpu.matmul %39, %38, %cst_13 {dimension_numbers = #tpu.dot_dimension_numbers<[1], [0], [0], [1], [0, 0, 1, 1], [], []>} : vector<64x128xbf16>, vector<128x128xbf16>, vector<64x128xf32> -> vector<64x128xf32>
    %41 = vector.extract_strided_slice %30 {offsets = [64, 0], sizes = [64, 128], strides = [1, 1]} : vector<128x128xbf16> to vector<64x128xbf16>
    %42 = vector.extract_strided_slice %32 {offsets = [64, 0], sizes = [64, 128], strides = [1, 1]} : vector<128x128xbf16> to vector<64x128xbf16>
    %cst_14 = arith.constant dense<0.000000e+00> : vector<128x128xf32>
    %43 = tpu.matmul %41, %42, %cst_14 {dimension_numbers = #tpu.dot_dimension_numbers<[0], [0], [1], [1], [0, 1, 1, 1], [], []>} : vector<64x128xbf16>, vector<64x128xbf16>, vector<128x128xf32> -> vector<128x128xf32>
    %44 = arith.mulf %43, %33 : vector<128x128xf32>
    %45 = arith.truncf %44 : vector<128x128xf32> to vector<128x128xbf16>
    %46 = vector.extract_strided_slice %22 {offsets = [64, 0], sizes = [64, 128], strides = [1, 1]} : vector<128x128xbf16> to vector<64x128xbf16>
    %cst_15 = arith.constant dense<0.000000e+00> : vector<64x128xf32>
    %47 = tpu.matmul %46, %45, %cst_15 {dimension_numbers = #tpu.dot_dimension_numbers<[1], [0], [0], [1], [0, 0, 1, 1], [], []>} : vector<64x128xbf16>, vector<128x128xbf16>, vector<64x128xf32> -> vector<64x128xf32>
    %48 = tpu.concatenate %40, %47 in 0 : vector<64x128xf32>, vector<64x128xf32> -> vector<128x128xf32>
    %49 = arith.mulf %48, %48 : vector<128x128xf32>
    %cst_16 = arith.constant dense<0.000000e+00> : vector<128xf32>
    %50 = vector.multi_reduction <add>, %49, %cst_16 [1] : vector<128x128xf32> to vector<128xf32>
    %51 = vector.shape_cast %50 : vector<128xf32> to vector<128x1xf32>
    %52 = math.sqrt %51 : vector<128x1xf32>
    %cst_17 = arith.constant 0.176776692 : f32
    %53 = vector.broadcast %cst_17 : f32 to vector<128x1xf32>
    %54 = arith.mulf %52, %53 : vector<128x1xf32>
    %cst_18 = arith.constant 9.99999993E-9 : f32
    %55 = vector.broadcast %cst_18 : f32 to vector<128x1xf32>
    %56 = arith.addf %54, %55 : vector<128x1xf32>
    %57 = tpu.reciprocal %56 {approx = true} : vector<128x1xf32> -> vector<128x1xf32>
    %58 = vector.broadcast %57 : vector<128x1xf32> to vector<128x128xf32>
    %59 = arith.mulf %48, %58 : vector<128x128xf32>
    %60 = arith.truncf %59 : vector<128x128xf32> to vector<128x128xbf16>
    %c0_19 = arith.constant 0 : index
    %c0_20 = arith.constant 0 : index
    %61 = vector.load %arg4[%c0_19, %c0_20] : memref<128x128xbf16, #tpu.memory_space<vmem>>, vector<128x128xbf16>
    %cst_21 = arith.constant dense<0.000000e+00> : vector<128x128xf32>
    %62 = tpu.matmul %60, %61, %cst_21 {dimension_numbers = #tpu.dot_dimension_numbers<[1], [0], [0], [1], [0, 0, 1, 1], [], []>} : vector<128x128xbf16>, vector<128x128xbf16>, vector<128x128xf32> -> vector<128x128xf32>
    %63 = arith.addf %0, %62 : vector<128x128xf32>
    %c0_22 = arith.constant 0 : index
    %c0_23 = arith.constant 0 : index
    %64 = vector.load %arg5[%c0_22, %c0_23] : memref<1x128xf32, #tpu.memory_space<vmem>>, vector<1x128xf32>
    %65 = vector.broadcast %64 : vector<1x128xf32> to vector<128x128xf32>
    %66 = arith.addf %63, %65 : vector<128x128xf32>
    %67 = arith.mulf %66, %66 : vector<128x128xf32>
    %cst_24 = arith.constant dense<0.000000e+00> : vector<128xf32>
    %68 = vector.multi_reduction <add>, %67, %cst_24 [1] : vector<128x128xf32> to vector<128xf32>
    %69 = vector.shape_cast %68 : vector<128xf32> to vector<128x1xf32>
    %70 = math.sqrt %69 : vector<128x1xf32>
    %cst_25 = arith.constant 0.176776692 : f32
    %71 = vector.broadcast %cst_25 : f32 to vector<128x1xf32>
    %72 = arith.mulf %70, %71 : vector<128x1xf32>
    %cst_26 = arith.constant 9.99999993E-9 : f32
    %73 = vector.broadcast %cst_26 : f32 to vector<128x1xf32>
    %74 = arith.addf %72, %73 : vector<128x1xf32>
    %75 = tpu.reciprocal %74 {approx = true} : vector<128x1xf32> -> vector<128x1xf32>
    %76 = vector.broadcast %75 : vector<128x1xf32> to vector<128x128xf32>
    %77 = arith.mulf %66, %76 : vector<128x128xf32>
    %78 = arith.truncf %77 : vector<128x128xf32> to vector<128x128xbf16>
    %c0_27 = arith.constant 0 : index
    %c0_28 = arith.constant 0 : index
    %79 = vector.load %arg6[%c0_27, %c0_28] : memref<128x128xbf16, #tpu.memory_space<vmem>>, vector<128x128xbf16>
    %cst_29 = arith.constant dense<0.000000e+00> : vector<128x128xf32>
    %80 = tpu.matmul %78, %79, %cst_29 {dimension_numbers = #tpu.dot_dimension_numbers<[1], [0], [0], [1], [0, 0, 1, 1], [], []>} : vector<128x128xbf16>, vector<128x128xbf16>, vector<128x128xf32> -> vector<128x128xf32>
    %c0_30 = arith.constant 0 : index
    %c0_31 = arith.constant 0 : index
    %81 = vector.load %arg7[%c0_30, %c0_31] : memref<1x128xf32, #tpu.memory_space<vmem>>, vector<1x128xf32>
    %82 = vector.broadcast %81 : vector<1x128xf32> to vector<128x128xf32>
    %83 = arith.addf %80, %82 : vector<128x128xf32>
    %84 = arith.mulf %83, %83 : vector<128x128xf32>
    %85 = arith.mulf %83, %84 : vector<128x128xf32>
    %cst_32 = arith.constant 4.471500e-02 : f32
    %86 = vector.broadcast %cst_32 : f32 to vector<128x128xf32>
    %87 = arith.mulf %86, %85 : vector<128x128xf32>
    %88 = arith.addf %83, %87 : vector<128x128xf32>
    %cst_33 = arith.constant 0.797884583 : f32
    %89 = vector.broadcast %cst_33 : f32 to vector<128x128xf32>
    %90 = arith.mulf %89, %88 : vector<128x128xf32>
    %91 = math.tanh %90 : vector<128x128xf32>
    %cst_34 = arith.constant 1.000000e+00 : f32
    %92 = vector.broadcast %cst_34 : f32 to vector<128x128xf32>
    %93 = arith.addf %92, %91 : vector<128x128xf32>
    %cst_35 = arith.constant 5.000000e-01 : f32
    %94 = vector.broadcast %cst_35 : f32 to vector<128x128xf32>
    %95 = arith.mulf %94, %93 : vector<128x128xf32>
    %96 = arith.mulf %83, %95 : vector<128x128xf32>
    %97 = arith.truncf %96 : vector<128x128xf32> to vector<128x128xbf16>
    %c0_36 = arith.constant 0 : index
    %c0_37 = arith.constant 0 : index
    %98 = vector.load %arg8[%c0_36, %c0_37] : memref<128x128xbf16, #tpu.memory_space<vmem>>, vector<128x128xbf16>
    %cst_38 = arith.constant dense<0.000000e+00> : vector<128x128xf32>
    %99 = tpu.matmul %97, %98, %cst_38 {dimension_numbers = #tpu.dot_dimension_numbers<[1], [0], [0], [1], [0, 0, 1, 1], [], []>} : vector<128x128xbf16>, vector<128x128xbf16>, vector<128x128xf32> -> vector<128x128xf32>
    %100 = arith.addf %66, %99 : vector<128x128xf32>
    %c0_39 = arith.constant 0 : index
    %c0_40 = arith.constant 0 : index
    %101 = vector.load %arg9[%c0_39, %c0_40] : memref<1x128xf32, #tpu.memory_space<vmem>>, vector<1x128xf32>
    %102 = vector.broadcast %101 : vector<1x128xf32> to vector<128x128xf32>
    %103 = arith.addf %100, %102 : vector<128x128xf32>
    %c0_41 = arith.constant 0 : index
    %c0_42 = arith.constant 0 : index
    %104 = vector.load %arg10[%c0_41, %c0_42] : memref<128x128xf32, #tpu.memory_space<vmem>>, vector<128x128xf32>
    tpu.vector_store %arg10[%c0_41, %c0_42], %103 {strides = array<i32>} : memref<128x128xf32, #tpu.memory_space<vmem>>, vector<128x128xf32>,
    return
  }
  func.func @transform_0(%arg0: i32) -> (i32, i32) {
    %c0_i32 = arith.constant 0 : i32
    %c0_i32_0 = arith.constant 0 : i32
    %c0_i32_1 = arith.constant 0 : i32
    return %c0_i32, %c0_i32_0 : i32, i32
  }
  func.func @transform_1(%arg0: i32) -> (i32, i32) {
    %c0_i32 = arith.constant 0 : i32
    %c0_i32_0 = arith.constant 0 : i32
    %c0_i32_1 = arith.constant 0 : i32
    return %c0_i32, %c0_i32_0 : i32, i32
  }
  func.func @transform_2(%arg0: i32) -> (i32, i32) {
    %c0_i32 = arith.constant 0 : i32
    %c0_i32_0 = arith.constant 0 : i32
    %c0_i32_1 = arith.constant 0 : i32
    return %c0_i32, %c0_i32_0 : i32, i32
  }
  func.func @transform_3(%arg0: i32) -> (i32, i32) {
    %c0_i32 = arith.constant 0 : i32
    %c0_i32_0 = arith.constant 0 : i32
    %c0_i32_1 = arith.constant 0 : i32
    return %c0_i32, %c0_i32_0 : i32, i32
  }
  func.func @transform_4(%arg0: i32) -> (i32, i32) {
    %c0_i32 = arith.constant 0 : i32
    %c0_i32_0 = arith.constant 0 : i32
    %c0_i32_1 = arith.constant 0 : i32
    return %c0_i32, %c0_i32_0 : i32, i32
  }
  func.func @transform_5(%arg0: i32) -> (i32, i32) {
    %c0_i32 = arith.constant 0 : i32
    %c0_i32_0 = arith.constant 0 : i32
    %c0_i32_1 = arith.constant 0 : i32
    return %c0_i32, %c0_i32_0 : i32, i32
  }
  func.func @transform_6(%arg0: i32) -> (i32, i32) {
    %c0_i32 = arith.constant 0 : i32
    %c0_i32_0 = arith.constant 0 : i32
    %c0_i32_1 = arith.constant 0 : i32
    return %c0_i32, %c0_i32_0 : i32, i32
  }
  func.func @transform_7(%arg0: i32) -> (i32, i32) {
    %c0_i32 = arith.constant 0 : i32
    %c0_i32_0 = arith.constant 0 : i32
    %c0_i32_1 = arith.constant 0 : i32
    return %c0_i32, %c0_i32_0 : i32, i32
  }
  func.func @transform_8(%arg0: i32) -> (i32, i32) {
    %c0_i32 = arith.constant 0 : i32
    %c0_i32_0 = arith.constant 0 : i32
    %c0_i32_1 = arith.constant 0 : i32
    return %c0_i32, %c0_i32_0 : i32, i32
  }
  func.func @transform_9(%arg0: i32) -> (i32, i32) {
    %c0_i32 = arith.constant 0 : i32
    %c0_i32_0 = arith.constant 0 : i32
    %c0_i32_1 = arith.constant 0 : i32
    return %c0_i32, %c0_i32_0 : i32, i32
  }
}

</mosaic_0001>

<bundles_post_ra>
// kernel: tpu_custom_call.1
= control target key start
LH: loop header
LB: loop body
LE: loop exit
PB: predicated region body
PF: predicated region fallthrough
CT: control target
= control target key end

     0   :  { %14 = vsyncpa [#allocation3], 0  ;;  %s4352_s0 = inlined_call_operand.hbm [shape: f32[128,128], index: 0, kind: input, shape index: {}]   ;;  %s4353_s1 = inlined_call_operand.hbm [shape: bf16[128,384], index: 1, kind: input, shape index: {}]   ;;  %s4354_s2 = inlined_call_operand.hbm [shape: f32[128,128], index: 2, kind: input, shape index: {}]   ;;  %s4355_s3 = inlined_call_operand.hbm [shape: bf16[128,128], index: 3, kind: input, shape index: {}]   ;;  %s4356_s4 = inlined_call_operand.vmem [shape: f32[1,128], index: 4, kind: input, shape index: {}]   ;;  %s4357_s5 = inlined_call_operand.hbm [shape: bf16[128,128], index: 5, kind: input, shape index: {}]   ;;  %s4358_s6 = inlined_call_operand.vmem [shape: f32[1,128], index: 6, kind: input, shape index: {}]   ;;  %s4359_s7 = inlined_call_operand.hbm [shape: bf16[128,128], index: 7, kind: input, shape index: {}]   ;;  %s4360_s8 = inlined_call_operand.vmem [shape: f32[1,128], index: 8, kind: input, shape index: {}]   ;;  %s4361_s9 = inlined_call_operand.hbm [shape: f32[128,128], index: 9, kind: output, shape index: {}]  }
   0x1   :  { %15 = vsyncpa [#allocation6], 0 }
   0x2   :  { %16 = vsyncpa [#allocation9], 0 }
   0x3   :  { %17 = vsyncpa [#allocation12], 0  ;;  %s36_s11 = sshll.u32 %s4353_s1, 4  ;;  %s37_s11 = int_to_ptr.hbm [resolvable:$true] %s36_s11 }
   0x4   :  { %18 = vsyncpa [#allocation4], 0  ;;  %s3416_s12 = smov [#allocation5]   ;;  %s62_s16 = sshll.u32 %s4355_s3, 4  ;;  %s63_s16 = int_to_ptr.hbm [resolvable:$true] %s62_s16 }
   0x5   :  { %s38_s13 = sshll.u32 %s3416_s12, 4  ;;  %s3417_s17 = smov 192   ;;  %s39_s13 = int_to_ptr.vmem [resolvable:$true] %s38_s13 }
   0x6   :  { %s3418_s18 = smov 12   ;;  %s3419_s19 = smov [#allocation8]  }
   0x7   :  { %44 = dma.hbm_to_vmem [thread:$0]  %s37_s11, 3072, %s39_s13, [#allocation6], %s3417_s17, %s3417_s17, %s3418_s18  }
   0x8   :  { %s64_s20 = sshll.u32 %s3419_s19, 4  ;;  %s3420_s21 = smov 64   ;;  %s65_s20 = int_to_ptr.vmem [resolvable:$true] %s64_s20 }
   0x9   :  { %s3421_s22 = smov 4   ;;  %s23_s24 = sshll.u32 %s4352_s0, 4  ;;  %s24_s24 = int_to_ptr.hbm [resolvable:$true] %s23_s24 }
   0xa   :  { %70 = dma.hbm_to_vmem [thread:$0]  %s63_s16, 1024, %s65_s20, [#allocation9], %s3420_s21, %s3420_s21, %s3421_s22  }
   0xb   :  { %s3422_s25 = smov [#allocation2]   ;;  %s49_s28 = sshll.u32 %s4354_s2, 4  ;;  %s50_s28 = int_to_ptr.hbm [resolvable:$true] %s49_s28 }
   0xc   :  { %s25_s3 = sshll.u32 %s3422_s25, 4  ;;  %s3423_s29 = smov 128   ;;  %s26_s3 = int_to_ptr.vmem [resolvable:$true] %s25_s3 }
   0xd   :  { %s3424_s30 = smov 8   ;;  %s3425_s10 = smov [#allocation7]  }
   0xe   :  { %31 = dma.hbm_to_vmem [thread:$0]  %s24_s24, 2048, %s26_s3, [#allocation3], %s3423_s29, %s3423_s29, %s3424_s30  }
   0xf   :  { %s51_s11 = sshll.u32 %s3425_s10, 4  ;;  %s77_s0 = sshll.u32 %s4357_s5, 4  ;;  %s52_s11 = int_to_ptr.vmem [resolvable:$true] %s51_s11  ;;  %s78_s0 = int_to_ptr.hbm [resolvable:$true] %s77_s0 }
  0x10   :  { %57 = dma.hbm_to_vmem [thread:$0]  %s50_s28, 2048, %s52_s11, [#allocation6], %s3423_s29, %s3423_s29, %s3424_s30  }
  0x11   :  { %s92_s15 = sshll.u32 %s4359_s7, 4  ;;  %s3426_s16 = smov [#allocation10]   ;;  %s93_s15 = int_to_ptr.hbm [resolvable:$true] %s92_s15 }
  0x12   :  { %s79_s17 = sshll.u32 %s3426_s16, 4  ;;  %s3427_s18 = smov [#allocation11]   ;;  %s80_s17 = int_to_ptr.vmem [resolvable:$true] %s79_s17 }
  0x13   :  { %85 = dma.hbm_to_vmem [thread:$0]  %s78_s0, 1024, %s80_s17, [#allocation9], %s3420_s21, %s3420_s21, %s3421_s22  }
  0x14   :  { %s94_s5 = sshll.u32 %s3427_s18, 4  ;;  %s95_s5 = int_to_ptr.vmem [resolvable:$true] %s94_s5 }
  0x15   :  { %100 = dma.hbm_to_vmem [thread:$0]  %s93_s15, 1024, %s95_s5, [#allocation12], %s3420_s21, %s3420_s21, %s3421_s22  }
  0x16   :  { %3406 = dma.done.wait [#allocation3], 2048  }
  0x17   :  { %3407 = vsyncadd [#allocation3], 4294965248 }
  0x18   :  { %3408 = dma.done.wait [#allocation6], 5120  }
  0x19   :  { %3409 = vsyncadd [#allocation6], 4294962176 }
  0x1a   :  { %3410 = dma.done.wait [#allocation9], 2048  }
  0x1b   :  { %3411 = vsyncadd [#allocation9], 4294965248 }
  0x1c   :  { %3412 = dma.done.wait [#allocation12], 1024  }
  0x1d   :  { %3413 = vsyncadd [#allocation12], 4294966272  ;;  %v3512_v0 = vld [vmem:[#allocation2 + $0x20] sm:$0xff]  ;;  %v3514_v1 = vld [vmem:[#allocation2 + $0x10] sm:$0xff]  ;;  %s2629_s24 = sshll.u32 %s4361_s9, 4  ;;  %s2630_s24 = int_to_ptr.hbm [resolvable:$true] %s2629_s24 }
  0x1e   :  { %v3516_v2 = vld [vmem:[#allocation2] sm:$0xff]  ;;  %v148_v3 = vmul.f32 %v3512_v0, %v3512_v0  ;;  %v146_v4 = vmul.f32 %v3514_v1, %v3514_v1  ;;  %v3524_v6 = vld [vmem:[#allocation2 + $0x28] sm:$0xff]  ;;  %v3526_v7 = vld [vmem:[#allocation2 + $0x18] sm:$0xff] }
  0x1f   :  { %v144_v5 = vmul.f32 %v3516_v2, %v3516_v2  ;;  %v3528_v8 = vld [vmem:[#allocation2 + $0x8] sm:$0xff]  ;;  %v149_v9 = vmul.f32 %v3524_v6, %v3524_v6  ;;  %v147_v10 = vmul.f32 %v3526_v7, %v3526_v7  ;;  %v3536_v12 = vld [vmem:[#allocation2 + $0x38] sm:$0xff]  ;;  %v3538_v13 = vld [vmem:[#allocation2 + $0x40] sm:$0xff] }
  0x20   :  { %168 = vadd.xlane.f32.xlu2 %v148_v3  ;;  %164 = vadd.xlane.f32.xlu1 %v146_v4  ;;  %v145_v11 = vmul.f32 %v3528_v8, %v3528_v8  ;;  %v3540_v14 = vld [vmem:[#allocation2 + $0x30] sm:$0xff]  ;;  %v151_v15 = vmul.f32 %v3536_v12, %v3536_v12  ;;  %v152_v16 = vmul.f32 %v3538_v13, %v3538_v13  ;;  %v3548_v18 = vld [vmem:[#allocation2 + $0x58] sm:$0xff]  ;;  %v3552_v20 = vld [vmem:[#allocation2 + $0x48] sm:$0xff] }
  0x21   :  { %160 = vadd.xlane.f32.xlu0 %v144_v5  ;;  %v150_v17 = vmul.f32 %v3540_v14, %v3540_v14  ;;  %v3550_v19 = vld [vmem:[#allocation2 + $0x50] sm:$0xff]  ;;  %v155_v21 = vmul.f32 %v3548_v18, %v3548_v18  ;;  %v153_v23 = vmul.f32 %v3552_v20, %v3552_v20  ;;  %v3560_v24 = vld [vmem:[#allocation2 + $0x68] sm:$0xff]  ;;  %v3564_v26 = vld [vmem:[#allocation2 + $0x60] sm:$0xff] }
  0x22   :  { %v154_v22 = vmul.f32 %v3550_v19, %v3550_v19  ;;  %v3562_v25 = vld [vmem:[#allocation2 + $0x70] sm:$0xff]  ;;  %v157_v27 = vmul.f32 %v3560_v24, %v3560_v24  ;;  %v156_v29 = vmul.f32 %v3564_v26, %v3564_v26  ;;  %v3572_v30 = vld [vmem:[#allocation2 + $0x78] sm:$0xff]  ;;  %v2731_v32 = vld [vmem:[#allocation5 + $0xa8] sm:$0xf] }
  0x23   :  { %v158_v28 = vmul.f32 %v3562_v25, %v3562_v25  ;;  %v159_v31 = vmul.f32 %v3572_v30, %v3572_v30  ;;  %v2875_v33 = vld [vmem:[#allocation5 + $0xb0] sm:$0xf0]  ;;  %v2874_v34 = vld [vmem:[#allocation5 + $0xac] sm:$0xf]  ;;  %v2733_v36 = vld [vmem:[#allocation5 + $0xb4] sm:$0xf0] }
  0x24   :  { %v2732_v35 = vor.u32 %v2875_v33, %v2731_v32  ;;  %v2739_v37 = vld [vmem:[#allocation5 + $0xb0] sm:$0xf]  ;;  %v2876_v38 = vld [vmem:[#allocation5 + $0xb8] sm:$0xf0]  ;;  %v3576_v39 = vor.u32 %v2874_v34, %v2733_v36  ;;  %v2871_v43 = vld [vmem:[#allocation5 + $0x94] sm:$0xf] }
  0x25   :  { %v2740_v40 = vor.u32 %v2876_v38, %v2739_v37  ;;  %v2719_v41 = vld [vmem:[#allocation5 + $0x90] sm:$0xf]  ;;  %v2872_v42 = vld [vmem:[#allocation5 + $0x98] sm:$0xf0]  ;;  %v2721_v45 = vld [vmem:[#allocation5 + $0x9c] sm:$0xf0] }
  0x26   :  { %616 = vmatpush.bf16.msra.mxu0 %v2732_v35  ;;  %2901 = vmatpush.bf16.msra.mxu1 %v3576_v39  ;;  %v2720_v44 = vor.u32 %v2872_v42, %v2719_v41  ;;  %v2727_v46 = vld [vmem:[#allocation5 + $0x98] sm:$0xf]  ;;  %v2873_v47 = vld [vmem:[#allocation5 + $0xa0] sm:$0xf0]  ;;  %v3579_v48 = vor.u32 %v2871_v43, %v2721_v45  ;;  %v2868_v52 = vld [vmem:[#allocation5 + $0x7c] sm:$0xf] }
  0x27   :  { %714 = vmatpush.bf16.msra.mxu2 %v2740_v40  ;;  %v2728_v49 = vor.u32 %v2873_v47, %v2727_v46  ;;  %v2707_v50 = vld [vmem:[#allocation5 + $0x78] sm:$0xf]  ;;  %v2869_v51 = vld [vmem:[#allocation5 + $0x80] sm:$0xf0]  ;;  %v2709_v54 = vld [vmem:[#allocation5 + $0x84] sm:$0xf0] }
  0x28   :  { %170 = vadd.xlane.f32.xlu2 %v149_v9  ;;  %166 = vadd.xlane.f32.xlu1 %v147_v10  ;;  %v2708_v53 = vor.u32 %v2869_v51, %v2707_v50  ;;  %v2715_v55 = vld [vmem:[#allocation5 + $0x80] sm:$0xf]  ;;  %v2870_v56 = vld [vmem:[#allocation5 + $0x88] sm:$0xf0]  ;;  %v3582_v57 = vor.u32 %v2868_v52, %v2709_v54  ;;  %v2865_v61 = vld [vmem:[#allocation5 + $0x64] sm:$0xf] }
  0x29   :  { %162 = vadd.xlane.f32.xlu0 %v145_v11  ;;  %v2716_v58 = vor.u32 %v2870_v56, %v2715_v55  ;;  %v2695_v59 = vld [vmem:[#allocation5 + $0x60] sm:$0xf]  ;;  %v2866_v60 = vld [vmem:[#allocation5 + $0x68] sm:$0xf0]  ;;  %v2697_v63 = vld [vmem:[#allocation5 + $0x6c] sm:$0xf0] }
  0x2a   :  { %617 = vmatpush.bf16.msra.mxu0 %v2720_v44  ;;  %2902 = vmatpush.bf16.msra.mxu1 %v3579_v48  ;;  %v2696_v62 = vor.u32 %v2866_v60, %v2695_v59  ;;  %v2703_v3 = vld [vmem:[#allocation5 + $0x68] sm:$0xf]  ;;  %v2867_v4 = vld [vmem:[#allocation5 + $0x70] sm:$0xf0]  ;;  %v3585_v5 = vor.u32 %v2865_v61, %v2697_v63  ;;  %v2860_v33 = vld [vmem:[#allocation5 + $0x38] sm:$0xf0] }
  0x2b   :  { %715 = vmatpush.bf16.msra.mxu2 %v2728_v49  ;;  %v2704_v9 = vor.u32 %v2867_v4, %v2703_v3  ;;  %v2683_v10 = vld [vmem:[#allocation5 + $0x48] sm:$0xf]  ;;  %v2863_v11 = vld [vmem:[#allocation5 + $0x50] sm:$0xf0]  ;;  %v2673_v35 = vld [vmem:[#allocation5 + $0x3c] sm:$0xf0] }
  0x2c   :  { %v2859_v34 = vld [vmem:[#allocation5 + $0x34] sm:$0xf]  ;;  %v2679_v37 = vld [vmem:[#allocation5 + $0x38] sm:$0xf]  ;;  %v2861_v38 = vld [vmem:[#allocation5 + $0x40] sm:$0xf0] }
  0x2d   :  { %v3600_v40 = vor.u32 %v2859_v34, %v2673_v35  ;;  %v2680_v41 = vor.u32 %v2861_v38, %v2679_v37  ;;  %v2659_v43 = vld [vmem:[#allocation5 + $0x18] sm:$0xf]  ;;  %v2857_v44 = vld [vmem:[#allocation5 + $0x20] sm:$0xf0]  ;;  %v2856_v56 = vld [vmem:[#allocation5 + $0x1c] sm:$0xf] }
  0x2e   :  { %618 = vmatpush.bf16.msra.mxu0 %v2708_v53  ;;  %2903 = vmatpush.bf16.msra.mxu1 %v3582_v57  ;;  %v2660_v50 = vor.u32 %v2857_v44, %v2659_v43  ;;  %v2667_v60 = vld [vmem:[#allocation5 + $0x20] sm:$0xf]  ;;  %v2858_v61 = vld [vmem:[#allocation5 + $0x28] sm:$0xf0] }
  0x2f   :  { %716 = vmatpush.bf16.msra.mxu2 %v2716_v58  ;;  %v2661_v58 = vld [vmem:[#allocation5 + $0x24] sm:$0xf0]  ;;  %v2854_v4 = vld [vmem:[#allocation5 + $0x8] sm:$0xf0] }
  0x30   :  { %174 = vadd.xlane.f32.xlu1 %v151_v15  ;;  %176 = vadd.xlane.f32.xlu2 %v152_v16 }
  0x31   :  { %172 = vadd.xlane.f32.xlu0 %v150_v17  ;;  %v2684_v17 = vor.u32 %v2863_v11, %v2683_v10  ;;  %v3619_v10 = vor.u32 %v2856_v56, %v2661_v58  ;;  %v2649_v11 = vld [vmem:[#allocation5 + $0xc] sm:$0xf0] }
  0x32   :  { %619 = vmatpush.bf16.msra.mxu0 %v2696_v62  ;;  %2904 = vmatpush.bf16.msra.mxu1 %v3585_v5  ;;  %v2647_v62 = vld [vmem:[#allocation5] sm:$0xf] }
  0x33   :  { %717 = vmatpush.bf16.msra.mxu2 %v2704_v9  ;;  %v2853_v9 = vld [vmem:[#allocation5 + $0x4] sm:$0xf] }
  0x34   :  { %v3623_v34 = vor.u32 %v2853_v9, %v2649_v11 }
  0x36   :  { %620 = vmatpush.bf16.msra.mxu0 %v2684_v17 }
  0x38   :  { %182 = vadd.xlane.f32.xlu2 %v155_v21  ;;  %180 = vadd.xlane.f32.xlu1 %v154_v22  ;;  %v2862_v21 = vld [vmem:[#allocation5 + $0x4c] sm:$0xf] }
  0x39   :  { %178 = vadd.xlane.f32.xlu0 %v153_v23  ;;  %v2685_v23 = vld [vmem:[#allocation5 + $0x54] sm:$0xf0] }
  0x40   :  { %186 = vadd.xlane.f32.xlu1 %v157_v27  ;;  %188 = vadd.xlane.f32.xlu2 %v158_v28  ;;  %v2691_v27 = vld [vmem:[#allocation5 + $0x50] sm:$0xf]  ;;  %v2864_v28 = vld [vmem:[#allocation5 + $0x58] sm:$0xf0] }
  0x41   :  { %184 = vadd.xlane.f32.xlu0 %v156_v29  ;;  %v2671_v29 = vld [vmem:[#allocation5 + $0x30] sm:$0xf]  ;;  %v2692_v32 = vor.u32 %v2864_v28, %v2691_v27  ;;  %v2648_v27 = vor.u32 %v2854_v4, %v2647_v62  ;;  %v2655_v28 = vld [vmem:[#allocation5 + $0x8] sm:$0xf] }
  0x42   :  { %v2672_v36 = vor.u32 %v2860_v33, %v2671_v29  ;;  %v2855_v29 = vld [vmem:[#allocation5 + $0x10] sm:$0xf0] }
  0x43   :  { %718 = vmatpush.bf16.msra.mxu2 %v2692_v32  ;;  %v2656_v43 = vor.u32 %v2855_v29, %v2655_v28 }
  0x44   :  { %621 = vmatpush.bf16.msra.mxu0 %v2672_v36 }
  0x47   :  { %719 = vmatpush.bf16.msra.mxu2 %v2680_v41 }
  0x48   :  { %622 = vmatpush.bf16.msra.mxu0 %v2660_v50 }
  0x49   :  { %190 = vadd.xlane.f32.xlu0 %v159_v31  ;;  %v3597_v31 = vor.u32 %v2862_v21, %v2685_v23  ;;  %v2668_v23 = vor.u32 %v2858_v61, %v2667_v60 }
  0x4b   :  { %2905 = vmatpush.bf16.msra.mxu1 %v3597_v31  ;;  %720 = vmatpush.bf16.msra.mxu2 %v2668_v23 }
  0x4c   :  { %623 = vmatpush.bf16.msra.mxu0 %v2648_v27 }
  0x4f   :  { %2906 = vmatpush.bf16.msra.mxu1 %v3600_v40  ;;  %721 = vmatpush.bf16.msra.mxu2 %v2656_v43 }
  0x50   :  { %665 = vmatpush.bf16.msrb.mxu0 %v3576_v39 }
  0x53   :  { %2907 = vmatpush.bf16.msra.mxu1 %v3619_v10 }
  0x54   :  { %666 = vmatpush.bf16.msrb.mxu0 %v3579_v48 }
  0x57   :  { %2908 = vmatpush.bf16.msra.mxu1 %v3623_v34 }
  0x58   :  { %667 = vmatpush.bf16.msrb.mxu0 %v3582_v57 }
  0x5c   :  { %668 = vmatpush.bf16.msrb.mxu0 %v3585_v5 }
  0x60   :  { %669 = vmatpush.bf16.msrb.mxu0 %v3597_v31 }
  0x64   :  { %670 = vmatpush.bf16.msrb.mxu0 %v3600_v40 }
  0x68   :  { %671 = vmatpush.bf16.msrb.mxu0 %v3619_v10 }
  0x6c   :  { %672 = vmatpush.bf16.msrb.mxu0 %v3623_v34 }
  0x93   :  { %v3588_v15 = vpop.xlane.xlu2 %168  ;;  %v3590_v16 = vpop.xlane.xlu1 %164 }
  0x94   :  { %2934 = vrsqrt.f32 %v3588_v15  ;;  %v3593_v22 = vpop.xlane.xlu0 %160  ;;  %vm247_vm0 = vcmp.eq.f32.partialorder %v3588_v15, inf  ;;  %vm249_vm1 = vcmp.eq.f32.partialorder %v3588_v15, 0.0  ;;  %v250_v44 = vand.u32 2147483648, %v3588_v15 }
  0x95   :  { %2936 = vrsqrt.f32 %v3590_v16  ;;  %vm199_vm2 = vcmp.eq.f32.partialorder %v3593_v22, inf  ;;  %vm201_vm3 = vcmp.eq.f32.partialorder %v3593_v22, 0.0  ;;  %v202_v62 = vand.u32 2147483648, %v3593_v22 }
  0x96   :  { %2938 = vrsqrt.f32 %v3593_v22  ;;  %vm223_vm7 = vcmp.eq.f32.partialorder %v3590_v16, inf  ;;  %vm225_vm11 = vcmp.eq.f32.partialorder %v3590_v16, 0.0 }
  0x9a   :  { %v2935_v42 = vpop.eup %2934 }
  0x9b   :  { %v3602_v45 = vpop.eup %2936  ;;  %v241_v46 = vmul.f32 %v2935_v42, %v3588_v15  ;;  %v3605_v47 = vpop.xlane.xlu2 %170 }
  0x9c   :  { %v3607_v49 = vpop.xlane.xlu1 %166  ;;  %v2939_v51 = vpop.eup %2938  ;;  %v217_v52 = vmul.f32 %v3602_v45, %v3590_v16  ;;  %2940 = vrsqrt.f32 %v3605_v47  ;;  %vm259_vm4 = vcmp.eq.f32.partialorder %v3605_v47, inf  ;;  %vm261_vm5 = vcmp.eq.f32.partialorder %v3605_v47, 0.0 }
  0x9d   :  { %v3612_v53 = vpop.xlane.xlu0 %162  ;;  %v242_v54 = vmul.f32 %v2935_v42, %v241_v46  ;;  %v193_v55 = vmul.f32 %v2939_v51, %v3593_v22  ;;  %2942 = vrsqrt.f32 %v3607_v49  ;;  %v262_v11 = vand.u32 2147483648, %v3605_v47 }
  0x9e   :  { %v218_v59 = vmul.f32 %v3602_v45, %v217_v52  ;;  %2944 = vrsqrt.f32 %v3612_v53  ;;  %v226_v52 = vand.u32 2147483648, %v3590_v16  ;;  %v238_v23 = vand.u32 2147483648, %v3607_v49 }
  0x9f   :  { %v243_v63 = vmul.f32 0.5, %v242_v54  ;;  %v194_v3 = vmul.f32 %v2939_v51, %v193_v55  ;;  %vm211_vm6 = vcmp.eq.f32.partialorder %v3612_v53, inf  ;;  %vm213_vm8 = vcmp.eq.f32.partialorder %v3612_v53, 0.0 }
  0xa0   :  { %v219_v33 = vmul.f32 0.5, %v218_v59  ;;  %v214_v43 = vand.u32 2147483648, %v3612_v53  ;;  %vm235_vm9 = vcmp.eq.f32.partialorder %v3607_v49, inf  ;;  %vm237_vm12 = vcmp.eq.f32.partialorder %v3607_v49, 0.0 }
  0xa1   :  { %v244_v17 = vsub.f32 1.5, %v243_v63  ;;  %v195_v21 = vmul.f32 0.5, %v194_v3 }
  0xa2   :  { %v2941_v32 = vpop.eup %2940  ;;  %v220_v56 = vsub.f32 1.5, %v219_v33 }
  0xa3   :  { %v3625_v35 = vpop.eup %2942  ;;  %v245_v36 = vmul.f32 %v2935_v42, %v244_v17  ;;  %v196_v37 = vsub.f32 1.5, %v195_v21  ;;  %v253_v38 = vmul.f32 %v2941_v32, %v3605_v47 }
  0xa4   :  { %v3628_v41 = vpop.xlane.xlu1 %174  ;;  %v229_v46 = vmul.f32 %v3625_v35, %v3607_v49  ;;  %v2945_v42 = vpop.eup %2944  ;;  %v221_v21 = vmul.f32 %v3602_v45, %v220_v56 }
  0xa5   :  { %2946 = vrsqrt.f32 %v3628_v41  ;;  %v3635_v50 = vpop.xlane.xlu0 %172  ;;  %v197_v54 = vmul.f32 %v2939_v51, %v196_v37  ;;  %v254_v55 = vmul.f32 %v2941_v32, %v253_v38  ;;  %v205_v59 = vmul.f32 %v2945_v42, %v3612_v53  ;;  %v3647_v51 = vpop.xlane.xlu2 %176 }
  0xa6   :  { %v230_v58 = vmul.f32 %v3625_v35, %v229_v46  ;;  %v246_v60 = vmul.f32 %v245_v36, %v3588_v15  ;;  %2948 = vrsqrt.f32 %v3635_v50  ;;  %vm283_vm10 = vcmp.eq.f32.partialorder %v3628_v41, inf }
  0xa7   :  { %v198_v39 = vmul.f32 %v197_v54, %v3593_v22  ;;  %v255_v61 = vmul.f32 0.5, %v254_v55  ;;  %v206_v3 = vmul.f32 %v2945_v42, %v205_v59  ;;  %2950 = vrsqrt.f32 %v3647_v51 }
  0xa8   :  { %v231_v63 = vmul.f32 0.5, %v230_v58  ;;  %v248_v48 = vsel %vm247_vm0, %v3588_v15, %v246_v60  ;;  %v222_v54 = vmul.f32 %v221_v21, %v3590_v16  ;;  %v286_v59 = vand.u32 2147483648, %v3628_v41 }
  0xa9   :  { %v200_v4 = vsel %vm199_vm2, %v3593_v22, %v198_v39  ;;  %v256_v9 = vsub.f32 1.5, %v255_v61  ;;  %v207_v27 = vmul.f32 0.5, %v206_v3  ;;  %v251_v58 = vsel %vm249_vm1, %v250_v44, %v248_v48 }
  0xaa   :  { %v232_v33 = vsub.f32 1.5, %v231_v63  ;;  %v203_v37 = vsel %vm201_vm3, %v202_v62, %v200_v4  ;;  %vm285_vm13 = vcmp.eq.f32.partialorder %v3628_v41, 0.0  ;;  %vm271_vm14 = vcmp.eq.f32.partialorder %v3635_v50, inf }
  0xab   :  { %v2947_v17 = vpop.eup %2946  ;;  %v257_v28 = vmul.f32 %v2941_v32, %v256_v9  ;;  %v208_v36 = vsub.f32 1.5, %v207_v27  ;;  %v384_v60 = vmul.f32 0.17677669, %v203_v37  ;;  %v388_v9 = vmul.f32 0.17677669, %v251_v58 }
  0xac   :  { %v277_v29 = vmul.f32 %v2947_v17, %v3628_v41  ;;  %v2949_v38 = vpop.eup %2948  ;;  %v233_v62 = vmul.f32 %v3625_v35, %v232_v33  ;;  %v224_v37 = vsel %vm223_vm7, %v3590_v16, %v222_v54  ;;  %vm273_vm15 = vcmp.eq.f32.partialorder %v3635_v50, 0.0 }
  0xad   :  { %v3667_v45 = vpop.xlane.xlu0 %178  ;;  %v258_v32 = vmul.f32 %v257_v28, %v3605_v47  ;;  %v209_v55 = vmul.f32 %v2945_v42, %v208_v36  ;;  %v265_v56 = vmul.f32 %v2949_v38, %v3635_v50  ;;  %v3683_v39 = vpop.xlane.xlu2 %182  ;;  %v400_v4 = vadd.f32 1e-08, %v384_v60 }
  0xae   :  { %v278_v46 = vmul.f32 %v2947_v17, %v277_v29  ;;  %2952 = vrsqrt.f32 %v3667_v45  ;;  %v2951_v61 = vpop.eup %2950  ;;  %v404_v36 = vadd.f32 1e-08, %v388_v9  ;;  %vm295_vm0 = vcmp.eq.f32.partialorder %v3647_v51, inf }
  0xaf   :  { %v260_v57 = vsel %vm259_vm4, %v3605_v47, %v258_v32  ;;  %v210_v42 = vmul.f32 %v209_v55, %v3612_v53  ;;  %v266_v15 = vmul.f32 %v2949_v38, %v265_v56  ;;  %v289_v3 = vmul.f32 %v2951_v61, %v3647_v51 }
  0xb0   :  { %v279_v22 = vmul.f32 0.5, %v278_v46  ;;  %v263_v44 = vsel %vm261_vm5, %v262_v11, %v260_v57  ;;  %2954 = vrsqrt.f32 %v3683_v39  ;;  %vm297_vm1 = vcmp.eq.f32.partialorder %v3647_v51, 0.0 }
  0xb1   :  { %v212_v35 = vsel %vm211_vm6, %v3612_v53, %v210_v42  ;;  %v267_v21 = vmul.f32 0.5, %v266_v15  ;;  %v389_v27 = vmul.f32 0.17677669, %v263_v44  ;;  %v290_v5 = vmul.f32 %v2951_v61, %v289_v3 }
  0xb2   :  { %v280_v63 = vsub.f32 1.5, %v279_v22  ;;  %v215_v11 = vsel %vm213_vm8, %v214_v43, %v212_v35  ;;  %2956 = vrcp.f32 %v400_v4  ;;  %v3708_v43 = vpop.xlane.xlu1 %180  ;;  %v274_v22 = vand.u32 2147483648, %v3635_v50 }
  0xb3   :  { %v268_v28 = vsub.f32 1.5, %v267_v21  ;;  %v385_v33 = vmul.f32 0.17677669, %v215_v11  ;;  %v291_v32 = vmul.f32 0.5, %v290_v5  ;;  %v405_v46 = vadd.f32 1e-08, %v389_v27 }
  0xb4   :  { %v2953_v48 = vpop.eup %2952  ;;  %v281_v47 = vmul.f32 %v2947_v17, %v280_v63  ;;  %v234_v17 = vmul.f32 %v233_v62, %v3607_v49  ;;  %2958 = vrcp.f32 %v404_v36  ;;  %v298_v3 = vand.u32 2147483648, %v3647_v51 }
  0xb5   :  { %v301_v29 = vmul.f32 %v2953_v48, %v3667_v45  ;;  %v269_v55 = vmul.f32 %v2949_v38, %v268_v28  ;;  %v401_v53 = vadd.f32 1e-08, %v385_v33  ;;  %v292_v57 = vsub.f32 1.5, %v291_v32 }
  0xb6   :  { %v282_v58 = vmul.f32 %v281_v47, %v3628_v41  ;;  %2960 = vrcp.f32 %v405_v46  ;;  %v3712_v31 = vpop.eup %2954  ;;  %v236_v62 = vsel %vm235_vm9, %v3607_v49, %v234_v17  ;;  %vm307_vm2 = vcmp.eq.f32.partialorder %v3667_v45, inf }
  0xb7   :  { %v302_v56 = vmul.f32 %v2953_v48, %v301_v29  ;;  %v270_v54 = vmul.f32 %v269_v55, %v3635_v50  ;;  %2962 = vrcp.f32 %v401_v53  ;;  %v293_v42 = vmul.f32 %v2951_v61, %v292_v57  ;;  %v3770_v53 = vpop.xlane.xlu0 %184 }
  0xb8   :  { %v2957_v38 = vpop.eup %2956  ;;  %2964 = vrsqrt.f32 %v3708_v43  ;;  %v325_v63 = vmul.f32 %v3712_v31, %v3683_v39  ;;  %v284_v40 = vsel %vm283_vm10, %v3628_v41, %v282_v58  ;;  %v227_v61 = vsel %vm225_vm11, %v226_v52, %v224_v37 }
  0xb9   :  { %v303_v60 = vmul.f32 0.5, %v302_v56  ;;  %v272_v15 = vsel %vm271_vm14, %v3635_v50, %v270_v54  ;;  %v239_v9 = vsel %vm237_vm12, %v238_v23, %v236_v62  ;;  %v386_v35 = vmul.f32 0.17677669, %v227_v61 }
  0xba   :  { %v2959_v50 = vpop.eup %2958  ;;  %v275_v21 = vsel %vm273_vm15, %v274_v22, %v272_v15  ;;  %v294_v47 = vmul.f32 %v293_v42, %v3647_v51  ;;  %v432_v5 = vmul.f32 %v2957_v38, %v3516_v2  ;;  %v387_v16 = vmul.f32 0.17677669, %v239_v9 }
  0xbb   :  { %v304_v44 = vsub.f32 1.5, %v303_v60  ;;  %v436_v11 = vmul.f32 %v2959_v50, %v3512_v0  ;;  %v326_v28 = vmul.f32 %v3712_v31, %v325_v63  ;;  %v402_v29 = vadd.f32 1e-08, %v386_v35  ;;  %v3751_v0 = vpop.xlane.xlu1 %186  ;;  %v3779_v35 = vpop.xlane.xlu2 %188 }
  0xbc   :  { %v2961_v27 = vpop.eup %2960  ;;  %v287_v49 = vsel %vm285_vm13, %v286_v59, %v284_v40  ;;  %v403_v2 = vadd.f32 1e-08, %v387_v16  ;;  %v390_v36 = vmul.f32 0.17677669, %v275_v21  ;;  %v296_v41 = vsel %vm295_vm0, %v3647_v51, %v294_v47 }
  0xbd   :  { %v305_v4 = vmul.f32 %v2953_v48, %v304_v44  ;;  %v2963_v52 = vpop.eup %2962  ;;  %v437_v48 = vmul.f32 %v2961_v27, %v3524_v6  ;;  %v310_v6 = vand.u32 2147483648, %v3667_v45  ;;  %2966 = vrcp.f32 %v402_v29 }
  0xbe   :  { %v2965_v10 = vpop.eup %2964  ;;  %v433_v33 = vmul.f32 %v2963_v52, %v3528_v8  ;;  %v391_v8 = vmul.f32 0.17677669, %v287_v49  ;;  %v327_v32 = vmul.f32 0.5, %v326_v28  ;;  %v406_v55 = vadd.f32 1e-08, %v390_v36 }
  0xbf   :  { %v306_v23 = vmul.f32 %v305_v4, %v3667_v45  ;;  %v3755_v37 = vpack.c.bf16 %v437_v48, %v436_v11  ;;  %v313_v17 = vmul.f32 %v2965_v10, %v3708_v43  ;;  %2968 = vrsqrt.f32 %v3751_v0  ;;  %v3790_v52 = vpop.xlane.xlu0 %190 }
  0xc0   :  { %v3762_v59 = vpack.c.bf16 %v433_v33, %v432_v5  ;;  %vm309_vm3 = vcmp.eq.f32.partialorder %v3667_v45, 0.0  ;;  %2970 = vrcp.f32 %v403_v2  ;;  %v407_v34 = vadd.f32 1e-08, %v391_v8 }
  0xc1   :  { %683 = vmatmul.bf16.vlgmr.msra.gmra.mxu1 %v3755_v37  ;;  %v314_v46 = vmul.f32 %v2965_v10, %v313_v17  ;;  %v308_v56 = vsel %vm307_vm2, %v3667_v45, %v306_v23  ;;  %2972 = vrcp.f32 %v406_v55  ;;  %v299_v57 = vsel %vm297_vm1, %v298_v3, %v296_v41 }
  0xc2   :  { %624 = vmatmul.bf16.vlgmr.msra.gmra.mxu0 %v3762_v59  ;;  %722 = vmatmul.bf16.vlgmr.msra.gmra.mxu2 %v3762_v59  ;;  %2974 = vrcp.f32 %v407_v34  ;;  %v328_v54 = vsub.f32 1.5, %v327_v32  ;;  %v311_v60 = vsel %vm309_vm3, %v310_v6, %v308_v56  ;;  %v392_v62 = vmul.f32 0.17677669, %v299_v57 }
  0xc3   :  { %v315_v58 = vmul.f32 0.5, %v314_v46  ;;  %2976 = vrsqrt.f32 %v3770_v53  ;;  %v2967_v45 = vpop.eup %2966  ;;  %v393_v15 = vmul.f32 0.17677669, %v311_v60  ;;  %vm319_vm4 = vcmp.eq.f32.partialorder %v3708_v43, inf }
  0xc4   :  { %v329_v63 = vmul.f32 %v3712_v31, %v328_v54  ;;  %v408_v9 = vadd.f32 1e-08, %v392_v62  ;;  %v434_v11 = vmul.f32 %v2967_v45, %v3514_v1  ;;  %2978 = vrsqrt.f32 %v3779_v35 }
  0xc5   :  { %v316_v22 = vsub.f32 1.5, %v315_v58  ;;  %v2969_v38 = vpop.eup %2968  ;;  %v409_v47 = vadd.f32 1e-08, %v393_v15  ;;  %vm331_vm5 = vcmp.eq.f32.partialorder %v3683_v39, inf  ;;  %v322_v48 = vand.u32 2147483648, %v3708_v43 }
  0xc6   :  { %v2971_v42 = vpop.eup %2970  ;;  %v349_v51 = vmul.f32 %v2969_v38, %v3751_v0  ;;  %v330_v5 = vmul.f32 %v329_v63, %v3683_v39  ;;  %2980 = vrcp.f32 %v408_v9  ;;  %vm321_vm6 = vcmp.eq.f32.partialorder %v3708_v43, 0.0 }
  0xc7   :  { %v2973_v44 = vpop.eup %2972  ;;  %v317_v40 = vmul.f32 %v2965_v10, %v316_v22  ;;  %v435_v21 = vmul.f32 %v2971_v42, %v3526_v7  ;;  %v334_v7 = vand.u32 2147483648, %v3683_v39  ;;  %2982 = vrcp.f32 %v409_v47 }
  0xc8   :  { %v2975_v61 = vpop.eup %2974  ;;  %v438_v50 = vmul.f32 %v2973_v44, %v3540_v14  ;;  %v350_v16 = vmul.f32 %v2969_v38, %v349_v51  ;;  %2984 = vrsqrt.f32 %v3790_v52  ;;  %v332_v49 = vsel %vm331_vm5, %v3683_v39, %v330_v5 }
  0xc9   :  { %v2977_v3 = vpop.eup %2976  ;;  %v439_v4 = vmul.f32 %v2975_v61, %v3536_v12  ;;  %v318_v31 = vmul.f32 %v317_v40, %v3708_v43  ;;  %v3795_v28 = vpack.c.bf16 %v435_v21, %v434_v11  ;;  %vm333_vm7 = vcmp.eq.f32.partialorder %v3683_v39, 0.0 }
  0xca   :  { %v337_v27 = vmul.f32 %v2977_v3, %v3770_v53  ;;  %v351_v10 = vmul.f32 0.5, %v350_v16  ;;  %v2979_v23 = vpop.eup %2978  ;;  %v335_v6 = vsel %vm333_vm7, %v334_v7, %v332_v49  ;;  %vm343_vm8 = vcmp.eq.f32.partialorder %v3770_v53, inf }
  0xcb   :  { %v3786_v14 = vpack.c.bf16 %v439_v4, %v438_v50  ;;  %v320_v29 = vsel %vm319_vm4, %v3708_v43, %v318_v31  ;;  %v395_v32 = vmul.f32 0.17677669, %v335_v6  ;;  %v361_v56 = vmul.f32 %v2979_v23, %v3779_v35 }
  0xcc   :  { %v338_v12 = vmul.f32 %v2977_v3, %v337_v27  ;;  %v323_v33 = vsel %vm321_vm6, %v322_v48, %v320_v29  ;;  %v2981_v2 = vpop.eup %2980  ;;  %v352_v17 = vsub.f32 1.5, %v351_v10  ;;  %vm355_vm9 = vcmp.eq.f32.partialorder %v3751_v0, inf }
  0xcd   :  { %v2983_v43 = vpop.eup %2982  ;;  %v394_v8 = vmul.f32 0.17677669, %v323_v33  ;;  %v440_v55 = vmul.f32 %v2981_v2, %v3538_v13  ;;  %v411_v54 = vadd.f32 1e-08, %v395_v32  ;;  %v362_v45 = vmul.f32 %v2979_v23, %v361_v56 }
  0xce   :  { %v339_v1 = vmul.f32 0.5, %v338_v12  ;;  %v2985_v41 = vpop.eup %2984  ;;  %v441_v39 = vmul.f32 %v2983_v43, %v3552_v20  ;;  %v353_v34 = vmul.f32 %v2969_v38, %v352_v17  ;;  %v346_v13 = vand.u32 2147483648, %v3770_v53 }
  0xcf   :  { %v373_v58 = vmul.f32 %v2985_v41, %v3790_v52  ;;  %v410_v57 = vadd.f32 1e-08, %v394_v8  ;;  %v358_v20 = vand.u32 2147483648, %v3751_v0  ;;  %vm345_vm10 = vcmp.eq.f32.partialorder %v3770_v53, 0.0 }
  0xd0   :  { %v340_v36 = vsub.f32 1.5, %v339_v1  ;;  %v3810_v60 = vpack.c.bf16 %v441_v39, %v440_v55  ;;  %v354_v62 = vmul.f32 %v353_v34, %v3751_v0  ;;  %v363_v15 = vmul.f32 0.5, %v362_v45 }
  0xd1   :  { %688 = vmatmul.bf16.gmra.mxu1 %v3786_v14  ;;  %v374_v42 = vmul.f32 %v2985_v41, %v373_v58  ;;  %2986 = vrcp.f32 %v410_v57  ;;  %vm357_vm11 = vcmp.eq.f32.partialorder %v3751_v0, 0.0  ;;  %vm367_vm12 = vcmp.eq.f32.partialorder %v3779_v35, inf }
  0xd2   :  { %629 = vmatmul.bf16.gmra.mxu0 %v3795_v28  ;;  %727 = vmatmul.bf16.gmra.mxu2 %v3795_v28  ;;  %v341_v46 = vmul.f32 %v2977_v3, %v340_v36  ;;  %2988 = vrcp.f32 %v411_v54  ;;  %v356_v44 = vsel %vm355_vm9, %v3751_v0, %v354_v62  ;;  %v364_v50 = vsub.f32 1.5, %v363_v15 }
  0xd3   :  { %v375_v63 = vmul.f32 0.5, %v374_v42  ;;  %v359_v51 = vsel %vm357_vm11, %v358_v20, %v356_v44  ;;  %vm379_vm13 = vcmp.eq.f32.partialorder %v3790_v52, inf  ;;  %v370_v12 = vand.u32 2147483648, %v3779_v35 }
  0xd4   :  { %v342_v22 = vmul.f32 %v341_v46, %v3770_v53  ;;  %v365_v21 = vmul.f32 %v2979_v23, %v364_v50  ;;  %vm369_vm14 = vcmp.eq.f32.partialorder %v3779_v35, 0.0  ;;  %vm381_vm15 = vcmp.eq.f32.partialorder %v3790_v52, 0.0 }
  0xd5   :  { %v376_v4 = vsub.f32 1.5, %v375_v63 }
  0xd6   :  { %v344_v38 = vsel %vm343_vm8, %v3770_v53, %v342_v22  ;;  %v397_v53 = vmul.f32 0.17677669, %v359_v51  ;;  %v366_v11 = vmul.f32 %v365_v21, %v3779_v35 }
  0xd7   :  { %v347_v40 = vsel %vm345_vm10, %v346_v13, %v344_v38  ;;  %v2987_v61 = vpop.eup %2986  ;;  %v377_v5 = vmul.f32 %v2985_v41, %v376_v4 }
  0xd8   :  { %v2989_v3 = vpop.eup %2988  ;;  %v396_v9 = vmul.f32 0.17677669, %v347_v40  ;;  %v442_v27 = vmul.f32 %v2987_v61, %v3550_v19  ;;  %v413_v31 = vadd.f32 1e-08, %v397_v53  ;;  %v368_v19 = vsel %vm367_vm12, %v3779_v35, %v366_v11 }
  0xd9   :  { %v443_v47 = vmul.f32 %v2989_v3, %v3548_v18  ;;  %v378_v16 = vmul.f32 %v377_v5, %v3790_v52  ;;  %v382_v18 = vand.u32 2147483648, %v3790_v52  ;;  %v371_v48 = vsel %vm369_vm14, %v370_v12, %v368_v19 }
  0xda   :  { %v412_v0 = vadd.f32 1e-08, %v396_v9  ;;  %v398_v10 = vmul.f32 0.17677669, %v371_v48 }
  0xdb   :  { %v380_v7 = vsel %vm379_vm13, %v3790_v52, %v378_v16 }
  0xdc   :  { %2990 = vrcp.f32 %v412_v0  ;;  %v383_v1 = vsel %vm381_vm15, %v382_v18, %v380_v7  ;;  %v414_v2 = vadd.f32 1e-08, %v398_v10 }
  0xdd   :  { %2992 = vrcp.f32 %v413_v31  ;;  %v399_v23 = vmul.f32 0.17677669, %v383_v1 }
  0xde   :  { %2994 = vrcp.f32 %v414_v2 }
  0xdf   :  { %v415_v36 = vadd.f32 1e-08, %v399_v23 }
  0xe1   :  { %693 = vmatmul.bf16.gmra.mxu1 %v3810_v60  ;;  %2996 = vrcp.f32 %v415_v36 }
  0xe2   :  { %634 = vmatmul.bf16.gmra.mxu0 %v3755_v37  ;;  %732 = vmatmul.bf16.gmra.mxu2 %v3755_v37  ;;  %v453_v37 = vpack.c.bf16 %v443_v47, %v442_v27  ;;  %v2991_v29 = vpop.eup %2990 }
  0xe3   :  { %v2993_v49 = vpop.eup %2992  ;;  %v444_v33 = vmul.f32 %v2991_v29, %v3564_v26 }
  0xe4   :  { %v445_v35 = vmul.f32 %v2993_v49, %v3560_v24 }
  0xe6   :  { %v454_v6 = vpack.c.bf16 %v445_v35, %v444_v33 }
  0xf1   :  { %698 = vmatmul.bf16.gmra.mxu1 %v453_v37 }
  0xf2   :  { %639 = vmatmul.bf16.gmra.mxu0 %v3786_v14  ;;  %737 = vmatmul.bf16.gmra.mxu2 %v3786_v14  ;;  %v2995_v14 = vpop.eup %2994 }
  0xf3   :  { %v2997_v52 = vpop.eup %2996  ;;  %v446_v43 = vmul.f32 %v2995_v14, %v3562_v25 }
  0xf4   :  { %v447_v17 = vmul.f32 %v2997_v52, %v3572_v30 }
  0xf6   :  { %v455_v41 = vpack.c.bf16 %v447_v17, %v446_v43 }
 0x101   :  { %703 = vmatmul.bf16.gmra.mxu1 %v454_v6 }
 0x102   :  { %644 = vmatmul.bf16.gmra.mxu0 %v3810_v60  ;;  %742 = vmatmul.bf16.gmra.mxu2 %v3810_v60 }
 0x111   :  { %708 = vmatmul.bf16.gmra.mxu1 %v455_v41 }
 0x112   :  { %649 = vmatmul.bf16.gmra.mxu0 %v453_v37  ;;  %747 = vmatmul.bf16.gmra.mxu2 %v453_v37 }
 0x122   :  { %654 = vmatmul.bf16.gmra.mxu0 %v454_v6  ;;  %752 = vmatmul.bf16.gmra.mxu2 %v454_v6 }
 0x132   :  { %659 = vmatmul.bf16.gmra.mxu0 %v455_v41  ;;  %757 = vmatmul.bf16.gmra.mxu2 %v455_v41 }
 0x13e   :  { %v3844_v24 = vpop.f32.mrf.mxu1 }
 0x13f   :  { %v3846_v26 = vpop.f32.mrf.mxu0 }
 0x142   :  { %673 = vmatmul.bf16.vlgmr.msrb.gmra.mxu0 %v3762_v59 }
 0x145   :  { %v3849_v8 = vpop.f32.mrf.mxu2 }
 0x146   :  { %v3851_v32 = vpop.f32.mrf.mxu1 }
 0x147   :  { %v3853_v25 = vpop.f32.mrf.mxu0 }
 0x14d   :  { %v3855_v30 = vpop.f32.mrf.mxu2 }
 0x14e   :  { %v3857_v46 = vpop.f32.mrf.mxu1 }
 0x14f   :  { %v3859_v55 = vpop.f32.mrf.mxu0 }
 0x152   :  { %678 = vmatmul.bf16.gmra.mxu0 %v3795_v28 }
 0x155   :  { %v3862_v39 = vpop.f32.mrf.mxu2 }
 0x156   :  { %v3864_v56 = vpop.f32.mrf.mxu1  ;;  %v957_v14 = vpack.c.bf16 %v3862_v39, %v3862_v39  ;;  %v955_v39 = vpack.c.bf16 %v3849_v8, %v3849_v8 }
 0x157   :  { %v3866_v34 = vpop.f32.mrf.mxu0 }
 0x15d   :  { %v3868_v59 = vpop.f32.mrf.mxu2 }
 0x15e   :  { %v694_v58 = vpop.f32.mrf.mxu1  ;;  %v958_v35 = vpack.c.bf16 %v3868_v59, %v3868_v59 }
 0x15f   :  { %v3870_v57 = vpop.f32.mrf.mxu0  ;;  %v907_v54 = vmul.f32 1.442695, %v694_v58  ;;  %v883_v42 = vadd.f32 1.0, %v694_v58  ;;  %vm867_vm0 = vcmp.gt.f32.partialorder %v694_v58, 0.0  ;;  %v956_v58 = vpack.c.bf16 %v3855_v30, %v3855_v30 }
 0x160   :  { %v1035_v30 = vunpack.c.l.b16 %v955_v39 }
 0x161   :  { %2998 = vpow2.f32 %v907_v54  ;;  %v1038_v54 = vunpack.c.l.b16 %v958_v35 }
 0x165   :  { %v733_v22 = vpop.f32.mrf.mxu2 }
 0x166   :  { %v696_v60 = vpop.f32.mrf.mxu1  ;;  %v959_v7 = vpack.c.bf16 %v733_v22, %v733_v22 }
 0x167   :  { %v3872_v45 = vpop.f32.mrf.mxu0  ;;  %v909_v62 = vmul.f32 1.442695, %v696_v60  ;;  %v2999_v28 = vpop.eup %2998  ;;  %v884_v44 = vadd.f32 1.0, %v696_v60  ;;  %vm868_vm1 = vcmp.gt.f32.partialorder %v696_v60, 0.0 }
 0x168   :  { %v931_v20 = vsel %vm867_vm0, %v883_v42, %v2999_v28  ;;  %v1039_v52 = vunpack.c.l.b16 %v959_v7  ;;  %v1037_v28 = vunpack.c.l.b16 %v957_v14  ;;  %vm864_vm0 = vcmp.gt.f32.partialorder %v3851_v32, 0.0 }
 0x169   :  { %3000 = vpow2.f32 %v909_v62  ;;  %v947_v61 = vpack.c.bf16 %v931_v20, %v931_v20 }
 0x16b   :  { %v1210_v3 = vunpack.c.l.b16 %v947_v61 }
 0x16d   :  { %v735_v13 = vpop.f32.mrf.mxu2 }
 0x16e   :  { %v699_v38 = vpop.f32.mrf.mxu1  ;;  %v960_v16 = vpack.c.bf16 %v735_v13, %v735_v13 }
 0x16f   :  { %v3001_v15 = vpop.eup %3000  ;;  %v3874_v63 = vpop.f32.mrf.mxu0  ;;  %v911_v40 = vmul.f32 1.442695, %v699_v38  ;;  %v885_v5 = vadd.f32 1.0, %v699_v38  ;;  %vm869_vm2 = vcmp.gt.f32.partialorder %v699_v38, 0.0  ;;  %v1036_v38 = vunpack.c.l.b16 %v956_v58 }
 0x170   :  { %v932_v50 = vsel %vm868_vm1, %v884_v44, %v3001_v15  ;;  %v1040_v2 = vunpack.c.l.b16 %v960_v16  ;;  %v1044_v15 = vpack.c.b16 %v1038_v54, %v1037_v28  ;;  %vm863_vm1 = vcmp.gt.f32.partialorder %v3844_v24, 0.0 }
 0x171   :  { %v948_v51 = vpack.c.bf16 %v932_v50, %v932_v50  ;;  %3002 = vpow2.f32 %v911_v40  ;;  %v1043_v50 = vpack.c.b16 %v1036_v38, %v1035_v30 }
 0x172   :  { %v1045_v60 = vpack.c.b16 %v1040_v2, %v1039_v52 }
 0x173   :  { %v1211_v4 = vunpack.c.l.b16 %v948_v51 }
 0x175   :  { %v738_v9 = vpop.f32.mrf.mxu2  ;;  %v1218_v21 = vpack.c.b16 %v1211_v4, %v1210_v3 }
 0x176   :  { %v701_v53 = vpop.f32.mrf.mxu1  ;;  %v961_v31 = vpack.c.bf16 %v738_v9, %v738_v9 }
 0x177   :  { %v3876_v27 = vpop.f32.mrf.mxu0  ;;  %v913_v47 = vmul.f32 1.442695, %v701_v53  ;;  %1226 = vxpose.xlu2.c.b16.start [1/4] (short) %v1218_v21, 128  ;;  %v3003_v0 = vpop.eup %3002  ;;  %vm870_vm3 = vcmp.gt.f32.partialorder %v701_v53, 0.0  ;;  %v886_v48 = vadd.f32 1.0, %v701_v53 }
 0x178   :  { %v933_v11 = vsel %vm869_vm2, %v885_v5, %v3003_v0  ;;  %v1041_v49 = vunpack.c.l.b16 %v961_v31  ;;  %vm865_vm2 = vcmp.gt.f32.partialorder %v3857_v46, 0.0 }
 0x179   :  { %3004 = vpow2.f32 %v913_v47  ;;  %v949_v1 = vpack.c.bf16 %v933_v11, %v933_v11 }
 0x17b   :  { %v1212_v43 = vunpack.c.l.b16 %v949_v1 }
 0x17d   :  { %v740_v37 = vpop.f32.mrf.mxu2 }
 0x17e   :  { %v962_v12 = vpack.c.bf16 %v740_v37, %v740_v37  ;;  %v704_v19 = vpop.f32.mrf.mxu1 }
 0x17f   :  { %v3005_v18 = vpop.eup %3004  ;;  %v3878_v29 = vpop.f32.mrf.mxu0  ;;  %v915_v10 = vmul.f32 1.442695, %v704_v19  ;;  %v887_v13 = vadd.f32 1.0, %v704_v19  ;;  %vm871_vm4 = vcmp.gt.f32.partialorder %v704_v19, 0.0 }
 0x180   :  { %v1042_v23 = vunpack.c.l.b16 %v962_v12  ;;  %v934_v33 = vsel %vm870_vm3, %v886_v48, %v3005_v18  ;;  %vm866_vm3 = vcmp.gt.f32.partialorder %v3864_v56, 0.0 }
 0x181   :  { %v950_v6 = vpack.c.bf16 %v934_v33, %v934_v33  ;;  %3006 = vpow2.f32 %v915_v10 }
 0x182   :  { %v1046_v36 = vpack.c.b16 %v1042_v23, %v1041_v49 }
 0x183   :  { %v1213_v17 = vunpack.c.l.b16 %v950_v6 }
 0x184   :  { %1080 = vmatpush.bf16.msra.mxu3 %v1046_v36 }
 0x185   :  { %v3884_v41 = vpop.f32.mrf.mxu2  ;;  %v1219_v59 = vpack.c.b16 %v1213_v17, %v1212_v43 }
 0x186   :  { %v706_v22 = vpop.f32.mrf.mxu1 }
 0x187   :  { %v3888_v62 = vpop.f32.mrf.mxu0  ;;  %v917_v42 = vmul.f32 1.442695, %v706_v22  ;;  %1227 = vxpose.xlu2.c.b16.cont [2/4] (short) %v1219_v59, 128  ;;  %v3007_v20 = vpop.eup %3006  ;;  %v888_v3 = vadd.f32 1.0, %v706_v22  ;;  %vm872_vm5 = vcmp.gt.f32.partialorder %v706_v22, 0.0 }
 0x188   :  { %1081 = vmatpush.bf16.msra.mxu3 %v1045_v60  ;;  %v935_v44 = vsel %vm871_vm4, %v887_v13, %v3007_v20  ;;  %vm1051_vm4 = vcmask 523264  }
 0x189   :  { %3008 = vpow2.f32 %v917_v42  ;;  %v951_v8 = vpack.c.bf16 %v935_v44, %v935_v44 }
 0x18b   :  { %v1214_v47 = vunpack.c.l.b16 %v951_v8 }
 0x18c   :  { %1082 = vmatpush.bf16.msra.mxu3 %v1044_v15 }
 0x18d   :  { %v3892_v40 = vpop.f32.mrf.mxu2 }
 0x18e   :  { %v709_v61 = vpop.f32.mrf.mxu1 }
 0x18f   :  { %v3009_v51 = vpop.eup %3008  ;;  %v3894_v4 = vpop.f32.mrf.mxu0  ;;  %v919_v9 = vmul.f32 1.442695, %v709_v61  ;;  %v889_v12 = vadd.f32 1.0, %v709_v61  ;;  %vm873_vm6 = vcmp.gt.f32.partialorder %v709_v61, 0.0 }
 0x190   :  { %1083 = vmatpush.bf16.msra.mxu3 %v1043_v50  ;;  %v936_v53 = vsel %vm872_vm5, %v888_v3, %v3009_v51  ;;  %vm772_vm5 = vcmp.gt.f32.partialorder %v3888_v62, 0.0 }
 0x191   :  { %v952_v21 = vpack.c.bf16 %v936_v53, %v936_v53  ;;  %3010 = vpow2.f32 %v919_v9 }
 0x193   :  { %v1215_v5 = vunpack.c.l.b16 %v952_v21 }
 0x195   :  { %v3896_v0 = vpop.f32.mrf.mxu2  ;;  %v1220_v11 = vpack.c.b16 %v1215_v5, %v1214_v47 }
 0x196   :  { %v711_v31 = vpop.f32.mrf.mxu1 }
 0x197   :  { %v3898_v37 = vpop.f32.mrf.mxu0  ;;  %v921_v16 = vmul.f32 1.442695, %v711_v31  ;;  %1228 = vxpose.xlu2.c.b16.cont [3/4] (short) %v1220_v11, 128  ;;  %v3011_v19 = vpop.eup %3010  ;;  %v890_v1 = vadd.f32 1.0, %v711_v31  ;;  %vm874_vm7 = vcmp.gt.f32.partialorder %v711_v31, 0.0 }
 0x198   :  { %v937_v18 = vsel %vm873_vm6, %v889_v12, %v3011_v19  ;;  %vm771_vm6 = vcmp.gt.f32.partialorder %v3878_v29, 0.0 }
 0x199   :  { %3012 = vpow2.f32 %v921_v16  ;;  %v953_v10 = vpack.c.bf16 %v937_v18, %v937_v18 }
 0x19b   :  { %v1216_v2 = vunpack.c.l.b16 %v953_v10 }
 0x19d   :  { %v3900_v7 = vpop.f32.mrf.mxu2 }
 0x19f   :  { %v3013_v48 = vpop.eup %3012  ;;  %v655_v49 = vpop.f32.mrf.mxu0 }
 0x1a0   :  { %v819_v23 = vmul.f32 1.442695, %v655_v49  ;;  %v938_v33 = vsel %vm874_vm7, %v890_v1, %v3013_v48  ;;  %v791_v58 = vadd.f32 1.0, %v655_v49  ;;  %vm775_vm8 = vcmp.gt.f32.partialorder %v655_v49, 0.0 }
 0x1a1   :  { %v954_v35 = vpack.c.bf16 %v938_v33, %v938_v33  ;;  %v966_v49 = vpack.c.bf16 %v3900_v7, %v3900_v7  ;;  %vm774_vm7 = vcmp.gt.f32.partialorder %v3898_v37, 0.0 }
 0x1a2   :  { %3014 = vpow2.f32 %v819_v23 }
 0x1a3   :  { %v1217_v36 = vunpack.c.l.b16 %v954_v35  ;;  %v965_v35 = vpack.c.bf16 %v3896_v0, %v3896_v0 }
 0x1a5   :  { %v753_v6 = vpop.f32.mrf.mxu2  ;;  %v1221_v14 = vpack.c.b16 %v1217_v36, %v1216_v2  ;;  %v1252_v0 = vunpack.c.l.b16 %v965_v35  ;;  %v880_v35 = vadd.f32 1.0, %v3851_v32 }
 0x1a6   :  { %v967_v5 = vpack.c.bf16 %v753_v6, %v753_v6 }
 0x1a7   :  { %v657_v52 = vpop.f32.mrf.mxu0  ;;  %1229 = vxpose.xlu2.c.b16.end [4/4] (short) %v1221_v14, 128  ;;  %v964_v14 = vpack.c.bf16 %v3892_v40, %v3892_v40 }
 0x1a8   :  { %v821_v43 = vmul.f32 1.442695, %v657_v52  ;;  %v3015_v17 = vpop.eup %3014  ;;  %v792_v60 = vadd.f32 1.0, %v657_v52  ;;  %vm776_vm9 = vcmp.gt.f32.partialorder %v657_v52, 0.0  ;;  %v1254_v2 = vunpack.c.l.b16 %v967_v5 }
 0x1a9   :  { %v839_v22 = vsel %vm775_vm8, %v791_v58, %v3015_v17  ;;  %v1253_v52 = vunpack.c.l.b16 %v966_v49  ;;  %v963_v58 = vpack.c.bf16 %v3884_v41, %v3884_v41  ;;  %vm773_vm8 = vcmp.gt.f32.partialorder %v3894_v4, 0.0 }
 0x1aa   :  { %3016 = vpow2.f32 %v821_v43  ;;  %v855_v28 = vpack.c.bf16 %v839_v22, %v839_v22 }
 0x1ac   :  { %v3902_v38 = vunpack.c.l.b16 %v855_v28 }
 0x1ad   :  { %v755_v54 = vpop.f32.mrf.mxu2 }
 0x1ae   :  { %v968_v21 = vpack.c.bf16 %v755_v54, %v755_v54 }
 0x1af   :  { %v660_v59 = vpop.f32.mrf.mxu0 }
 0x1b0   :  { %v3017_v42 = vpop.eup %3016  ;;  %v823_v39 = vmul.f32 1.442695, %v660_v59  ;;  %v793_v3 = vadd.f32 1.0, %v660_v59  ;;  %vm777_vm10 = vcmp.gt.f32.partialorder %v660_v59, 0.0  ;;  %v1255_v10 = vunpack.c.l.b16 %v968_v21 }
 0x1b1   :  { %v840_v13 = vsel %vm776_vm9, %v792_v60, %v3017_v42  ;;  %v1251_v60 = vunpack.c.l.b16 %v964_v14  ;;  %v1259_v59 = vpack.c.b16 %v1253_v52, %v1252_v0  ;;  %v879_v14 = vadd.f32 1.0, %v3844_v24 }
 0x1b2   :  { %v856_v20 = vpack.c.bf16 %v840_v13, %v840_v13  ;;  %3018 = vpow2.f32 %v823_v39  ;;  %v1260_v43 = vpack.c.b16 %v1255_v10, %v1254_v2  ;;  %v1250_v39 = vunpack.c.l.b16 %v963_v58 }
 0x1b3   :  { %vm764_vm9 = vcmp.gt.f32.partialorder %v3853_v25, 0.0 }
 0x1b4   :  { %v3904_v15 = vunpack.c.l.b16 %v856_v20  ;;  %v1258_v28 = vpack.c.b16 %v1251_v60, %v1250_v39  ;;  %v882_v39 = vadd.f32 1.0, %v3864_v56 }
 0x1b5   :  { %v758_v30 = vpop.f32.mrf.mxu2 }
 0x1b6   :  { %v1381_v44 = vpack.c.b16 %v3904_v15, %v3902_v38  ;;  %v969_v8 = vpack.c.bf16 %v758_v30, %v758_v30 }
 0x1b7   :  { %v662_v61 = vpop.f32.mrf.mxu0 }
 0x1b8   :  { %v825_v50 = vmul.f32 1.442695, %v662_v61  ;;  %v3019_v51 = vpop.eup %3018  ;;  %v1256_v31 = vunpack.c.l.b16 %v969_v8  ;;  %v794_v11 = vadd.f32 1.0, %v662_v61  ;;  %vm778_vm11 = vcmp.gt.f32.partialorder %v662_v61, 0.0 }
 0x1b9   :  { %v841_v53 = vsel %vm777_vm10, %v793_v3, %v3019_v51  ;;  %vm768_vm10 = vcmp.gt.f32.partialorder %v3872_v45, 0.0 }
 0x1ba   :  { %3020 = vpow2.f32 %v825_v50  ;;  %v857_v48 = vpack.c.bf16 %v841_v53, %v841_v53 }
 0x1bc   :  { %v3912_v36 = vunpack.c.l.b16 %v857_v48 }
 0x1bd   :  { %v760_v9 = vpop.f32.mrf.mxu2 }
 0x1be   :  { %v970_v47 = vpack.c.bf16 %v760_v9, %v760_v9 }
 0x1bf   :  { %v674_v16 = vpop.f32.mrf.mxu0 }
 0x1c0   :  { %v3021_v12 = vpop.eup %3020  ;;  %v1257_v19 = vunpack.c.l.b16 %v970_v47  ;;  %v891_v18 = vmul.f32 1.442695, %v674_v16  ;;  %v875_v42 = vadd.f32 1.0, %v674_v16  ;;  %vm859_vm12 = vcmp.gt.f32.partialorder %v674_v16, 0.0 }
 0x1c1   :  { %v842_v1 = vsel %vm778_vm11, %v794_v11, %v3021_v12  ;;  %v901_v11 = vmul.f32 1.442695, %v3851_v32  ;;  %v881_v32 = vadd.f32 1.0, %v3857_v46  ;;  %vm763_vm11 = vcmp.gt.f32.partialorder %v3846_v26, 0.0 }
 0x1c2   :  { %v1261_v23 = vpack.c.b16 %v1257_v19, %v1256_v31  ;;  %v858_v33 = vpack.c.bf16 %v842_v1, %v842_v1  ;;  %3022 = vpow2.f32 %v891_v18  ;;  %v899_v19 = vmul.f32 1.442695, %v3844_v24 }
 0x1c4   :  { %1294 = vmatpush.bf16.msra.mxu0 %v1261_v23  ;;  %v3914_v6 = vunpack.c.l.b16 %v858_v33 }
 0x1c6   :  { %v1382_v7 = vpack.c.b16 %v3914_v6, %v3912_v36  ;;  %v797_v36 = vmul.f32 1.442695, %v3853_v25 }
 0x1c7   :  { %v676_v17 = vpop.f32.mrf.mxu0 }
 0x1c8   :  { %v893_v54 = vmul.f32 1.442695, %v676_v17  ;;  %1295 = vmatpush.bf16.msra.mxu0 %v1260_v43  ;;  %v3023_v22 = vpop.eup %3022  ;;  %v876_v13 = vadd.f32 1.0, %v676_v17  ;;  %vm860_vm13 = vcmp.gt.f32.partialorder %v676_v17, 0.0  ;;  %v905_v17 = vmul.f32 1.442695, %v3864_v56 }
 0x1c9   :  { %v923_v40 = vsel %vm859_vm12, %v875_v42, %v3023_v22  ;;  %vm767_vm12 = vcmp.gt.f32.partialorder %v3870_v57, 0.0 }
 0x1ca   :  { %3024 = vpow2.f32 %v893_v54  ;;  %v939_v41 = vpack.c.bf16 %v923_v40, %v923_v40  ;;  %v903_v54 = vmul.f32 1.442695, %v3857_v46 }
 0x1cc   :  { %1296 = vmatpush.bf16.msra.mxu0 %v1259_v59  ;;  %v995_v3 = vunpack.c.l.b16 %v939_v41 }
 0x1cf   :  { %v679_v20 = vpop.f32.mrf.mxu0 }
 0x1d0   :  { %v3025_v30 = vpop.eup %3024  ;;  %v895_v61 = vmul.f32 1.442695, %v679_v20  ;;  %1297 = vmatpush.bf16.msra.mxu0 %v1258_v28  ;;  %v877_v5 = vadd.f32 1.0, %v679_v20  ;;  %vm861_vm14 = vcmp.gt.f32.partialorder %v679_v20, 0.0 }
 0x1d1   :  { %v924_v50 = vsel %vm860_vm13, %v876_v13, %v3025_v30  ;;  %vm766_vm13 = vcmp.gt.f32.partialorder %v3866_v34, 0.0 }
 0x1d2   :  { %v940_v51 = vpack.c.bf16 %v924_v50, %v924_v50  ;;  %3026 = vpow2.f32 %v895_v61 }
 0x1d4   :  { %v996_v8 = vunpack.c.l.b16 %v940_v51 }
 0x1d6   :  { %v1003_v9 = vpack.c.b16 %v996_v8, %v995_v3 }
 0x1d7   :  { %v681_v53 = vpop.f32.mrf.mxu0 }
 0x1d8   :  { %v897_v21 = vmul.f32 1.442695, %v681_v53  ;;  %1011 = vxpose.xlu1.c.b16.start [1/4] (short) %v1003_v9, 128  ;;  %v3027_v47 = vpop.eup %3026  ;;  %v878_v16 = vadd.f32 1.0, %v681_v53  ;;  %vm862_vm15 = vcmp.gt.f32.partialorder %v681_v53, 0.0 }
 0x1d9   :  { %v925_v31 = vsel %vm861_vm14, %v877_v5, %v3027_v47  ;;  %vm770_vm14 = vcmp.gt.f32.partialorder %v3876_v27, 0.0 }
 0x1da   :  { %3028 = vpow2.f32 %v897_v21  ;;  %v941_v18 = vpack.c.bf16 %v925_v31, %v925_v31 }
 0x1db   :  { %3030 = vpow2.f32 %v901_v11 }
 0x1dc   :  { %3032 = vpow2.f32 %v899_v19  ;;  %v997_v49 = vunpack.c.l.b16 %v941_v18 }
 0x1dd   :  { %3034 = vpow2.f32 %v905_v17 }
 0x1de   :  { %3036 = vpow2.f32 %v903_v54 }
 0x1e0   :  { %v3029_v12 = vpop.eup %3028 }
 0x1e1   :  { %v926_v48 = vsel %vm862_vm15, %v878_v16, %v3029_v12  ;;  %v3031_v33 = vpop.eup %3030  ;;  %vm765_vm15 = vcmp.gt.f32.partialorder %v3859_v55, 0.0 }
 0x1e2   :  { %v942_v1 = vpack.c.bf16 %v926_v48, %v926_v48  ;;  %v3033_v2 = vpop.eup %3032  ;;  %v928_v52 = vsel %vm864_vm0, %v880_v35, %v3031_v33  ;;  %vm769_vm0 = vcmp.gt.f32.partialorder %v3874_v63, 0.0 }
 0x1e3   :  { %v927_v43 = vsel %vm863_vm1, %v879_v14, %v3033_v2  ;;  %v944_v58 = vpack.c.bf16 %v928_v52, %v928_v52  ;;  %v3035_v42 = vpop.eup %3034 }
 0x1e4   :  { %v998_v10 = vunpack.c.l.b16 %v942_v1  ;;  %v943_v0 = vpack.c.bf16 %v927_v43, %v927_v43  ;;  %v3037_v40 = vpop.eup %3036  ;;  %v930_v24 = vsel %vm866_vm3, %v882_v39, %v3035_v42  ;;  %v3956_v42 = vld [vmem:[#allocation7 + $0x20] sm:$0xff]  ;;  %v3960_v39 = vld [vmem:[#allocation7 + $0x10] sm:$0xff] }
 0x1e5   :  { %v1000_v22 = vunpack.c.l.b16 %v944_v58  ;;  %v929_v28 = vsel %vm865_vm2, %v881_v32, %v3037_v40  ;;  %v946_v13 = vpack.c.bf16 %v930_v24, %v930_v24  ;;  %v3950_v58 = vld [vmem:[#allocation7 + $0x30] sm:$0xff]  ;;  %v3958_v32 = vld [vmem:[#allocation7 + $0x28] sm:$0xff]  ;;  %v3962_v40 = vld [vmem:[#allocation7 + $0x18] sm:$0xff] }
 0x1e6   :  { %v1004_v23 = vpack.c.b16 %v998_v10, %v997_v49  ;;  %v999_v60 = vunpack.c.l.b16 %v943_v0  ;;  %v945_v20 = vpack.c.bf16 %v929_v28, %v929_v28  ;;  %v3952_v0 = vld [vmem:[#allocation7 + $0x38] sm:$0xff] }
 0x1e7   :  { %v1002_v30 = vunpack.c.l.b16 %v946_v13 }
 0x1e8   :  { %1012 = vxpose.xlu1.c.b16.cont [2/4] (short) %v1004_v23, 128  ;;  %v1005_v59 = vpack.c.b16 %v1000_v22, %v999_v60  ;;  %v1001_v61 = vunpack.c.l.b16 %v945_v20 }
 0x1ea   :  { %v1006_v41 = vpack.c.b16 %v1002_v30, %v1001_v61 }
 0x1f8   :  { %1013 = vxpose.xlu1.c.b16.cont [3/4] (short) %v1005_v59, 128 }
 0x208   :  { %1014 = vxpose.xlu1.c.b16.end [4/4] (short) %v1006_v41, 128 }
 0x218   :  { %v1234_v50 = vpop.trf.xlu2 }
 0x219   :  { %2749 = vmatmul.msk.bf16.vlgmr.msra.gmra.mxu0 %vm1051_vm4, %v1234_v50 }
 0x228   :  { %v1235_v51 = vpop.trf.xlu2 }
 0x229   :  { %2750 = vmatmul.msk.bf16.gmra.mxu0 %vm1051_vm4, %v1235_v51  ;;  %v3970_v51 = vld [vmem:[#allocation7 + $0x70] sm:$0xff] }
 0x238   :  { %v1236_v3 = vpop.trf.xlu2 }
 0x239   :  { %2751 = vmatmul.msk.bf16.gmra.mxu0 %vm1051_vm4, %v1236_v3  ;;  %v3972_v3 = vld [vmem:[#allocation7] sm:$0xff] }
 0x248   :  { %v1237_v46 = vpop.trf.xlu2 }
 0x249   :  { %2752 = vmatmul.msk.bf16.gmra.mxu0 %vm1051_vm4, %v1237_v46  ;;  %v3974_v46 = vld [vmem:[#allocation7 + $0x8] sm:$0xff] }
 0x258   :  { %v1238_v56 = vpop.trf.xlu2 }
 0x259   :  { %2753 = vmatmul.msk.bf16.gmra.mxu0 %vm1051_vm4, %v1238_v56 }
 0x268   :  { %v1239_v8 = vpop.trf.xlu2 }
 0x269   :  { %2754 = vmatmul.msk.bf16.gmra.mxu0 %vm1051_vm4, %v1239_v8 }
 0x278   :  { %v1240_v9 = vpop.trf.xlu2 }
 0x279   :  { %2755 = vmatmul.msk.bf16.gmra.mxu0 %vm1051_vm4, %v1240_v9  ;;  %v3978_v9 = vld [vmem:[#allocation7 + $0x60] sm:$0xff] }
 0x284   :  { %v1019_v53 = vpop.trf.xlu1 }
 0x285   :  { %2741 = vmatmul.msk.bf16.vlgmr.msra.gmra.mxu3 %vm1051_vm4, %v1019_v53  ;;  %v3980_v53 = vld [vmem:[#allocation7 + $0x68] sm:$0xff] }
 0x288   :  { %v1241_v21 = vpop.trf.xlu2 }
 0x289   :  { %2756 = vmatmul.msk.bf16.gmra.mxu0 %vm1051_vm4, %v1241_v21  ;;  %v3982_v21 = vld [vmem:[#allocation7 + $0x78] sm:$0xff] }
 0x294   :  { %v1020_v47 = vpop.trf.xlu1 }
 0x295   :  { %2742 = vmatmul.msk.bf16.gmra.mxu3 %vm1051_vm4, %v1020_v47 }
 0x296   :  { %v1299_v5 = vpop.f32.mrf.mxu0 }
 0x297   :  { %v1339_v56 = vmul.f32 %v1299_v5, %v3972_v3  ;;  %v3990_v5 = vld [vmem:[#allocation7 + $0x50] sm:$0xff] }
 0x29e   :  { %v1301_v31 = vpop.f32.mrf.mxu0 }
 0x29f   :  { %v1340_v8 = vmul.f32 %v1301_v31, %v3974_v46  ;;  %v3992_v31 = vld [vmem:[#allocation7 + $0x58] sm:$0xff] }
 0x2a4   :  { %v1021_v11 = vpop.trf.xlu1 }
 0x2a5   :  { %2743 = vmatmul.msk.bf16.gmra.mxu3 %vm1051_vm4, %v1021_v11 }
 0x2a6   :  { %v1304_v16 = vpop.f32.mrf.mxu0 }
 0x2a7   :  { %v1341_v24 = vmul.f32 %v1304_v16, %v3960_v39 }
 0x2ae   :  { %v1306_v12 = vpop.f32.mrf.mxu0 }
 0x2af   :  { %v1342_v28 = vmul.f32 %v1306_v12, %v3962_v40 }
 0x2b1   :  { %v1356_v50 = vpack.c.bf16 %v1342_v28, %v1341_v24  ;;  %v813_v24 = vmul.f32 1.442695, %v3888_v62 }
 0x2b3   :  { %3038 = vpow2.f32 %v813_v24 }
 0x2b4   :  { %v1022_v19 = vpop.trf.xlu1 }
 0x2b5   :  { %2744 = vmatmul.msk.bf16.gmra.mxu3 %vm1051_vm4, %v1022_v19 }
 0x2b6   :  { %v1309_v18 = vpop.f32.mrf.mxu0 }
 0x2b7   :  { %v1343_v13 = vmul.f32 %v1309_v18, %v3956_v42 }
 0x2be   :  { %v1311_v48 = vpop.f32.mrf.mxu0 }
 0x2bf   :  { %v1344_v20 = vmul.f32 %v1311_v48, %v3958_v32  ;;  %v1355_v48 = vpack.c.bf16 %v1340_v8, %v1339_v56 }
 0x2c1   :  { %v1357_v41 = vpack.c.bf16 %v1344_v20, %v1343_v13  ;;  %v3039_v13 = vpop.eup %3038  ;;  %v787_v20 = vadd.f32 1.0, %v3878_v29 }
 0x2c4   :  { %v1023_v1 = vpop.trf.xlu1 }
 0x2c5   :  { %2745 = vmatmul.msk.bf16.gmra.mxu3 %vm1051_vm4, %v1023_v1 }
 0x2c6   :  { %v1314_v49 = vpop.f32.mrf.mxu0 }
 0x2c7   :  { %v1345_v54 = vmul.f32 %v1314_v49, %v3950_v58 }
 0x2ce   :  { %v1316_v10 = vpop.f32.mrf.mxu0 }
 0x2cf   :  { %v1346_v22 = vmul.f32 %v1316_v10, %v3952_v0 }
 0x2d1   :  { %v1358_v59 = vpack.c.bf16 %v1346_v22, %v1345_v54 }
 0x2d4   :  { %v1024_v23 = vpop.trf.xlu1 }
 0x2d5   :  { %2746 = vmatmul.msk.bf16.gmra.mxu3 %vm1051_vm4, %v1024_v23 }
 0x2d6   :  { %v1319_v33 = vpop.f32.mrf.mxu0 }
 0x2de   :  { %v1321_v35 = vpop.f32.mrf.mxu0 }
 0x2e4   :  { %v1025_v2 = vpop.trf.xlu1 }
 0x2e5   :  { %2747 = vmatmul.msk.bf16.gmra.mxu3 %vm1051_vm4, %v1025_v2  ;;  %v3996_v2 = vld [vmem:[#allocation7 + $0x40] sm:$0xff] }
 0x2e6   :  { %v1324_v14 = vpop.f32.mrf.mxu0 }
 0x2e7   :  { %v1349_v49 = vmul.f32 %v1324_v14, %v3990_v5  ;;  %v811_v14 = vmul.f32 1.442695, %v3878_v29  ;;  %v790_v29 = vadd.f32 1.0, %v3898_v37 }
 0x2e9   :  { %3040 = vpow2.f32 %v811_v14 }
 0x2ee   :  { %v1326_v52 = vpop.f32.mrf.mxu0 }
 0x2ef   :  { %v1350_v10 = vmul.f32 %v1326_v52, %v3992_v31 }
 0x2f4   :  { %v1026_v43 = vpop.trf.xlu1 }
 0x2f5   :  { %2748 = vmatmul.msk.bf16.gmra.mxu3 %vm1051_vm4, %v1026_v43  ;;  %v3998_v43 = vld [vmem:[#allocation7 + $0x48] sm:$0xff] }
 0x2f6   :  { %v1329_v17 = vpop.f32.mrf.mxu0  ;;  %v1348_v54 = vmul.f32 %v1321_v35, %v3998_v43  ;;  %v3041_v35 = vpop.eup %3040 }
 0x2f7   :  { %v1351_v16 = vmul.f32 %v1329_v17, %v3978_v9  ;;  %v1347_v17 = vmul.f32 %v1319_v33, %v3996_v2  ;;  %v788_v33 = vadd.f32 1.0, %v3888_v62  ;;  %v835_v56 = vsel %vm771_vm6, %v787_v20, %v3041_v35 }
 0x2f9   :  { %v1359_v52 = vpack.c.bf16 %v1348_v54, %v1347_v17 }
 0x2fe   :  { %v1331_v60 = vpop.f32.mrf.mxu0 }
 0x2ff   :  { %v1352_v12 = vmul.f32 %v1331_v60, %v3980_v53  ;;  %v1360_v60 = vpack.c.bf16 %v1350_v10, %v1349_v49 }
 0x301   :  { %v1361_v23 = vpack.c.bf16 %v1352_v12, %v1351_v16  ;;  %v851_v16 = vpack.c.bf16 %v835_v56, %v835_v56  ;;  %v815_v12 = vmul.f32 1.442695, %v3894_v4 }
 0x303   :  { %v1371_v62 = vunpack.c.l.b16 %v851_v16 }
 0x306   :  { %v1334_v30 = vpop.f32.mrf.mxu0 }
 0x307   :  { %v1353_v47 = vmul.f32 %v1334_v30, %v3970_v51  ;;  %v836_v30 = vsel %vm772_vm5, %v788_v33, %v3039_v13 }
 0x308   :  { %v3968_v61 = vpop.f32.mrf.mxu3 }
 0x30e   :  { %v1336_v11 = vpop.f32.mrf.mxu0 }
 0x30f   :  { %v1354_v19 = vmul.f32 %v1336_v11, %v3982_v21  ;;  %v852_v11 = vpack.c.bf16 %v836_v30, %v836_v30 }
 0x310   :  { %v3988_v18 = vpop.f32.mrf.mxu3 }
 0x311   :  { %v1362_v1 = vpack.c.bf16 %v1354_v19, %v1353_v47  ;;  %v817_v47 = vmul.f32 1.442695, %v3898_v37 }
 0x313   :  { %1387 = vmatpush.bf16.msrb.mxu1 %v1362_v1  ;;  %3042 = vpow2.f32 %v817_v47 }
 0x314   :  { %3044 = vpow2.f32 %v815_v12 }
 0x315   :  { %3046 = vpow2.f32 %v797_v36 }
 0x317   :  { %1388 = vmatpush.bf16.msrb.mxu1 %v1361_v23 }
 0x318   :  { %v4002_v22 = vpop.f32.mrf.mxu3 }
 0x319   :  { %v3043_v49 = vpop.eup %3042 }
 0x31a   :  { %v3045_v10 = vpop.eup %3044  ;;  %v838_v23 = vsel %vm774_vm7, %v790_v29, %v3043_v49 }
 0x31b   :  { %1389 = vmatpush.bf16.msrb.mxu1 %v1360_v60  ;;  %v854_v54 = vpack.c.bf16 %v838_v23, %v838_v23  ;;  %v779_v23 = vadd.f32 1.0, %v3846_v26 }
 0x31d   :  { %v1374_v24 = vunpack.c.l.b16 %v854_v54 }
 0x31f   :  { %1390 = vmatpush.bf16.msrb.mxu1 %v1359_v52 }
 0x320   :  { %v4006_v28 = vpop.f32.mrf.mxu3 }
 0x323   :  { %1391 = vmatpush.bf16.msrb.mxu1 %v1358_v59  ;;  %v1372_v59 = vunpack.c.l.b16 %v852_v11 }
 0x325   :  { %v1379_v1 = vpack.c.b16 %v1372_v59, %v1371_v62 }
 0x327   :  { %1392 = vmatpush.bf16.msrb.mxu1 %v1357_v41  ;;  %v789_v41 = vadd.f32 1.0, %v3894_v4 }
 0x328   :  { %v4012_v8 = vpop.f32.mrf.mxu3 }
 0x329   :  { %v837_v17 = vsel %vm773_vm8, %v789_v41, %v3045_v10  ;;  %v780_v10 = vadd.f32 1.0, %v3853_v25  ;;  %v784_v41 = vadd.f32 1.0, %v3872_v45 }
 0x32a   :  { %v853_v60 = vpack.c.bf16 %v837_v17, %v837_v17 }
 0x32b   :  { %1393 = vmatpush.bf16.msrb.mxu1 %v1356_v50 }
 0x32c   :  { %v1373_v14 = vunpack.c.l.b16 %v853_v60  ;;  %v1127_v60 = vmul.f32 %v4002_v22, %v3960_v39  ;;  %v1125_v39 = vmul.f32 %v3968_v61, %v3972_v3  ;;  %v782_v61 = vadd.f32 1.0, %v3866_v34 }
 0x32d   :  { %v786_v3 = vadd.f32 1.0, %v3876_v27 }
 0x32e   :  { %v1380_v52 = vpack.c.b16 %v1374_v24, %v1373_v14 }
 0x32f   :  { %1394 = vmatpush.bf16.msrb.mxu1 %v1355_v48 }
 0x330   :  { %v1097_v19 = vpop.f32.mrf.mxu3 }
 0x332   :  { %1395 = vmatmul.bf16.vlgmr.msrb.gmra.mxu1 %v1379_v1  ;;  %v3047_v1 = vpop.eup %3046 }
 0x338   :  { %v1100_v50 = vpop.f32.mrf.mxu3 }
 0x339   :  { %v1131_v62 = vmul.f32 %v1100_v50, %v3950_v58  ;;  %v1128_v50 = vmul.f32 %v4006_v28, %v3962_v40  ;;  %v799_v40 = vmul.f32 1.442695, %v3859_v55 }
 0x33b   :  { %v1142_v28 = vpack.c.bf16 %v1128_v50, %v1127_v60 }
 0x340   :  { %v1102_v48 = vpop.f32.mrf.mxu3 }
 0x342   :  { %1400 = vmatmul.bf16.gmra.mxu1 %v1380_v52  ;;  %v807_v52 = vmul.f32 1.442695, %v3874_v63 }
 0x348   :  { %v1105_v13 = vpop.f32.mrf.mxu3 }
 0x349   :  { %v1133_v59 = vmul.f32 %v1105_v13, %v3996_v2 }
 0x350   :  { %v1107_v33 = vpop.f32.mrf.mxu3 }
 0x352   :  { %1405 = vmatmul.bf16.gmra.mxu1 %v1381_v44 }
 0x358   :  { %v1110_v37 = vpop.f32.mrf.mxu3 }
 0x359   :  { %v1135_v6 = vmul.f32 %v1110_v37, %v3990_v5  ;;  %v1132_v5 = vmul.f32 %v1102_v48, %v3952_v0  ;;  %v1129_v0 = vmul.f32 %v4012_v8, %v3956_v42  ;;  %v801_v8 = vmul.f32 1.442695, %v3866_v34 }
 0x35b   :  { %v1144_v49 = vpack.c.bf16 %v1132_v5, %v1131_v62 }
 0x360   :  { %v1112_v35 = vpop.f32.mrf.mxu3 }
 0x361   :  { %v1136_v15 = vmul.f32 %v1112_v35, %v3992_v31 }
 0x362   :  { %1410 = vmatmul.bf16.gmra.mxu1 %v1382_v7  ;;  %v805_v7 = vmul.f32 1.442695, %v3872_v45  ;;  %v809_v45 = vmul.f32 1.442695, %v3876_v27 }
 0x364   :  { %3048 = vpow2.f32 %v805_v7 }
 0x368   :  { %v1115_v4 = vpop.f32.mrf.mxu3 }
 0x369   :  { %v1137_v38 = vmul.f32 %v1115_v4, %v3978_v9  ;;  %v803_v9 = vmul.f32 1.442695, %v3870_v57 }
 0x36a   :  { %v3049_v29 = vpop.eup %3048 }
 0x36b   :  { %v832_v25 = vsel %vm768_vm10, %v784_v41, %v3049_v29 }
 0x36c   :  { %v848_v14 = vpack.c.bf16 %v832_v25, %v832_v25 }
 0x36e   :  { %v1162_v13 = vunpack.c.l.b16 %v848_v14 }
 0x370   :  { %v1117_v20 = vpop.f32.mrf.mxu3 }
 0x371   :  { %v1138_v16 = vmul.f32 %v1117_v20, %v3980_v53  ;;  %v1134_v53 = vmul.f32 %v1107_v33, %v3998_v43  ;;  %v1130_v43 = vmul.f32 %v1097_v19, %v3958_v32  ;;  %v828_v32 = vsel %vm764_vm9, %v780_v10, %v3047_v1 }
 0x372   :  { %v783_v19 = vadd.f32 1.0, %v3870_v57  ;;  %v844_v24 = vpack.c.bf16 %v828_v32, %v828_v32 }
 0x373   :  { %v1147_v44 = vpack.c.bf16 %v1138_v16, %v1137_v38  ;;  %v1145_v31 = vpack.c.bf16 %v1134_v53, %v1133_v59  ;;  %v1143_v17 = vpack.c.bf16 %v1130_v43, %v1129_v0 }
 0x374   :  { %v1158_v22 = vunpack.c.l.b16 %v844_v24 }
 0x378   :  { %v1120_v30 = vpop.f32.mrf.mxu3 }
 0x379   :  { %v1139_v47 = vmul.f32 %v1120_v30, %v3970_v51  ;;  %v795_v51 = vmul.f32 1.442695, %v3846_v26  ;;  %v1126_v26 = vmul.f32 %v3988_v18, %v3974_v46 }
 0x37b   :  { %3050 = vpow2.f32 %v795_v51  ;;  %v1141_v33 = vpack.c.bf16 %v1126_v26, %v1125_v39  ;;  %v2883_v39 = vld [vmem:[#allocation8 + $0x30] sm:$0xff] }
 0x37c   :  { %3052 = vpow2.f32 %v803_v9 }
 0x37d   :  { %3054 = vpow2.f32 %v801_v8 }
 0x37e   :  { %3056 = vpow2.f32 %v809_v45 }
 0x37f   :  { %3058 = vpow2.f32 %v799_v40 }
 0x380   :  { %v1122_v56 = vpop.f32.mrf.mxu3  ;;  %3060 = vpow2.f32 %v807_v52 }
 0x381   :  { %v1140_v11 = vmul.f32 %v1122_v56, %v3982_v21  ;;  %v1146_v21 = vpack.c.bf16 %v1136_v15, %v1135_v6  ;;  %v3051_v2 = vpop.eup %3050 }
 0x382   :  { %v3053_v58 = vpop.eup %3052  ;;  %v827_v42 = vsel %vm763_vm11, %v779_v23, %v3051_v2 }
 0x383   :  { %v1148_v12 = vpack.c.bf16 %v1140_v11, %v1139_v47  ;;  %v831_v54 = vsel %vm767_vm12, %v783_v19, %v3053_v58  ;;  %v843_v57 = vpack.c.bf16 %v827_v42, %v827_v42  ;;  %v3055_v4 = vpop.eup %3054  ;;  %v781_v47 = vadd.f32 1.0, %v3859_v55 }
 0x384   :  { %v847_v48 = vpack.c.bf16 %v831_v54, %v831_v54  ;;  %v3057_v20 = vpop.eup %3056  ;;  %v785_v11 = vadd.f32 1.0, %v3874_v63  ;;  %v830_v16 = vsel %vm766_vm13, %v782_v61, %v3055_v4 }
 0x385   :  { %1173 = vmatpush.bf16.msrb.mxu2 %v1148_v12  ;;  %2909 = vmatpush.bf16.msrb.mxu3 %v1148_v12  ;;  %v1157_v37 = vunpack.c.l.b16 %v843_v57  ;;  %v3059_v30 = vpop.eup %3058  ;;  %v834_v12 = vsel %vm770_vm14, %v786_v3, %v3057_v20 }
 0x386   :  { %v1161_v35 = vunpack.c.l.b16 %v847_v48  ;;  %v3061_v56 = vpop.eup %3060  ;;  %v829_v38 = vsel %vm765_vm15, %v781_v47, %v3059_v30  ;;  %v850_v36 = vpack.c.bf16 %v834_v12, %v834_v12  ;;  %v2884_v48 = vld [vmem:[#allocation8 + $0x38] sm:$0xff]  ;;  %v2879_v47 = vld [vmem:[#allocation8 + $0x10] sm:$0xff] }
 0x387   :  { %v1165_v46 = vpack.c.b16 %v1158_v22, %v1157_v37  ;;  %v833_v15 = vsel %vm769_vm0, %v785_v11, %v3061_v56  ;;  %v845_v6 = vpack.c.bf16 %v829_v38, %v829_v38  ;;  %v2882_v22 = vld [vmem:[#allocation8 + $0x28] sm:$0xff] }
 0x388   :  { %v1167_v18 = vpack.c.b16 %v1162_v13, %v1161_v35  ;;  %v849_v7 = vpack.c.bf16 %v833_v15, %v833_v15  ;;  %v1164_v34 = vunpack.c.l.b16 %v850_v36  ;;  %v2881_v35 = vld [vmem:[#allocation8 + $0x20] sm:$0xff] }
 0x389   :  { %1174 = vmatpush.bf16.msrb.mxu2 %v1147_v44  ;;  %2910 = vmatpush.bf16.msrb.mxu3 %v1147_v44  ;;  %v846_v44 = vpack.c.bf16 %v830_v16, %v830_v16  ;;  %v1159_v27 = vunpack.c.l.b16 %v845_v6 }
 0x38b   :  { %v1160_v51 = vunpack.c.l.b16 %v846_v44  ;;  %v2878_v44 = vld [vmem:[#allocation8 + $0x8] sm:$0xff] }
 0x38d   :  { %1175 = vmatpush.bf16.msrb.mxu2 %v1146_v21  ;;  %2911 = vmatpush.bf16.msrb.mxu3 %v1146_v21  ;;  %v1163_v21 = vunpack.c.l.b16 %v849_v7  ;;  %v1166_v9 = vpack.c.b16 %v1160_v51, %v1159_v27 }
 0x38f   :  { %v1168_v59 = vpack.c.b16 %v1164_v34, %v1163_v21  ;;  %v2877_v21 = vld [vmem:[#allocation8] sm:$0xff] }
 0x391   :  { %1176 = vmatpush.bf16.msrb.mxu2 %v1145_v31  ;;  %2912 = vmatpush.bf16.msrb.mxu3 %v1145_v31 }
 0x395   :  { %1177 = vmatpush.bf16.msrb.mxu2 %v1144_v49  ;;  %2913 = vmatpush.bf16.msrb.mxu3 %v1144_v49 }
 0x399   :  { %1178 = vmatpush.bf16.msrb.mxu2 %v1143_v17  ;;  %2914 = vmatpush.bf16.msrb.mxu3 %v1143_v17 }
 0x39d   :  { %1179 = vmatpush.bf16.msrb.mxu2 %v1142_v28  ;;  %2915 = vmatpush.bf16.msrb.mxu3 %v1142_v28 }
 0x3a1   :  { %1180 = vmatpush.bf16.msrb.mxu2 %v1141_v33  ;;  %2916 = vmatpush.bf16.msrb.mxu3 %v1141_v33 }
 0x3a4   :  { %1181 = vmatmul.bf16.vlgmr.msrb.gmra.mxu2 %v1165_v46  ;;  %1191 = vmatmul.bf16.vlgmr.msrb.gmra.mxu3 %v1167_v18  ;;  %v2880_v18 = vld [vmem:[#allocation8 + $0x18] sm:$0xff] }
 0x3a5   :  { %1792 = vmatpush.bf16.msra.mxu2 %v2884_v48 }
 0x3a9   :  { %1793 = vmatpush.bf16.msra.mxu2 %v2883_v39 }
 0x3ad   :  { %1794 = vmatpush.bf16.msra.mxu2 %v2882_v22 }
 0x3af   :  { %v4071_v53 = vpop.f32.mrf.mxu1 }
 0x3b0   :  { %v1424_v45 = vmul.f32 %v4071_v53, %v4071_v53 }
 0x3b1   :  { %1795 = vmatpush.bf16.msra.mxu2 %v2881_v35 }
 0x3b4   :  { %1186 = vmatmul.bf16.gmra.mxu2 %v1166_v9  ;;  %1196 = vmatmul.bf16.gmra.mxu3 %v1168_v59 }
 0x3b5   :  { %1796 = vmatpush.bf16.msra.mxu2 %v2880_v18 }
 0x3b7   :  { %v4073_v5 = vpop.f32.mrf.mxu1 }
 0x3b8   :  { %v1425_v24 = vmul.f32 %v4073_v5, %v4073_v5 }
 0x3b9   :  { %1797 = vmatpush.bf16.msra.mxu2 %v2879_v47 }
 0x3bd   :  { %1798 = vmatpush.bf16.msra.mxu2 %v2878_v44 }
 0x3bf   :  { %v4075_v55 = vpop.f32.mrf.mxu1 }
 0x3c0   :  { %v1426_v14 = vmul.f32 %v4075_v55, %v4075_v55 }
 0x3c1   :  { %1799 = vmatpush.bf16.msra.mxu2 %v2877_v21 }
 0x3c7   :  { %v4077_v63 = vpop.f32.mrf.mxu1 }
 0x3c8   :  { %v1427_v31 = vmul.f32 %v4077_v63, %v4077_v63 }
 0x3ca   :  { %1454 = vadd.xlane.f32.xlu2 %v1427_v31 }
 0x3cf   :  { %v4081_v62 = vpop.f32.mrf.mxu1 }
 0x3d0   :  { %v1428_v40 = vmul.f32 %v4081_v62, %v4081_v62 }
 0x3d7   :  { %v4083_v1 = vpop.f32.mrf.mxu1 }
 0x3d8   :  { %v1429_v26 = vmul.f32 %v4083_v1, %v4083_v1 }
 0x3df   :  { %v4085_v43 = vpop.f32.mrf.mxu1 }
 0x3e0   :  { %v1430_v49 = vmul.f32 %v4085_v43, %v4085_v43 }
 0x3e2   :  { %1460 = vadd.xlane.f32.xlu1 %v1430_v49 }
 0x3e7   :  { %v4131_v28 = vpop.f32.mrf.mxu1 }
 0x3e8   :  { %v1431_v57 = vmul.f32 %v4131_v28, %v4131_v28 }
 0x427   :  { %v4089_v29 = vpop.f32.mrf.mxu2  ;;  %v4101_v23 = vpop.f32.mrf.mxu3 }
 0x428   :  { %v1416_v10 = vmul.f32 %v4089_v29, %v4089_v29  ;;  %v1420_v50 = vmul.f32 %v4101_v23, %v4101_v23 }
 0x42a   :  { %1432 = vadd.xlane.f32.xlu0 %v1416_v10 }
 0x42f   :  { %v4093_v2 = vpop.f32.mrf.mxu2  ;;  %v4109_v17 = vpop.f32.mrf.mxu3 }
 0x430   :  { %v1417_v41 = vmul.f32 %v4093_v2, %v4093_v2  ;;  %v1421_v25 = vmul.f32 %v4109_v17, %v4109_v17 }
 0x432   :  { %1434 = vadd.xlane.f32.xlu0 %v1417_v41 }
 0x437   :  { %v4097_v0 = vpop.f32.mrf.mxu2  ;;  %v4113_v42 = vpop.f32.mrf.mxu3 }
 0x438   :  { %v1418_v58 = vmul.f32 %v4097_v0, %v4097_v0  ;;  %v1422_v8 = vmul.f32 %v4113_v42, %v4113_v42 }
 0x43a   :  { %1436 = vadd.xlane.f32.xlu0 %v1418_v58 }
 0x43f   :  { %v4103_v32 = vpop.f32.mrf.mxu2  ;;  %v4117_v54 = vpop.f32.mrf.mxu3 }
 0x440   :  { %v1419_v19 = vmul.f32 %v4103_v32, %v4103_v32  ;;  %v1423_v60 = vmul.f32 %v4117_v54, %v4117_v54 }
 0x442   :  { %1438 = vadd.xlane.f32.xlu0 %v1419_v19 }
 0x44a   :  { %1440 = vadd.xlane.f32.xlu0 %v1420_v50 }
 0x452   :  { %1442 = vadd.xlane.f32.xlu0 %v1421_v25 }
 0x45a   :  { %1444 = vadd.xlane.f32.xlu0 %v1422_v8 }
 0x462   :  { %1446 = vadd.xlane.f32.xlu0 %v1423_v60 }
 0x46a   :  { %1448 = vadd.xlane.f32.xlu0 %v1424_v45 }
 0x472   :  { %1450 = vadd.xlane.f32.xlu0 %v1425_v24 }
 0x47a   :  { %1452 = vadd.xlane.f32.xlu0 %v1426_v14 }
 0x482   :  { %1456 = vadd.xlane.f32.xlu0 %v1428_v40 }
 0x48a   :  { %1458 = vadd.xlane.f32.xlu0 %v1429_v26 }
 0x492   :  { %1462 = vadd.xlane.f32.xlu0 %v1431_v57 }
 0x49d   :  { %v1433_v52 = vpop.xlane.xlu0 %1432 }
 0x49e   :  { %3062 = vrsqrt.f32 %v1433_v52  ;;  %vm1471_vm1 = vcmp.eq.f32.partialorder %v1433_v52, inf  ;;  %v1474_v12 = vand.u32 2147483648, %v1433_v52  ;;  %vm1473_vm2 = vcmp.eq.f32.partialorder %v1433_v52, 0.0 }
 0x4a4   :  { %v3063_v13 = vpop.eup %3062 }
 0x4a5   :  { %v1465_v33 = vmul.f32 %v3063_v13, %v1433_v52  ;;  %v1435_v37 = vpop.xlane.xlu0 %1434 }
 0x4a6   :  { %3064 = vrsqrt.f32 %v1435_v37  ;;  %vm1483_vm3 = vcmp.eq.f32.partialorder %v1435_v37, inf  ;;  %v1486_v49 = vand.u32 2147483648, %v1435_v37  ;;  %vm1485_vm4 = vcmp.eq.f32.partialorder %v1435_v37, 0.0 }
 0x4a7   :  { %v1466_v46 = vmul.f32 %v3063_v13, %v1465_v33 }
 0x4a9   :  { %v1467_v4 = vmul.f32 0.5, %v1466_v46 }
 0x4ab   :  { %v1468_v20 = vsub.f32 1.5, %v1467_v4 }
 0x4ac   :  { %v3065_v30 = vpop.eup %3064 }
 0x4ad   :  { %v1469_v61 = vmul.f32 %v3063_v13, %v1468_v20  ;;  %v1477_v3 = vmul.f32 %v3065_v30, %v1435_v37  ;;  %v1437_v56 = vpop.xlane.xlu0 %1436 }
 0x4ae   :  { %3066 = vrsqrt.f32 %v1437_v56  ;;  %vm1495_vm5 = vcmp.eq.f32.partialorder %v1437_v56, inf  ;;  %v1498_v57 = vand.u32 2147483648, %v1437_v56  ;;  %vm1497_vm6 = vcmp.eq.f32.partialorder %v1437_v56, 0.0 }
 0x4af   :  { %v1470_v11 = vmul.f32 %v1469_v61, %v1433_v52  ;;  %v1478_v16 = vmul.f32 %v3065_v30, %v1477_v3 }
 0x4b1   :  { %v1472_v38 = vsel %vm1471_vm1, %v1433_v52, %v1470_v11  ;;  %v1479_v15 = vmul.f32 0.5, %v1478_v16 }
 0x4b2   :  { %v1475_v36 = vsel %vm1473_vm2, %v1474_v12, %v1472_v38 }
 0x4b3   :  { %v1480_v6 = vsub.f32 1.5, %v1479_v15  ;;  %v1656_v9 = vmul.f32 0.17677669, %v1475_v36 }
 0x4b4   :  { %v3067_v7 = vpop.eup %3066 }
 0x4b5   :  { %v1481_v51 = vmul.f32 %v3065_v30, %v1480_v6  ;;  %v1489_v34 = vmul.f32 %v3067_v7, %v1437_v56  ;;  %v1439_v27 = vpop.xlane.xlu0 %1438  ;;  %v1672_v58 = vadd.f32 1e-08, %v1656_v9 }
 0x4b6   :  { %3068 = vrsqrt.f32 %v1439_v27  ;;  %vm1507_vm7 = vcmp.eq.f32.partialorder %v1439_v27, inf  ;;  %v1510_v47 = vand.u32 2147483648, %v1439_v27  ;;  %vm1509_vm8 = vcmp.eq.f32.partialorder %v1439_v27, 0.0 }
 0x4b7   :  { %v1482_v59 = vmul.f32 %v1481_v51, %v1435_v37  ;;  %v1490_v31 = vmul.f32 %v3067_v7, %v1489_v34  ;;  %3070 = vrcp.f32 %v1672_v58 }
 0x4b9   :  { %v1484_v10 = vsel %vm1483_vm3, %v1435_v37, %v1482_v59  ;;  %v1491_v41 = vmul.f32 0.5, %v1490_v31 }
 0x4ba   :  { %v1487_v19 = vsel %vm1485_vm4, %v1486_v49, %v1484_v10 }
 0x4bb   :  { %v1492_v50 = vsub.f32 1.5, %v1491_v41  ;;  %v1657_v25 = vmul.f32 0.17677669, %v1487_v19 }
 0x4bc   :  { %v3069_v8 = vpop.eup %3068 }
 0x4bd   :  { %v1493_v60 = vmul.f32 %v3067_v7, %v1492_v50  ;;  %v1501_v45 = vmul.f32 %v3069_v8, %v1439_v27  ;;  %v1441_v24 = vpop.xlane.xlu0 %1440  ;;  %v1673_v14 = vadd.f32 1e-08, %v1657_v25  ;;  %v3071_v22 = vpop.eup %3070 }
 0x4be   :  { %3072 = vrsqrt.f32 %v1441_v24  ;;  %v1704_v61 = vmul.f32 %v3071_v22, %v4089_v29  ;;  %vm1519_vm9 = vcmp.eq.f32.partialorder %v1441_v24, inf  ;;  %v1522_v21 = vand.u32 2147483648, %v1441_v24 }
 0x4bf   :  { %v1494_v40 = vmul.f32 %v1493_v60, %v1437_v56  ;;  %v1502_v26 = vmul.f32 %v3069_v8, %v1501_v45  ;;  %3074 = vrcp.f32 %v1673_v14  ;;  %vm1521_vm10 = vcmp.eq.f32.partialorder %v1441_v24, 0.0 }
 0x4c1   :  { %v1503_v48 = vmul.f32 0.5, %v1502_v26  ;;  %v1496_v52 = vsel %vm1495_vm5, %v1437_v56, %v1494_v40  ;;  %v4139_v40 = vpop.xlane.xlu2 %1454 }
 0x4c2   :  { %v1499_v39 = vsel %vm1497_vm6, %v1498_v57, %v1496_v52  ;;  %vm1603_vm5 = vcmp.eq.f32.partialorder %v4139_v40, inf }
 0x4c3   :  { %v1504_v13 = vsub.f32 1.5, %v1503_v48  ;;  %v1658_v4 = vmul.f32 0.17677669, %v1499_v39 }
 0x4c4   :  { %v3073_v33 = vpop.eup %3072 }
 0x4c5   :  { %v3075_v37 = vpop.eup %3074  ;;  %v1505_v35 = vmul.f32 %v3069_v8, %v1504_v13  ;;  %v1513_v46 = vmul.f32 %v3073_v33, %v1441_v24  ;;  %v1443_v18 = vpop.xlane.xlu0 %1442  ;;  %v1674_v12 = vadd.f32 1e-08, %v1658_v4 }
 0x4c6   :  { %3076 = vrsqrt.f32 %v1443_v18  ;;  %v1705_v3 = vmul.f32 %v3075_v37, %v4093_v2  ;;  %vm1531_vm11 = vcmp.eq.f32.partialorder %v1443_v18, inf  ;;  %vm1533_vm12 = vcmp.eq.f32.partialorder %v1443_v18, 0.0 }
 0x4c7   :  { %v1506_v20 = vmul.f32 %v1505_v35, %v1439_v27  ;;  %v1514_v30 = vmul.f32 %v3073_v33, %v1513_v46  ;;  %3078 = vrcp.f32 %v1674_v12 }
 0x4c8   :  { %v1720_v11 = vpack.c.bf16 %v1705_v3, %v1704_v61 }
 0x4c9   :  { %v1515_v56 = vmul.f32 0.5, %v1514_v30  ;;  %v1508_v16 = vsel %vm1507_vm7, %v1439_v27, %v1506_v20 }
 0x4ca   :  { %v1511_v38 = vsel %vm1509_vm8, %v1510_v47, %v1508_v16  ;;  %1800 = vmatmul.bf16.vlgmr.msra.gmra.mxu2 %v1720_v11  ;;  %vm1605_vm8 = vcmp.eq.f32.partialorder %v4139_v40, 0.0 }
 0x4cb   :  { %v1516_v15 = vsub.f32 1.5, %v1515_v56  ;;  %v1659_v44 = vmul.f32 0.17677669, %v1511_v38 }
 0x4cc   :  { %v3077_v36 = vpop.eup %3076 }
 0x4cd   :  { %v1517_v6 = vmul.f32 %v3073_v33, %v1516_v15  ;;  %v1525_v7 = vmul.f32 %v3077_v36, %v1443_v18  ;;  %v1445_v51 = vpop.xlane.xlu0 %1444  ;;  %v1675_v34 = vadd.f32 1e-08, %v1659_v44  ;;  %v3079_v31 = vpop.eup %3078 }
 0x4ce   :  { %3080 = vrsqrt.f32 %v1445_v51  ;;  %v1706_v45 = vmul.f32 %v3079_v31, %v4097_v0  ;;  %vm1543_vm13 = vcmp.eq.f32.partialorder %v1445_v51, inf  ;;  %vm1545_vm14 = vcmp.eq.f32.partialorder %v1445_v51, 0.0 }
 0x4cf   :  { %v1518_v29 = vmul.f32 %v1517_v6, %v1441_v24  ;;  %v1526_v2 = vmul.f32 %v3077_v36, %v1525_v7  ;;  %3082 = vrcp.f32 %v1675_v34 }
 0x4d1   :  { %v1520_v9 = vsel %vm1519_vm9, %v1441_v24, %v1518_v29  ;;  %v1527_v27 = vmul.f32 0.5, %v1526_v2  ;;  %v1534_v24 = vand.u32 2147483648, %v1443_v18 }
 0x4d2   :  { %v1523_v59 = vsel %vm1521_vm10, %v1522_v21, %v1520_v9 }
 0x4d3   :  { %v1528_v49 = vsub.f32 1.5, %v1527_v27  ;;  %v1660_v25 = vmul.f32 0.17677669, %v1523_v59 }
 0x4d4   :  { %v3081_v10 = vpop.eup %3080 }
 0x4d5   :  { %v3083_v41 = vpop.eup %3082  ;;  %v1529_v58 = vmul.f32 %v3077_v36, %v1528_v49  ;;  %v1537_v19 = vmul.f32 %v3081_v10, %v1445_v51  ;;  %v1447_v50 = vpop.xlane.xlu0 %1446  ;;  %v1676_v52 = vadd.f32 1e-08, %v1660_v25 }
 0x4d6   :  { %3084 = vrsqrt.f32 %v1447_v50  ;;  %v1707_v14 = vmul.f32 %v3083_v41, %v4103_v32  ;;  %vm1555_vm15 = vcmp.eq.f32.partialorder %v1447_v50, inf  ;;  %vm1557_vm0 = vcmp.eq.f32.partialorder %v1447_v50, 0.0 }
 0x4d7   :  { %v1530_v8 = vmul.f32 %v1529_v58, %v1443_v18  ;;  %v1538_v60 = vmul.f32 %v3081_v10, %v1537_v19  ;;  %3086 = vrsqrt.f32 %v4139_v40  ;;  %v1558_v29 = vand.u32 2147483648, %v1447_v50 }
 0x4d8   :  { %v1721_v48 = vpack.c.bf16 %v1707_v14, %v1706_v45  ;;  %3088 = vrcp.f32 %v1676_v52 }
 0x4d9   :  { %v1532_v26 = vsel %vm1531_vm11, %v1443_v18, %v1530_v8  ;;  %v1539_v57 = vmul.f32 0.5, %v1538_v60  ;;  %v1546_v18 = vand.u32 2147483648, %v1445_v51 }
 0x4da   :  { %v1535_v39 = vsel %vm1533_vm12, %v1534_v24, %v1532_v26  ;;  %1805 = vmatmul.bf16.gmra.mxu2 %v1721_v48 }
 0x4db   :  { %v1540_v22 = vsub.f32 1.5, %v1539_v57  ;;  %v1661_v13 = vmul.f32 0.17677669, %v1535_v39 }
 0x4dc   :  { %v3085_v33 = vpop.eup %3084 }
 0x4dd   :  { %v1541_v37 = vmul.f32 %v3081_v10, %v1540_v22  ;;  %v1549_v0 = vmul.f32 %v3085_v33, %v1447_v50  ;;  %v1449_v35 = vpop.xlane.xlu0 %1448  ;;  %v1677_v32 = vadd.f32 1e-08, %v1661_v13  ;;  %v3087_v61 = vpop.eup %3086 }
 0x4de   :  { %3090 = vrsqrt.f32 %v1449_v35  ;;  %v3089_v47 = vpop.eup %3088  ;;  %vm1567_vm1 = vcmp.eq.f32.partialorder %v1449_v35, inf  ;;  %v1570_v60 = vand.u32 2147483648, %v1449_v35  ;;  %vm1569_vm2 = vcmp.eq.f32.partialorder %v1449_v35, 0.0 }
 0x4df   :  { %v1542_v46 = vmul.f32 %v1541_v37, %v1445_v51  ;;  %v1550_v4 = vmul.f32 %v3085_v33, %v1549_v0  ;;  %3092 = vrcp.f32 %v1677_v32  ;;  %v1708_v7 = vmul.f32 %v3089_v47, %v4101_v23 }
 0x4e1   :  { %v1544_v20 = vsel %vm1543_vm13, %v1445_v51, %v1542_v46  ;;  %v1551_v30 = vmul.f32 0.5, %v1550_v4  ;;  %v1597_v51 = vmul.f32 %v3087_v61, %v4139_v40 }
 0x4e2   :  { %v1547_v3 = vsel %vm1545_vm14, %v1546_v18, %v1544_v20  ;;  %v4154_v20 = vpop.xlane.xlu1 %1460 }
 0x4e3   :  { %v1552_v56 = vsub.f32 1.5, %v1551_v30  ;;  %v1662_v44 = vmul.f32 0.17677669, %v1547_v3  ;;  %v1598_v41 = vmul.f32 %v3087_v61, %v1597_v51  ;;  %v1606_v51 = vand.u32 2147483648, %v4139_v40 }
 0x4e4   :  { %v3091_v11 = vpop.eup %3090  ;;  %vm1639_vm14 = vcmp.eq.f32.partialorder %v4154_v20, inf }
 0x4e5   :  { %v3093_v16 = vpop.eup %3092  ;;  %v1553_v12 = vmul.f32 %v3085_v33, %v1552_v56  ;;  %v1561_v38 = vmul.f32 %v3091_v11, %v1449_v35  ;;  %v1451_v15 = vpop.xlane.xlu0 %1450  ;;  %v1678_v27 = vadd.f32 1e-08, %v1662_v44 }
 0x4e6   :  { %3094 = vrsqrt.f32 %v1451_v15  ;;  %v1709_v34 = vmul.f32 %v3093_v16, %v4109_v17  ;;  %vm1579_vm3 = vcmp.eq.f32.partialorder %v1451_v15, inf  ;;  %vm1581_vm4 = vcmp.eq.f32.partialorder %v1451_v15, 0.0 }
 0x4e7   :  { %v1554_v36 = vmul.f32 %v1553_v12, %v1447_v50  ;;  %v1562_v6 = vmul.f32 %v3091_v11, %v1561_v38  ;;  %3096 = vrcp.f32 %v1678_v27  ;;  %v1582_v18 = vand.u32 2147483648, %v1451_v15 }
 0x4e8   :  { %v1722_v9 = vpack.c.bf16 %v1709_v34, %v1708_v7 }
 0x4e9   :  { %v1556_v2 = vsel %vm1555_vm15, %v1447_v50, %v1554_v36  ;;  %v1563_v21 = vmul.f32 0.5, %v1562_v6  ;;  %v1599_v50 = vmul.f32 0.5, %v1598_v41 }
 0x4ea   :  { %v1559_v59 = vsel %vm1557_vm0, %v1558_v29, %v1556_v2  ;;  %1810 = vmatmul.bf16.gmra.mxu2 %v1722_v9  ;;  %vm1641_vm0 = vcmp.eq.f32.partialorder %v4154_v20, 0.0 }
 0x4eb   :  { %v1564_v31 = vsub.f32 1.5, %v1563_v21  ;;  %v1663_v49 = vmul.f32 0.17677669, %v1559_v59  ;;  %v1600_v52 = vsub.f32 1.5, %v1599_v50 }
 0x4ec   :  { %v3095_v10 = vpop.eup %3094 }
 0x4ed   :  { %v1565_v58 = vmul.f32 %v3091_v11, %v1564_v31  ;;  %v1573_v19 = vmul.f32 %v3095_v10, %v1451_v15  ;;  %v4145_v23 = vpop.xlane.xlu0 %1452  ;;  %v1679_v17 = vadd.f32 1e-08, %v1663_v49  ;;  %v3097_v26 = vpop.eup %3096  ;;  %v1601_v4 = vmul.f32 %v3087_v61, %v1600_v52 }
 0x4ee   :  { %3098 = vrsqrt.f32 %v4145_v23  ;;  %v1710_v46 = vmul.f32 %v3097_v26, %v4113_v42  ;;  %vm1591_vm6 = vcmp.eq.f32.partialorder %v4145_v23, inf  ;;  %v1594_v34 = vand.u32 2147483648, %v4145_v23 }
 0x4ef   :  { %v1566_v25 = vmul.f32 %v1565_v58, %v1449_v35  ;;  %v1574_v8 = vmul.f32 %v3095_v10, %v1573_v19  ;;  %3100 = vrcp.f32 %v1679_v17  ;;  %v1602_v44 = vmul.f32 %v1601_v4, %v4139_v40 }
 0x4f0   :  { %vm1593_vm7 = vcmp.eq.f32.partialorder %v4145_v23, 0.0 }
 0x4f1   :  { %v1568_v45 = vsel %vm1567_vm1, %v1449_v35, %v1566_v25  ;;  %v1575_v14 = vmul.f32 0.5, %v1574_v8  ;;  %v1604_v7 = vsel %vm1603_vm5, %v4139_v40, %v1602_v44 }
 0x4f2   :  { %v1571_v24 = vsel %vm1569_vm2, %v1570_v60, %v1568_v45  ;;  %v1607_v59 = vsel %vm1605_vm8, %v1606_v51, %v1604_v7 }
 0x4f3   :  { %v1576_v57 = vsub.f32 1.5, %v1575_v14  ;;  %v1664_v37 = vmul.f32 0.17677669, %v1571_v24  ;;  %v1667_v17 = vmul.f32 0.17677669, %v1607_v59 }
 0x4f4   :  { %v3099_v48 = vpop.eup %3098 }
 0x4f5   :  { %v3101_v39 = vpop.eup %3100  ;;  %v1577_v22 = vmul.f32 %v3095_v10, %v1576_v57  ;;  %v1585_v13 = vmul.f32 %v3099_v48, %v4145_v23  ;;  %v4149_v33 = vpop.xlane.xlu0 %1456  ;;  %v1680_v56 = vadd.f32 1e-08, %v1664_v37  ;;  %v1683_v24 = vadd.f32 1e-08, %v1667_v17 }
 0x4f6   :  { %3102 = vrsqrt.f32 %v4149_v33  ;;  %v1711_v35 = vmul.f32 %v3101_v39, %v4117_v54  ;;  %vm1615_vm9 = vcmp.eq.f32.partialorder %v4149_v33, inf  ;;  %vm1617_vm12 = vcmp.eq.f32.partialorder %v4149_v33, 0.0 }
 0x4f7   :  { %v1578_v0 = vmul.f32 %v1577_v22, %v1451_v15  ;;  %v1586_v32 = vmul.f32 %v3099_v48, %v1585_v13  ;;  %3104 = vrsqrt.f32 %v4154_v20 }
 0x4f8   :  { %v1723_v47 = vpack.c.bf16 %v1711_v35, %v1710_v46  ;;  %3106 = vrcp.f32 %v1680_v56 }
 0x4f9   :  { %v1580_v30 = vsel %vm1579_vm3, %v1451_v15, %v1578_v0  ;;  %v1587_v3 = vmul.f32 0.5, %v1586_v32  ;;  %v1618_v32 = vand.u32 2147483648, %v4149_v33 }
 0x4fa   :  { %v1583_v11 = vsel %vm1581_vm4, %v1582_v18, %v1580_v30  ;;  %1815 = vmatmul.bf16.gmra.mxu2 %v1723_v47 }
 0x4fb   :  { %v1588_v16 = vsub.f32 1.5, %v1587_v3  ;;  %v1665_v12 = vmul.f32 0.17677669, %v1583_v11 }
 0x4fc   :  { %v3103_v38 = vpop.eup %3102 }
 0x4fd   :  { %v1589_v42 = vmul.f32 %v3099_v48, %v1588_v16  ;;  %v1609_v54 = vmul.f32 %v3103_v38, %v4149_v33  ;;  %v1459_v61 = vpop.xlane.xlu0 %1458  ;;  %v1681_v36 = vadd.f32 1e-08, %v1665_v12  ;;  %v3105_v21 = vpop.eup %3104 }
 0x4fe   :  { %3108 = vrsqrt.f32 %v1459_v61  ;;  %v3107_v27 = vpop.eup %3106  ;;  %v1633_v50 = vmul.f32 %v3105_v21, %v4154_v20  ;;  %vm1627_vm10 = vcmp.eq.f32.partialorder %v1459_v61, inf  ;;  %v1630_v0 = vand.u32 2147483648, %v1459_v61 }
 0x4ff   :  { %v1590_v15 = vmul.f32 %v1589_v42, %v4145_v23  ;;  %v1610_v6 = vmul.f32 %v3103_v38, %v1609_v54  ;;  %3110 = vrcp.f32 %v1681_v36  ;;  %v1712_v8 = vmul.f32 %v3107_v27, %v4071_v53 }
 0x500   :  { %v1634_v48 = vmul.f32 %v3105_v21, %v1633_v50  ;;  %vm1629_vm11 = vcmp.eq.f32.partialorder %v1459_v61, 0.0 }
 0x501   :  { %v1592_v29 = vsel %vm1591_vm6, %v4145_v23, %v1590_v15  ;;  %v1611_v2 = vmul.f32 0.5, %v1610_v6 }
 0x502   :  { %v1595_v9 = vsel %vm1593_vm7, %v1594_v34, %v1592_v29  ;;  %v1635_v13 = vmul.f32 0.5, %v1634_v48 }
 0x503   :  { %v1612_v49 = vsub.f32 1.5, %v1611_v2  ;;  %v1666_v10 = vmul.f32 0.17677669, %v1595_v9 }
 0x504   :  { %v3109_v31 = vpop.eup %3108  ;;  %v1636_v56 = vsub.f32 1.5, %v1635_v13 }
 0x505   :  { %v3111_v41 = vpop.eup %3110  ;;  %v1621_v58 = vmul.f32 %v3109_v31, %v1459_v61  ;;  %v1463_v19 = vpop.xlane.xlu0 %1462  ;;  %v1613_v60 = vmul.f32 %v3103_v38, %v1612_v49  ;;  %v1682_v40 = vadd.f32 1e-08, %v1666_v10 }
 0x506   :  { %3112 = vrsqrt.f32 %v1463_v19  ;;  %v1713_v23 = vmul.f32 %v3111_v41, %v4073_v5  ;;  %v1637_v42 = vmul.f32 %v3105_v21, %v1636_v56  ;;  %vm1651_vm13 = vcmp.eq.f32.partialorder %v1463_v19, inf  ;;  %v3228_v56 = vld [vmem:[#allocation2 + $0x30] sm:$0xff] }
 0x507   :  { %v1622_v25 = vmul.f32 %v3109_v31, %v1621_v58  ;;  %v1614_v52 = vmul.f32 %v1613_v60, %v4149_v33  ;;  %3114 = vrcp.f32 %v1682_v40  ;;  %v1654_v7 = vand.u32 2147483648, %v1463_v19  ;;  %v3223_v60 = vld [vmem:[#allocation2 + $0x8] sm:$0xff] }
 0x508   :  { %v1724_v14 = vpack.c.bf16 %v1713_v23, %v1712_v8  ;;  %3116 = vrcp.f32 %v1683_v24  ;;  %vm1653_vm15 = vcmp.eq.f32.partialorder %v1463_v19, 0.0  ;;  %v3224_v24 = vld [vmem:[#allocation2 + $0x10] sm:$0xff] }
 0x509   :  { %v1623_v45 = vmul.f32 0.5, %v1622_v25  ;;  %v1616_v37 = vsel %vm1615_vm9, %v4149_v33, %v1614_v52  ;;  %v1638_v33 = vmul.f32 %v1637_v42, %v4154_v20  ;;  %v3222_v25 = vld [vmem:[#allocation2] sm:$0xff] }
 0x50a   :  { %1820 = vmatmul.bf16.gmra.mxu2 %v1724_v14  ;;  %v1619_v3 = vsel %vm1617_vm12, %v1618_v32, %v1616_v37  ;;  %v3226_v37 = vld [vmem:[#allocation2 + $0x20] sm:$0xff] }
 0x50b   :  { %v1624_v26 = vsub.f32 1.5, %v1623_v45  ;;  %v1668_v38 = vmul.f32 0.17677669, %v1619_v3 }
 0x50c   :  { %v3113_v57 = vpop.eup %3112 }
 0x50d   :  { %v1625_v39 = vmul.f32 %v3109_v31, %v1624_v26  ;;  %v1645_v22 = vmul.f32 %v3113_v57, %v1463_v19  ;;  %v3115_v4 = vpop.eup %3114  ;;  %v1684_v15 = vadd.f32 1e-08, %v1668_v38 }
 0x50e   :  { %v3117_v47 = vpop.eup %3116  ;;  %v1714_v16 = vmul.f32 %v3115_v4, %v4075_v55  ;;  %v1640_v55 = vsel %vm1639_vm14, %v4154_v20, %v1638_v33  ;;  %v3227_v4 = vld [vmem:[#allocation2 + $0x28] sm:$0xff] }
 0x50f   :  { %v1626_v53 = vmul.f32 %v1625_v39, %v1459_v61  ;;  %v1646_v5 = vmul.f32 %v3113_v57, %v1645_v22  ;;  %v1715_v44 = vmul.f32 %v3117_v47, %v4077_v63  ;;  %v1642_v63 = vand.u32 2147483648, %v4154_v20  ;;  %v3225_v39 = vld [vmem:[#allocation2 + $0x18] sm:$0xff] }
 0x511   :  { %v1628_v46 = vsel %vm1627_vm10, %v1459_v61, %v1626_v53  ;;  %v1647_v35 = vmul.f32 0.5, %v1646_v5  ;;  %v1725_v36 = vpack.c.bf16 %v1715_v44, %v1714_v16  ;;  %v1643_v29 = vsel %vm1641_vm0, %v1642_v63, %v1640_v55  ;;  %v3229_v44 = vld [vmem:[#allocation2 + $0x38] sm:$0xff]  ;;  %v3231_v63 = vld [vmem:[#allocation2 + $0x48] sm:$0xff] }
 0x512   :  { %v1631_v18 = vsel %vm1629_vm11, %v1630_v0, %v1628_v46  ;;  %v1670_v27 = vmul.f32 0.17677669, %v1643_v29 }
 0x513   :  { %v1648_v30 = vsub.f32 1.5, %v1647_v35  ;;  %v1669_v11 = vmul.f32 0.17677669, %v1631_v18 }
 0x514   :  { %v1686_v10 = vadd.f32 1e-08, %v1670_v27 }
 0x515   :  { %v1649_v12 = vmul.f32 %v3113_v57, %v1648_v30  ;;  %v1685_v54 = vadd.f32 1e-08, %v1669_v11 }
 0x517   :  { %v1650_v61 = vmul.f32 %v1649_v12, %v1463_v19  ;;  %3118 = vrcp.f32 %v1685_v54 }
 0x518   :  { %3120 = vrcp.f32 %v1684_v15  ;;  %v3230_v15 = vld [vmem:[#allocation2 + $0x40] sm:$0xff] }
 0x519   :  { %v1652_v6 = vsel %vm1651_vm13, %v1463_v19, %v1650_v61 }
 0x51a   :  { %1825 = vmatmul.bf16.gmra.mxu2 %v1725_v36  ;;  %v1655_v34 = vsel %vm1653_vm15, %v1654_v7, %v1652_v6 }
 0x51b   :  { %v1671_v21 = vmul.f32 0.17677669, %v1655_v34 }
 0x51d   :  { %v3119_v51 = vpop.eup %3118  ;;  %v1687_v31 = vadd.f32 1e-08, %v1671_v21  ;;  %v3232_v21 = vld [vmem:[#allocation2 + $0x50] sm:$0xff] }
 0x51e   :  { %v3121_v2 = vpop.eup %3120  ;;  %v1717_v9 = vmul.f32 %v3119_v51, %v4083_v1  ;;  %v4190_v1 = vld [vmem:[%s4356_s4] ss:$0 sm:$0xff] }
 0x51f   :  { %v1716_v59 = vmul.f32 %v3121_v2, %v4081_v62  ;;  %3122 = vrcp.f32 %v1687_v31 }
 0x520   :  { %3124 = vrcp.f32 %v1686_v10 }
 0x521   :  { %v1726_v49 = vpack.c.bf16 %v1717_v9, %v1716_v59 }
 0x525   :  { %v3123_v41 = vpop.eup %3122 }
 0x526   :  { %v3125_v58 = vpop.eup %3124  ;;  %v1719_v19 = vmul.f32 %v3123_v41, %v4131_v28 }
 0x527   :  { %v1718_v20 = vmul.f32 %v3125_v58, %v4085_v43 }
 0x529   :  { %v1727_v17 = vpack.c.bf16 %v1719_v19, %v1718_v20  ;;  %v3234_v20 = vld [vmem:[#allocation2 + $0x60] sm:$0xff] }
 0x52a   :  { %1830 = vmatmul.bf16.gmra.mxu2 %v1726_v49  ;;  %v3233_v49 = vld [vmem:[#allocation2 + $0x58] sm:$0xff] }
 0x53a   :  { %1835 = vmatmul.bf16.gmra.mxu2 %v1727_v17 }
 0x54d   :  { %v1801_v62 = vpop.f32.mrf.mxu2 }
 0x54e   :  { %v1841_v8 = vadd.f32 %v3222_v25, %v1801_v62 }
 0x550   :  { %v4193_v23 = vadd.f32 %v4190_v1, %v1841_v8 }
 0x552   :  { %v1877_v50 = vmul.f32 %v4193_v23, %v4193_v23 }
 0x554   :  { %1893 = vadd.xlane.f32.xlu0 %v1877_v50  ;;  %v3235_v50 = vld [vmem:[#allocation2 + $0x68] sm:$0xff] }
 0x555   :  { %v1803_v28 = vpop.f32.mrf.mxu2 }
 0x556   :  { %v1842_v43 = vadd.f32 %v3223_v60, %v1803_v28 }
 0x558   :  { %v4198_v40 = vadd.f32 %v4190_v1, %v1842_v43 }
 0x55a   :  { %v1878_v45 = vmul.f32 %v4198_v40, %v4198_v40 }
 0x55c   :  { %1895 = vadd.xlane.f32.xlu0 %v1878_v45 }
 0x55d   :  { %v1806_v14 = vpop.f32.mrf.mxu2 }
 0x55e   :  { %v1843_v26 = vadd.f32 %v3224_v24, %v1806_v14  ;;  %v3236_v14 = vld [vmem:[#allocation2 + $0x70] sm:$0xff] }
 0x560   :  { %v4203_v57 = vadd.f32 %v4190_v1, %v1843_v26 }
 0x562   :  { %v1879_v48 = vmul.f32 %v4203_v57, %v4203_v57 }
 0x564   :  { %1897 = vadd.xlane.f32.xlu0 %v1879_v48 }
 0x565   :  { %v1808_v52 = vpop.f32.mrf.mxu2 }
 0x566   :  { %v1844_v22 = vadd.f32 %v3225_v39, %v1808_v52  ;;  %v2892_v52 = vld [vmem:[#allocation10 + $0x38] sm:$0xff] }
 0x567   :  { %2257 = vmatpush.bf16.msra.mxu3 %v2892_v52 }
 0x568   :  { %v4208_v53 = vadd.f32 %v4190_v1, %v1844_v22  ;;  %v3237_v22 = vld [vmem:[#allocation2 + $0x78] sm:$0xff] }
 0x56a   :  { %v1880_v5 = vmul.f32 %v4208_v53, %v4208_v53 }
 0x56c   :  { %1899 = vadd.xlane.f32.xlu0 %v1880_v5 }
 0x56d   :  { %v1811_v13 = vpop.f32.mrf.mxu2 }
 0x56e   :  { %v1845_v0 = vadd.f32 %v3226_v37, %v1811_v13  ;;  %v2891_v13 = vld [vmem:[#allocation10 + $0x30] sm:$0xff] }
 0x56f   :  { %2258 = vmatpush.bf16.msra.mxu3 %v2891_v13 }
 0x570   :  { %v4213_v32 = vadd.f32 %v4190_v1, %v1845_v0 }
 0x572   :  { %v1881_v46 = vmul.f32 %v4213_v32, %v4213_v32 }
 0x574   :  { %1901 = vadd.xlane.f32.xlu0 %v1881_v46  ;;  %v2890_v46 = vld [vmem:[#allocation10 + $0x28] sm:$0xff] }
 0x575   :  { %v1813_v35 = vpop.f32.mrf.mxu2  ;;  %2259 = vmatpush.bf16.msra.mxu3 %v2890_v46 }
 0x576   :  { %v1846_v18 = vadd.f32 %v3227_v4, %v1813_v35 }
 0x578   :  { %v4218_v30 = vadd.f32 %v4190_v1, %v1846_v18  ;;  %v2889_v18 = vld [vmem:[#allocation10 + $0x20] sm:$0xff] }
 0x579   :  { %2260 = vmatpush.bf16.msra.mxu3 %v2889_v18 }
 0x57a   :  { %v1882_v3 = vmul.f32 %v4218_v30, %v4218_v30 }
 0x57c   :  { %1903 = vadd.xlane.f32.xlu0 %v1882_v3 }
 0x57d   :  { %v1816_v47 = vpop.f32.mrf.mxu2 }
 0x57e   :  { %v1847_v11 = vadd.f32 %v3228_v56, %v1816_v47 }
 0x580   :  { %v4223_v16 = vadd.f32 %v4190_v1, %v1847_v11  ;;  %v2888_v11 = vld [vmem:[#allocation10 + $0x18] sm:$0xff] }
 0x581   :  { %2261 = vmatpush.bf16.msra.mxu3 %v2888_v11 }
 0x582   :  { %v1883_v12 = vmul.f32 %v4223_v16, %v4223_v16 }
 0x584   :  { %1905 = vadd.xlane.f32.xlu0 %v1883_v12 }
 0x585   :  { %v1818_v38 = vpop.f32.mrf.mxu2 }
 0x586   :  { %v1848_v42 = vadd.f32 %v3229_v44, %v1818_v38  ;;  %v2887_v44 = vld [vmem:[#allocation10 + $0x10] sm:$0xff] }
 0x587   :  { %2262 = vmatpush.bf16.msra.mxu3 %v2887_v44 }
 0x588   :  { %v4228_v54 = vadd.f32 %v4190_v1, %v1848_v42 }
 0x58a   :  { %v1884_v36 = vmul.f32 %v4228_v54, %v4228_v54 }
 0x58c   :  { %1907 = vadd.xlane.f32.xlu0 %v1884_v36 }
 0x58d   :  { %v1821_v61 = vpop.f32.mrf.mxu2 }
 0x58e   :  { %v1849_v33 = vadd.f32 %v3230_v15, %v1821_v61 }
 0x590   :  { %v4233_v6 = vadd.f32 %v4190_v1, %v1849_v33 }
 0x592   :  { %v1885_v7 = vmul.f32 %v4233_v6, %v4233_v6 }
 0x594   :  { %1909 = vadd.xlane.f32.xlu0 %v1885_v7 }
 0x595   :  { %v1823_v55 = vpop.f32.mrf.mxu2 }
 0x596   :  { %v1850_v34 = vadd.f32 %v3231_v63, %v1823_v55  ;;  %v2886_v55 = vld [vmem:[#allocation10 + $0x8] sm:$0xff] }
 0x597   :  { %2263 = vmatpush.bf16.msra.mxu3 %v2886_v55 }
 0x598   :  { %v4238_v51 = vadd.f32 %v4190_v1, %v1850_v34 }
 0x59a   :  { %v1886_v29 = vmul.f32 %v4238_v51, %v4238_v51 }
 0x59c   :  { %1911 = vadd.xlane.f32.xlu0 %v1886_v29 }
 0x59d   :  { %v1826_v2 = vpop.f32.mrf.mxu2 }
 0x59e   :  { %v1851_v9 = vadd.f32 %v3232_v21, %v1826_v2 }
 0x5a0   :  { %v4243_v27 = vadd.f32 %v4190_v1, %v1851_v9  ;;  %v2885_v9 = vld [vmem:[#allocation10] sm:$0xff] }
 0x5a1   :  { %2264 = vmatpush.bf16.msra.mxu3 %v2885_v9 }
 0x5a2   :  { %v1887_v59 = vmul.f32 %v4243_v27, %v4243_v27 }
 0x5a4   :  { %1913 = vadd.xlane.f32.xlu0 %v1887_v59 }
 0x5a5   :  { %v1828_v31 = vpop.f32.mrf.mxu2 }
 0x5a6   :  { %v1852_v10 = vadd.f32 %v3233_v49, %v1828_v31 }
 0x5a8   :  { %v4248_v41 = vadd.f32 %v4190_v1, %v1852_v10 }
 0x5aa   :  { %v1888_v58 = vmul.f32 %v4248_v41, %v4248_v41 }
 0x5ac   :  { %1915 = vadd.xlane.f32.xlu0 %v1888_v58 }
 0x5ad   :  { %v1831_v19 = vpop.f32.mrf.mxu2 }
 0x5ae   :  { %v1853_v17 = vadd.f32 %v3234_v20, %v1831_v19 }
 0x5b0   :  { %v4253_v62 = vadd.f32 %v4190_v1, %v1853_v17 }
 0x5b2   :  { %v1889_v25 = vmul.f32 %v4253_v62, %v4253_v62 }
 0x5b4   :  { %1917 = vadd.xlane.f32.xlu0 %v1889_v25 }
 0x5b5   :  { %v1833_v8 = vpop.f32.mrf.mxu2 }
 0x5b6   :  { %v1854_v28 = vadd.f32 %v3235_v50, %v1833_v8 }
 0x5b8   :  { %v4258_v60 = vadd.f32 %v4190_v1, %v1854_v28 }
 0x5ba   :  { %v1890_v43 = vmul.f32 %v4258_v60, %v4258_v60 }
 0x5bc   :  { %1919 = vadd.xlane.f32.xlu0 %v1890_v43 }
 0x5bd   :  { %v1836_v45 = vpop.f32.mrf.mxu2 }
 0x5be   :  { %v1855_v24 = vadd.f32 %v3236_v14, %v1836_v45 }
 0x5c0   :  { %v4263_v26 = vadd.f32 %v4190_v1, %v1855_v24 }
 0x5c2   :  { %v1891_v48 = vmul.f32 %v4263_v26, %v4263_v26 }
 0x5c4   :  { %1921 = vadd.xlane.f32.xlu0 %v1891_v48 }
 0x5c5   :  { %v1838_v39 = vpop.f32.mrf.mxu2 }
 0x5c6   :  { %v1856_v5 = vadd.f32 %v3237_v22, %v1838_v39 }
 0x5c7   :  { %v1894_v37 = vpop.xlane.xlu0 %1893 }
 0x5c8   :  { %v4268_v0 = vadd.f32 %v4190_v1, %v1856_v5  ;;  %3126 = vrsqrt.f32 %v1894_v37  ;;  %vm1932_vm1 = vcmp.eq.f32.partialorder %v1894_v37, inf  ;;  %v1935_v7 = vand.u32 2147483648, %v1894_v37 }
 0x5c9   :  { %vm1934_vm2 = vcmp.eq.f32.partialorder %v1894_v37, 0.0 }
 0x5ca   :  { %v1892_v35 = vmul.f32 %v4268_v0, %v4268_v0 }
 0x5cc   :  { %1923 = vadd.xlane.f32.xlu0 %v1892_v35 }
 0x5ce   :  { %v3127_v4 = vpop.eup %3126 }
 0x5cf   :  { %v1926_v3 = vmul.f32 %v3127_v4, %v1894_v37  ;;  %v1896_v47 = vpop.xlane.xlu0 %1895 }
 0x5d0   :  { %3128 = vrsqrt.f32 %v1896_v47  ;;  %vm1944_vm3 = vcmp.eq.f32.partialorder %v1896_v47, inf  ;;  %v1947_v20 = vand.u32 2147483648, %v1896_v47  ;;  %vm1946_vm4 = vcmp.eq.f32.partialorder %v1896_v47, 0.0 }
 0x5d1   :  { %v1927_v56 = vmul.f32 %v3127_v4, %v1926_v3 }
 0x5d3   :  { %v1928_v12 = vmul.f32 0.5, %v1927_v56 }
 0x5d5   :  { %v1929_v1 = vsub.f32 1.5, %v1928_v12 }
 0x5d6   :  { %v3129_v38 = vpop.eup %3128 }
 0x5d7   :  { %v1930_v42 = vmul.f32 %v3127_v4, %v1929_v1  ;;  %v1938_v36 = vmul.f32 %v3129_v38, %v1896_v47  ;;  %v1898_v61 = vpop.xlane.xlu0 %1897 }
 0x5d8   :  { %3130 = vrsqrt.f32 %v1898_v61  ;;  %vm1956_vm5 = vcmp.eq.f32.partialorder %v1898_v61, inf  ;;  %v1959_v5 = vand.u32 2147483648, %v1898_v61  ;;  %vm1958_vm6 = vcmp.eq.f32.partialorder %v1898_v61, 0.0 }
 0x5d9   :  { %v1931_v15 = vmul.f32 %v1930_v42, %v1894_v37  ;;  %v1939_v33 = vmul.f32 %v3129_v38, %v1938_v36 }
 0x5db   :  { %v1933_v63 = vsel %vm1932_vm1, %v1894_v37, %v1931_v15  ;;  %v1940_v34 = vmul.f32 0.5, %v1939_v33 }
 0x5dc   :  { %v1936_v29 = vsel %vm1934_vm2, %v1935_v7, %v1933_v63 }
 0x5dd   :  { %v1941_v2 = vsub.f32 1.5, %v1940_v34  ;;  %v2117_v10 = vmul.f32 0.17677669, %v1936_v29 }
 0x5de   :  { %v3131_v21 = vpop.eup %3130 }
 0x5df   :  { %v1942_v59 = vmul.f32 %v3129_v38, %v1941_v2  ;;  %v1950_v31 = vmul.f32 %v3131_v21, %v1898_v61  ;;  %v1900_v49 = vpop.xlane.xlu0 %1899  ;;  %v2133_v8 = vadd.f32 1e-08, %v2117_v10 }
 0x5e0   :  { %3132 = vrsqrt.f32 %v1900_v49  ;;  %vm1968_vm7 = vcmp.eq.f32.partialorder %v1900_v49, inf  ;;  %v1971_v36 = vand.u32 2147483648, %v1900_v49  ;;  %vm1970_vm8 = vcmp.eq.f32.partialorder %v1900_v49, 0.0 }
 0x5e1   :  { %v1943_v58 = vmul.f32 %v1942_v59, %v1896_v47  ;;  %v1951_v19 = vmul.f32 %v3131_v21, %v1950_v31  ;;  %3134 = vrcp.f32 %v2133_v8 }
 0x5e3   :  { %v1945_v17 = vsel %vm1944_vm3, %v1896_v47, %v1943_v58  ;;  %v1952_v25 = vmul.f32 0.5, %v1951_v19 }
 0x5e4   :  { %v1948_v50 = vsel %vm1946_vm4, %v1947_v20, %v1945_v17 }
 0x5e5   :  { %v1953_v28 = vsub.f32 1.5, %v1952_v25  ;;  %v2118_v43 = vmul.f32 0.17677669, %v1948_v50 }
 0x5e6   :  { %v3133_v45 = vpop.eup %3132 }
 0x5e7   :  { %v1954_v14 = vmul.f32 %v3131_v21, %v1953_v28  ;;  %v1962_v24 = vmul.f32 %v3133_v45, %v1900_v49  ;;  %v1902_v48 = vpop.xlane.xlu0 %1901  ;;  %v2134_v52 = vadd.f32 1e-08, %v2118_v43  ;;  %v3135_v35 = vpop.eup %3134 }
 0x5e8   :  { %3136 = vrsqrt.f32 %v1902_v48  ;;  %v2165_v44 = vmul.f32 %v3135_v35, %v4193_v23  ;;  %vm1980_vm9 = vcmp.eq.f32.partialorder %v1902_v48, inf  ;;  %v1983_v58 = vand.u32 2147483648, %v1902_v48 }
 0x5e9   :  { %v1955_v39 = vmul.f32 %v1954_v14, %v1898_v61  ;;  %v1963_v22 = vmul.f32 %v3133_v45, %v1962_v24  ;;  %3138 = vrcp.f32 %v2134_v52  ;;  %vm1982_vm10 = vcmp.eq.f32.partialorder %v1902_v48, 0.0 }
 0x5eb   :  { %v1964_v13 = vmul.f32 0.5, %v1963_v22  ;;  %v1957_v37 = vsel %vm1956_vm5, %v1898_v61, %v1955_v39 }
 0x5ec   :  { %v1960_v46 = vsel %vm1958_vm6, %v1959_v5, %v1957_v37 }
 0x5ed   :  { %v1965_v4 = vsub.f32 1.5, %v1964_v13  ;;  %v2119_v12 = vmul.f32 0.17677669, %v1960_v46 }
 0x5ee   :  { %v3137_v18 = vpop.eup %3136 }
 0x5ef   :  { %v3139_v3 = vpop.eup %3138  ;;  %v1966_v47 = vmul.f32 %v3133_v45, %v1965_v4  ;;  %v1974_v56 = vmul.f32 %v3137_v18, %v1902_v48  ;;  %v1904_v11 = vpop.xlane.xlu0 %1903  ;;  %v2135_v7 = vadd.f32 1e-08, %v2119_v12 }
 0x5f0   :  { %3140 = vrsqrt.f32 %v1904_v11  ;;  %v2166_v42 = vmul.f32 %v3139_v3, %v4198_v40  ;;  %vm1992_vm11 = vcmp.eq.f32.partialorder %v1904_v11, inf  ;;  %vm1994_vm12 = vcmp.eq.f32.partialorder %v1904_v11, 0.0 }
 0x5f1   :  { %v1967_v1 = vmul.f32 %v1966_v47, %v1900_v49  ;;  %v1975_v38 = vmul.f32 %v3137_v18, %v1974_v56  ;;  %3142 = vrcp.f32 %v2135_v7 }
 0x5f2   :  { %v2181_v15 = vpack.c.bf16 %v2166_v42, %v2165_v44 }
 0x5f3   :  { %v1976_v61 = vmul.f32 0.5, %v1975_v38  ;;  %v1969_v33 = vsel %vm1968_vm7, %v1900_v49, %v1967_v1 }
 0x5f4   :  { %v1972_v55 = vsel %vm1970_vm8, %v1971_v36, %v1969_v33  ;;  %2265 = vmatmul.bf16.vlgmr.msra.gmra.mxu3 %v2181_v15 }
 0x5f5   :  { %v1977_v63 = vsub.f32 1.5, %v1976_v61  ;;  %v2120_v34 = vmul.f32 0.17677669, %v1972_v55 }
 0x5f6   :  { %v3141_v29 = vpop.eup %3140 }
 0x5f7   :  { %v1978_v2 = vmul.f32 %v3137_v18, %v1977_v63  ;;  %v1986_v21 = vmul.f32 %v3141_v29, %v1904_v11  ;;  %v1906_v9 = vpop.xlane.xlu0 %1905  ;;  %v2136_v59 = vadd.f32 1e-08, %v2120_v34  ;;  %v3143_v17 = vpop.eup %3142 }
 0x5f8   :  { %3144 = vrsqrt.f32 %v1906_v9  ;;  %v2167_v39 = vmul.f32 %v3143_v17, %v4203_v57  ;;  %vm2004_vm13 = vcmp.eq.f32.partialorder %v1906_v9, inf  ;;  %v2007_v42 = vand.u32 2147483648, %v1906_v9 }
 0x5f9   :  { %v1979_v31 = vmul.f32 %v1978_v2, %v1902_v48  ;;  %v1987_v10 = vmul.f32 %v3141_v29, %v1986_v21  ;;  %3146 = vrcp.f32 %v2136_v59  ;;  %vm2006_vm14 = vcmp.eq.f32.partialorder %v1906_v9, 0.0 }
 0x5fb   :  { %v1981_v19 = vsel %vm1980_vm9, %v1902_v48, %v1979_v31  ;;  %v1988_v49 = vmul.f32 0.5, %v1987_v10  ;;  %v1995_v48 = vand.u32 2147483648, %v1904_v11 }
 0x5fc   :  { %v1984_v20 = vsel %vm1982_vm10, %v1983_v58, %v1981_v19 }
 0x5fd   :  { %v1989_v25 = vsub.f32 1.5, %v1988_v49  ;;  %v2121_v14 = vmul.f32 0.17677669, %v1984_v20 }
 0x5fe   :  { %v3145_v8 = vpop.eup %3144 }
 0x5ff   :  { %v3147_v50 = vpop.eup %3146  ;;  %v1990_v28 = vmul.f32 %v3141_v29, %v1989_v25  ;;  %v1998_v43 = vmul.f32 %v3145_v8, %v1906_v9  ;;  %v1908_v45 = vpop.xlane.xlu0 %1907  ;;  %v2137_v46 = vadd.f32 1e-08, %v2121_v14 }
 0x600   :  { %3148 = vrsqrt.f32 %v1908_v45  ;;  %v2168_v22 = vmul.f32 %v3147_v50, %v4208_v53  ;;  %vm2016_vm15 = vcmp.eq.f32.partialorder %v1908_v45, inf  ;;  %vm2018_vm0 = vcmp.eq.f32.partialorder %v1908_v45, 0.0 }
 0x601   :  { %v1991_v24 = vmul.f32 %v1990_v28, %v1904_v11  ;;  %v1999_v52 = vmul.f32 %v3145_v8, %v1998_v43  ;;  %3150 = vrcp.f32 %v2137_v46 }
 0x602   :  { %v2182_v37 = vpack.c.bf16 %v2168_v22, %v2167_v39 }
 0x603   :  { %v1993_v5 = vsel %vm1992_vm11, %v1904_v11, %v1991_v24  ;;  %v2000_v13 = vmul.f32 0.5, %v1999_v52 }
 0x604   :  { %v1996_v35 = vsel %vm1994_vm12, %v1995_v48, %v1993_v5  ;;  %2270 = vmatmul.bf16.gmra.mxu3 %v2182_v37 }
 0x605   :  { %v2001_v4 = vsub.f32 1.5, %v2000_v13  ;;  %v2122_v18 = vmul.f32 0.17677669, %v1996_v35 }
 0x606   :  { %v3149_v3 = vpop.eup %3148 }
 0x607   :  { %v2002_v47 = vmul.f32 %v3145_v8, %v2001_v4  ;;  %v2010_v56 = vmul.f32 %v3149_v3, %v1908_v45  ;;  %v1910_v12 = vpop.xlane.xlu0 %1909  ;;  %v2138_v1 = vadd.f32 1e-08, %v2122_v18  ;;  %v3151_v15 = vpop.eup %3150 }
 0x608   :  { %3152 = vrsqrt.f32 %v1910_v12  ;;  %v2169_v31 = vmul.f32 %v3151_v15, %v4213_v32  ;;  %vm2028_vm1 = vcmp.eq.f32.partialorder %v1910_v12, inf  ;;  %v2031_v22 = vand.u32 2147483648, %v1910_v12 }
 0x609   :  { %v2003_v38 = vmul.f32 %v2002_v47, %v1906_v9  ;;  %v2011_v44 = vmul.f32 %v3149_v3, %v2010_v56  ;;  %3154 = vrcp.f32 %v2138_v1  ;;  %vm2030_vm2 = vcmp.eq.f32.partialorder %v1910_v12, 0.0 }
 0x60b   :  { %v2005_v11 = vsel %vm2004_vm13, %v1906_v9, %v2003_v38  ;;  %v2012_v36 = vmul.f32 0.5, %v2011_v44  ;;  %v2019_v9 = vand.u32 2147483648, %v1908_v45 }
 0x60c   :  { %v2008_v61 = vsel %vm2006_vm14, %v2007_v42, %v2005_v11 }
 0x60d   :  { %v2013_v33 = vsub.f32 1.5, %v2012_v36  ;;  %v2123_v2 = vmul.f32 0.17677669, %v2008_v61 }
 0x60e   :  { %v3153_v7 = vpop.eup %3152 }
 0x60f   :  { %v3155_v55 = vpop.eup %3154  ;;  %v2014_v63 = vmul.f32 %v3149_v3, %v2013_v33  ;;  %v2022_v34 = vmul.f32 %v3153_v7, %v1910_v12  ;;  %v1912_v29 = vpop.xlane.xlu0 %1911  ;;  %v2139_v20 = vadd.f32 1e-08, %v2123_v2 }
 0x610   :  { %3156 = vrsqrt.f32 %v1912_v29  ;;  %v2170_v10 = vmul.f32 %v3155_v55, %v4218_v30  ;;  %vm2040_vm3 = vcmp.eq.f32.partialorder %v1912_v29, inf  ;;  %vm2042_vm4 = vcmp.eq.f32.partialorder %v1912_v29, 0.0 }
 0x611   :  { %v2015_v21 = vmul.f32 %v2014_v63, %v1908_v45  ;;  %v2023_v59 = vmul.f32 %v3153_v7, %v2022_v34  ;;  %3158 = vrcp.f32 %v2139_v20 }
 0x612   :  { %v2183_v49 = vpack.c.bf16 %v2170_v10, %v2169_v31 }
 0x613   :  { %v2017_v58 = vsel %vm2016_vm15, %v1908_v45, %v2015_v21  ;;  %v2024_v19 = vmul.f32 0.5, %v2023_v59 }
 0x614   :  { %v2020_v17 = vsel %vm2018_vm0, %v2019_v9, %v2017_v58  ;;  %2275 = vmatmul.bf16.gmra.mxu3 %v2183_v49 }
 0x615   :  { %v2025_v25 = vsub.f32 1.5, %v2024_v19  ;;  %v2124_v8 = vmul.f32 0.17677669, %v2020_v17 }
 0x616   :  { %v3157_v50 = vpop.eup %3156 }
 0x617   :  { %v2026_v28 = vmul.f32 %v3153_v7, %v2025_v25  ;;  %v2034_v43 = vmul.f32 %v3157_v50, %v1912_v29  ;;  %v1914_v14 = vpop.xlane.xlu0 %1913  ;;  %v2140_v24 = vadd.f32 1e-08, %v2124_v8  ;;  %v3159_v13 = vpop.eup %3158 }
 0x618   :  { %3160 = vrsqrt.f32 %v1914_v14  ;;  %v2171_v38 = vmul.f32 %v3159_v13, %v4223_v16  ;;  %vm2052_vm5 = vcmp.eq.f32.partialorder %v1914_v14, inf  ;;  %v2055_v10 = vand.u32 2147483648, %v1914_v14 }
 0x619   :  { %v2027_v52 = vmul.f32 %v2026_v28, %v1910_v12  ;;  %v2035_v39 = vmul.f32 %v3157_v50, %v2034_v43  ;;  %3162 = vrcp.f32 %v2140_v24  ;;  %vm2054_vm6 = vcmp.eq.f32.partialorder %v1914_v14, 0.0 }
 0x61b   :  { %v2029_v45 = vsel %vm2028_vm1, %v1910_v12, %v2027_v52  ;;  %v2036_v48 = vmul.f32 0.5, %v2035_v39  ;;  %v2043_v12 = vand.u32 2147483648, %v1912_v29 }
 0x61c   :  { %v2032_v5 = vsel %vm2030_vm2, %v2031_v22, %v2029_v45 }
 0x61d   :  { %v2037_v37 = vsub.f32 1.5, %v2036_v48  ;;  %v2125_v47 = vmul.f32 0.17677669, %v2032_v5 }
 0x61e   :  { %v3161_v46 = vpop.eup %3160 }
 0x61f   :  { %v3163_v35 = vpop.eup %3162  ;;  %v2038_v4 = vmul.f32 %v3157_v50, %v2037_v37  ;;  %v2046_v18 = vmul.f32 %v3161_v46, %v1914_v14  ;;  %v1916_v3 = vpop.xlane.xlu0 %1915  ;;  %v2141_v61 = vadd.f32 1e-08, %v2125_v47 }
 0x620   :  { %3164 = vrsqrt.f32 %v1916_v3  ;;  %v2172_v44 = vmul.f32 %v3163_v35, %v4228_v54  ;;  %vm2064_vm7 = vcmp.eq.f32.partialorder %v1916_v3, inf  ;;  %vm2066_vm8 = vcmp.eq.f32.partialorder %v1916_v3, 0.0 }
 0x621   :  { %v2039_v56 = vmul.f32 %v2038_v4, %v1912_v29  ;;  %v2047_v1 = vmul.f32 %v3161_v46, %v2046_v18  ;;  %3166 = vrcp.f32 %v2141_v61 }
 0x622   :  { %v2184_v36 = vpack.c.bf16 %v2172_v44, %v2171_v38 }
 0x623   :  { %v2041_v42 = vsel %vm2040_vm3, %v1912_v29, %v2039_v56  ;;  %v2048_v11 = vmul.f32 0.5, %v2047_v1 }
 0x624   :  { %v2044_v15 = vsel %vm2042_vm4, %v2043_v12, %v2041_v42  ;;  %2280 = vmatmul.bf16.gmra.mxu3 %v2184_v36 }
 0x625   :  { %v2049_v33 = vsub.f32 1.5, %v2048_v11  ;;  %v2126_v7 = vmul.f32 0.17677669, %v2044_v15 }
 0x626   :  { %v3165_v55 = vpop.eup %3164 }
 0x627   :  { %v2050_v63 = vmul.f32 %v3161_v46, %v2049_v33  ;;  %v2058_v34 = vmul.f32 %v3165_v55, %v1916_v3  ;;  %v1918_v2 = vpop.xlane.xlu0 %1917  ;;  %v2142_v21 = vadd.f32 1e-08, %v2126_v7  ;;  %v3167_v19 = vpop.eup %3166 }
 0x628   :  { %3168 = vrsqrt.f32 %v1918_v2  ;;  %v2173_v52 = vmul.f32 %v3167_v19, %v4233_v6  ;;  %vm2076_vm9 = vcmp.eq.f32.partialorder %v1918_v2, inf  ;;  %v2079_v44 = vand.u32 2147483648, %v1918_v2 }
 0x629   :  { %v2051_v59 = vmul.f32 %v2050_v63, %v1914_v14  ;;  %v2059_v31 = vmul.f32 %v3165_v55, %v2058_v34  ;;  %3170 = vrcp.f32 %v2142_v21  ;;  %vm2078_vm10 = vcmp.eq.f32.partialorder %v1918_v2, 0.0 }
 0x62b   :  { %v2053_v29 = vsel %vm2052_vm5, %v1914_v14, %v2051_v59  ;;  %v2060_v9 = vmul.f32 0.5, %v2059_v31  ;;  %v2067_v14 = vand.u32 2147483648, %v1916_v3 }
 0x62c   :  { %v2056_v58 = vsel %vm2054_vm6, %v2055_v10, %v2053_v29 }
 0x62d   :  { %v2061_v49 = vsub.f32 1.5, %v2060_v9  ;;  %v2127_v28 = vmul.f32 0.17677669, %v2056_v58 }
 0x62e   :  { %v3169_v20 = vpop.eup %3168 }
 0x62f   :  { %v3171_v17 = vpop.eup %3170  ;;  %v2062_v25 = vmul.f32 %v3165_v55, %v2061_v49  ;;  %v2070_v8 = vmul.f32 %v3169_v20, %v1918_v2  ;;  %v1920_v50 = vpop.xlane.xlu0 %1919  ;;  %v2143_v5 = vadd.f32 1e-08, %v2127_v28 }
 0x630   :  { %3172 = vrsqrt.f32 %v1920_v50  ;;  %v2174_v39 = vmul.f32 %v3171_v17, %v4238_v51  ;;  %vm2088_vm11 = vcmp.eq.f32.partialorder %v1920_v50, inf  ;;  %vm2090_vm12 = vcmp.eq.f32.partialorder %v1920_v50, 0.0 }
 0x631   :  { %v2063_v43 = vmul.f32 %v2062_v25, %v1916_v3  ;;  %v2071_v24 = vmul.f32 %v3169_v20, %v2070_v8  ;;  %3174 = vrcp.f32 %v2143_v5 }
 0x632   :  { %v2185_v48 = vpack.c.bf16 %v2174_v39, %v2173_v52 }
 0x633   :  { %v2065_v22 = vsel %vm2064_vm7, %v1916_v3, %v2063_v43  ;;  %v2072_v45 = vmul.f32 0.5, %v2071_v24 }
 0x634   :  { %v2068_v13 = vsel %vm2066_vm8, %v2067_v14, %v2065_v22  ;;  %2285 = vmatmul.bf16.gmra.mxu3 %v2185_v48 }
 0x635   :  { %v2073_v37 = vsub.f32 1.5, %v2072_v45  ;;  %v2128_v46 = vmul.f32 0.17677669, %v2068_v13 }
 0x636   :  { %v3173_v35 = vpop.eup %3172 }
 0x637   :  { %v2074_v4 = vmul.f32 %v3169_v20, %v2073_v37  ;;  %v2082_v18 = vmul.f32 %v3173_v35, %v1920_v50  ;;  %v1922_v47 = vpop.xlane.xlu0 %1921  ;;  %v2144_v56 = vadd.f32 1e-08, %v2128_v46  ;;  %v3175_v11 = vpop.eup %3174 }
 0x638   :  { %3176 = vrsqrt.f32 %v1922_v47  ;;  %v2175_v59 = vmul.f32 %v3175_v11, %v4243_v27  ;;  %vm2100_vm13 = vcmp.eq.f32.partialorder %v1922_v47, inf  ;;  %v2103_v52 = vand.u32 2147483648, %v1922_v47 }
 0x639   :  { %v2075_v1 = vmul.f32 %v2074_v4, %v1918_v2  ;;  %v2083_v38 = vmul.f32 %v3173_v35, %v2082_v18  ;;  %3178 = vrcp.f32 %v2144_v56  ;;  %vm2102_vm14 = vcmp.eq.f32.partialorder %v1922_v47, 0.0 }
 0x63b   :  { %v2077_v3 = vsel %vm2076_vm9, %v1918_v2, %v2075_v1  ;;  %v2084_v12 = vmul.f32 0.5, %v2083_v38  ;;  %v2091_v2 = vand.u32 2147483648, %v1920_v50 }
 0x63c   :  { %v2080_v42 = vsel %vm2078_vm10, %v2079_v44, %v2077_v3 }
 0x63d   :  { %v2085_v36 = vsub.f32 1.5, %v2084_v12  ;;  %v2129_v63 = vmul.f32 0.17677669, %v2080_v42 }
 0x63e   :  { %v3177_v61 = vpop.eup %3176 }
 0x63f   :  { %v3179_v15 = vpop.eup %3178  ;;  %v2086_v33 = vmul.f32 %v3173_v35, %v2085_v36  ;;  %v2094_v7 = vmul.f32 %v3177_v61, %v1922_v47  ;;  %v1924_v55 = vpop.xlane.xlu0 %1923  ;;  %v2145_v58 = vadd.f32 1e-08, %v2129_v63 }
 0x640   :  { %3180 = vrsqrt.f32 %v1924_v55  ;;  %v2176_v31 = vmul.f32 %v3179_v15, %v4248_v41  ;;  %vm2112_vm15 = vcmp.eq.f32.partialorder %v1924_v55, inf  ;;  %v2115_v4 = vand.u32 2147483648, %v1924_v55  ;;  %v2899_v15 = vld [vmem:[#allocation11 + $0x30] sm:$0xff] }
 0x641   :  { %v2087_v34 = vmul.f32 %v2086_v33, %v1920_v50  ;;  %v2095_v21 = vmul.f32 %v3177_v61, %v2094_v7  ;;  %3182 = vrcp.f32 %v2145_v58  ;;  %vm2114_vm0 = vcmp.eq.f32.partialorder %v1924_v55, 0.0  ;;  %v2898_v33 = vld [vmem:[#allocation11 + $0x28] sm:$0xff]  ;;  %v4291_v7 = vld [vmem:[%s4358_s6] ss:$0 sm:$0xff] }
 0x642   :  { %v2186_v9 = vpack.c.bf16 %v2176_v31, %v2175_v59  ;;  %v2895_v31 = vld [vmem:[#allocation11 + $0x10] sm:$0xff] }
 0x643   :  { %v2089_v10 = vsel %vm2088_vm11, %v1920_v50, %v2087_v34  ;;  %v2096_v29 = vmul.f32 0.5, %v2095_v21  ;;  %v2896_v34 = vld [vmem:[#allocation11 + $0x18] sm:$0xff] }
 0x644   :  { %v2092_v19 = vsel %vm2090_vm12, %v2091_v2, %v2089_v10  ;;  %2290 = vmatmul.bf16.gmra.mxu3 %v2186_v9 }
 0x645   :  { %v2097_v49 = vsub.f32 1.5, %v2096_v29  ;;  %v2130_v20 = vmul.f32 0.17677669, %v2092_v19  ;;  %v2894_v29 = vld [vmem:[#allocation11 + $0x8] sm:$0xff] }
 0x646   :  { %v3181_v17 = vpop.eup %3180 }
 0x647   :  { %v2098_v25 = vmul.f32 %v3177_v61, %v2097_v49  ;;  %v2106_v8 = vmul.f32 %v3181_v17, %v1924_v55  ;;  %v2146_v28 = vadd.f32 1e-08, %v2130_v20  ;;  %v3183_v22 = vpop.eup %3182  ;;  %v2900_v61 = vld [vmem:[#allocation11 + $0x38] sm:$0xff] }
 0x648   :  { %v2177_v37 = vmul.f32 %v3183_v22, %v4253_v62  ;;  %2522 = vmatpush.bf16.msra.mxu1 %v2900_v61 }
 0x649   :  { %v2099_v43 = vmul.f32 %v2098_v25, %v1922_v47  ;;  %v2107_v24 = vmul.f32 %v3181_v17, %v2106_v8  ;;  %3184 = vrcp.f32 %v2146_v28  ;;  %v2893_v25 = vld [vmem:[#allocation11] sm:$0xff] }
 0x64b   :  { %v2101_v39 = vsel %vm2100_vm13, %v1922_v47, %v2099_v43  ;;  %v2108_v50 = vmul.f32 0.5, %v2107_v24 }
 0x64c   :  { %v2104_v14 = vsel %vm2102_vm14, %v2103_v52, %v2101_v39  ;;  %2523 = vmatpush.bf16.msra.mxu1 %v2899_v15 }
 0x64d   :  { %v2109_v45 = vsub.f32 1.5, %v2108_v50  ;;  %v2131_v13 = vmul.f32 0.17677669, %v2104_v14 }
 0x64f   :  { %v3185_v48 = vpop.eup %3184  ;;  %v2110_v5 = vmul.f32 %v3181_v17, %v2109_v45  ;;  %v2147_v1 = vadd.f32 1e-08, %v2131_v13 }
 0x650   :  { %v2178_v46 = vmul.f32 %v3185_v48, %v4258_v60  ;;  %2524 = vmatpush.bf16.msra.mxu1 %v2898_v33 }
 0x651   :  { %v2111_v35 = vmul.f32 %v2110_v5, %v1924_v55  ;;  %3186 = vrcp.f32 %v2147_v1 }
 0x652   :  { %v2187_v18 = vpack.c.bf16 %v2178_v46, %v2177_v37 }
 0x653   :  { %v2113_v56 = vsel %vm2112_vm15, %v1924_v55, %v2111_v35  ;;  %v2897_v55 = vld [vmem:[#allocation11 + $0x20] sm:$0xff] }
 0x654   :  { %v2116_v38 = vsel %vm2114_vm0, %v2115_v4, %v2113_v56  ;;  %2295 = vmatmul.bf16.gmra.mxu3 %v2187_v18  ;;  %2525 = vmatpush.bf16.msra.mxu1 %v2897_v55 }
 0x655   :  { %v2132_v47 = vmul.f32 0.17677669, %v2116_v38 }
 0x657   :  { %v2148_v44 = vadd.f32 1e-08, %v2132_v47  ;;  %v3187_v3 = vpop.eup %3186 }
 0x658   :  { %v2179_v42 = vmul.f32 %v3187_v3, %v4263_v26  ;;  %2526 = vmatpush.bf16.msra.mxu1 %v2896_v34 }
 0x659   :  { %3188 = vrcp.f32 %v2148_v44 }
 0x65c   :  { %2527 = vmatpush.bf16.msra.mxu1 %v2895_v31 }
 0x65f   :  { %v3189_v12 = vpop.eup %3188 }
 0x660   :  { %v2180_v11 = vmul.f32 %v3189_v12, %v4268_v0  ;;  %2528 = vmatpush.bf16.msra.mxu1 %v2894_v29 }
 0x662   :  { %v2188_v36 = vpack.c.bf16 %v2180_v11, %v2179_v42 }
 0x664   :  { %2300 = vmatmul.bf16.gmra.mxu3 %v2188_v36  ;;  %2529 = vmatpush.bf16.msra.mxu1 %v2893_v25 }
 0x677   :  { %v2266_v63 = vpop.f32.mrf.mxu3 }
 0x678   :  { %v2267_v21 = vadd.f32 %v4291_v7, %v2266_v63 }
 0x67a   :  { %v2306_v59 = vmul.f32 %v2267_v21, %v2267_v21 }
 0x67c   :  { %v2322_v2 = vmul.f32 %v2306_v59, %v2267_v21 }
 0x67e   :  { %v2338_v10 = vmul.f32 0.044715, %v2322_v2 }
 0x67f   :  { %v2268_v9 = vpop.f32.mrf.mxu3 }
 0x680   :  { %v2354_v58 = vadd.f32 %v2338_v10, %v2267_v21  ;;  %v2269_v19 = vadd.f32 %v4291_v7, %v2268_v9 }
 0x682   :  { %v2370_v49 = vmul.f32 0.7978846, %v2354_v58  ;;  %v2307_v20 = vmul.f32 %v2269_v19, %v2269_v19 }
 0x684   :  { %v2323_v17 = vmul.f32 %v2307_v20, %v2269_v19  ;;  %3190 = vtanh.f32 %v2370_v49 }
 0x686   :  { %v2339_v8 = vmul.f32 0.044715, %v2323_v17 }
 0x687   :  { %v2271_v28 = vpop.f32.mrf.mxu3 }
 0x688   :  { %v2355_v43 = vadd.f32 %v2339_v8, %v2269_v19  ;;  %v2272_v24 = vadd.f32 %v4291_v7, %v2271_v28 }
 0x68a   :  { %v2371_v52 = vmul.f32 0.7978846, %v2355_v43  ;;  %v2308_v39 = vmul.f32 %v2272_v24, %v2272_v24  ;;  %v3191_v50 = vpop.eup %3190 }
 0x68b   :  { %v2402_v45 = vadd.f32 1.0, %v3191_v50 }
 0x68c   :  { %3192 = vtanh.f32 %v2371_v52  ;;  %v2324_v14 = vmul.f32 %v2308_v39, %v2272_v24 }
 0x68d   :  { %v2418_v4 = vmul.f32 0.5, %v2402_v45 }
 0x68e   :  { %v2340_v22 = vmul.f32 0.044715, %v2324_v14 }
 0x68f   :  { %v2273_v48 = vpop.f32.mrf.mxu3  ;;  %v2434_v47 = vmul.f32 %v2418_v4, %v2267_v21 }
 0x690   :  { %v2356_v5 = vadd.f32 %v2340_v22, %v2272_v24  ;;  %v2274_v13 = vadd.f32 %v4291_v7, %v2273_v48 }
 0x692   :  { %v3193_v37 = vpop.eup %3192  ;;  %v2309_v46 = vmul.f32 %v2274_v13, %v2274_v13  ;;  %v2372_v35 = vmul.f32 0.7978846, %v2356_v5 }
 0x693   :  { %v2403_v18 = vadd.f32 1.0, %v3193_v37 }
 0x694   :  { %v2325_v56 = vmul.f32 %v2309_v46, %v2274_v13  ;;  %3194 = vtanh.f32 %v2372_v35 }
 0x695   :  { %v2419_v1 = vmul.f32 0.5, %v2403_v18 }
 0x696   :  { %v2341_v38 = vmul.f32 0.044715, %v2325_v56 }
 0x697   :  { %v2435_v44 = vmul.f32 %v2419_v1, %v2269_v19  ;;  %v2276_v3 = vpop.f32.mrf.mxu3 }
 0x698   :  { %v2357_v12 = vadd.f32 %v2341_v38, %v2274_v13  ;;  %v2277_v42 = vadd.f32 %v4291_v7, %v2276_v3 }
 0x699   :  { %v2450_v11 = vpack.c.bf16 %v2435_v44, %v2434_v47 }
 0x69a   :  { %v2310_v36 = vmul.f32 %v2277_v42, %v2277_v42  ;;  %v2373_v61 = vmul.f32 0.7978846, %v2357_v12  ;;  %v3195_v15 = vpop.eup %3194 }
 0x69b   :  { %2530 = vmatmul.bf16.vlgmr.msra.gmra.mxu1 %v2450_v11  ;;  %v2404_v34 = vadd.f32 1.0, %v3195_v15 }
 0x69c   :  { %v2326_v33 = vmul.f32 %v2310_v36, %v2277_v42  ;;  %3196 = vtanh.f32 %v2373_v61 }
 0x69d   :  { %v2420_v9 = vmul.f32 0.5, %v2404_v34 }
 0x69e   :  { %v2342_v55 = vmul.f32 0.044715, %v2326_v33 }
 0x69f   :  { %v2278_v63 = vpop.f32.mrf.mxu3  ;;  %v2436_v17 = vmul.f32 %v2420_v9, %v2272_v24 }
 0x6a0   :  { %v2358_v59 = vadd.f32 %v2342_v55, %v2277_v42  ;;  %v2279_v31 = vadd.f32 %v4291_v7, %v2278_v63 }
 0x6a2   :  { %v3197_v2 = vpop.eup %3196  ;;  %v2374_v21 = vmul.f32 0.7978846, %v2358_v59  ;;  %v2311_v10 = vmul.f32 %v2279_v31, %v2279_v31 }
 0x6a3   :  { %v2405_v29 = vadd.f32 1.0, %v3197_v2 }
 0x6a4   :  { %v2327_v58 = vmul.f32 %v2311_v10, %v2279_v31  ;;  %3198 = vtanh.f32 %v2374_v21 }
 0x6a5   :  { %v2421_v19 = vmul.f32 0.5, %v2405_v29 }
 0x6a6   :  { %v2343_v49 = vmul.f32 0.044715, %v2327_v58 }
 0x6a7   :  { %v2281_v20 = vpop.f32.mrf.mxu3  ;;  %v2437_v25 = vmul.f32 %v2421_v19, %v2274_v13 }
 0x6a8   :  { %v2359_v8 = vadd.f32 %v2343_v49, %v2279_v31  ;;  %v2282_v28 = vadd.f32 %v4291_v7, %v2281_v20 }
 0x6a9   :  { %v2451_v43 = vpack.c.bf16 %v2437_v25, %v2436_v17 }
 0x6aa   :  { %v2375_v52 = vmul.f32 0.7978846, %v2359_v8  ;;  %v2312_v39 = vmul.f32 %v2282_v28, %v2282_v28  ;;  %v3199_v50 = vpop.eup %3198 }
 0x6ab   :  { %2535 = vmatmul.bf16.gmra.mxu1 %v2451_v43  ;;  %v2406_v48 = vadd.f32 1.0, %v3199_v50 }
 0x6ac   :  { %3200 = vtanh.f32 %v2375_v52  ;;  %v2328_v14 = vmul.f32 %v2312_v39, %v2282_v28 }
 0x6ad   :  { %v2422_v4 = vmul.f32 0.5, %v2406_v48 }
 0x6ae   :  { %v2344_v22 = vmul.f32 0.044715, %v2328_v14 }
 0x6af   :  { %v2283_v45 = vpop.f32.mrf.mxu3  ;;  %v2438_v47 = vmul.f32 %v2422_v4, %v2277_v42 }
 0x6b0   :  { %v2360_v5 = vadd.f32 %v2344_v22, %v2282_v28  ;;  %v2284_v37 = vadd.f32 %v4291_v7, %v2283_v45 }
 0x6b2   :  { %v3201_v46 = vpop.eup %3200  ;;  %v2376_v35 = vmul.f32 0.7978846, %v2360_v5  ;;  %v2313_v24 = vmul.f32 %v2284_v37, %v2284_v37 }
 0x6b3   :  { %v2407_v13 = vadd.f32 1.0, %v3201_v46 }
 0x6b4   :  { %v2329_v18 = vmul.f32 %v2313_v24, %v2284_v37  ;;  %3202 = vtanh.f32 %v2376_v35 }
 0x6b5   :  { %v2423_v56 = vmul.f32 0.5, %v2407_v13 }
 0x6b6   :  { %v2345_v1 = vmul.f32 0.044715, %v2329_v18 }
 0x6b7   :  { %v2286_v38 = vpop.f32.mrf.mxu3  ;;  %v2439_v44 = vmul.f32 %v2423_v56, %v2279_v31 }
 0x6b8   :  { %v2361_v3 = vadd.f32 %v2345_v1, %v2284_v37  ;;  %v2287_v12 = vadd.f32 %v4291_v7, %v2286_v38 }
 0x6b9   :  { %v2452_v11 = vpack.c.bf16 %v2439_v44, %v2438_v47 }
 0x6ba   :  { %v2377_v36 = vmul.f32 0.7978846, %v2361_v3  ;;  %v2314_v61 = vmul.f32 %v2287_v12, %v2287_v12  ;;  %v3203_v15 = vpop.eup %3202 }
 0x6bb   :  { %2540 = vmatmul.bf16.gmra.mxu1 %v2452_v11  ;;  %v2408_v34 = vadd.f32 1.0, %v3203_v15 }
 0x6bc   :  { %3204 = vtanh.f32 %v2377_v36  ;;  %v2330_v33 = vmul.f32 %v2314_v61, %v2287_v12 }
 0x6bd   :  { %v2424_v29 = vmul.f32 0.5, %v2408_v34 }
 0x6be   :  { %v2346_v55 = vmul.f32 0.044715, %v2330_v33 }
 0x6bf   :  { %v2288_v63 = vpop.f32.mrf.mxu3  ;;  %v2440_v20 = vmul.f32 %v2424_v29, %v2282_v28 }
 0x6c0   :  { %v2362_v59 = vadd.f32 %v2346_v55, %v2287_v12  ;;  %v2289_v2 = vadd.f32 %v4291_v7, %v2288_v63 }
 0x6c2   :  { %v3205_v21 = vpop.eup %3204  ;;  %v2378_v10 = vmul.f32 0.7978846, %v2362_v59  ;;  %v2315_v42 = vmul.f32 %v2289_v2, %v2289_v2 }
 0x6c3   :  { %v2409_v31 = vadd.f32 1.0, %v3205_v21 }
 0x6c4   :  { %v2331_v9 = vmul.f32 %v2315_v42, %v2289_v2  ;;  %3206 = vtanh.f32 %v2378_v10 }
 0x6c5   :  { %v2425_v58 = vmul.f32 0.5, %v2409_v31 }
 0x6c6   :  { %v2347_v19 = vmul.f32 0.044715, %v2331_v9 }
 0x6c7   :  { %v2291_v49 = vpop.f32.mrf.mxu3  ;;  %v2441_v17 = vmul.f32 %v2425_v58, %v2284_v37 }
 0x6c8   :  { %v2363_v25 = vadd.f32 %v2347_v19, %v2289_v2  ;;  %v2292_v8 = vadd.f32 %v4291_v7, %v2291_v49 }
 0x6c9   :  { %v2453_v43 = vpack.c.bf16 %v2441_v17, %v2440_v20 }
 0x6ca   :  { %v2379_v52 = vmul.f32 0.7978846, %v2363_v25  ;;  %v2316_v39 = vmul.f32 %v2292_v8, %v2292_v8  ;;  %v3207_v50 = vpop.eup %3206 }
 0x6cb   :  { %2545 = vmatmul.bf16.gmra.mxu1 %v2453_v43  ;;  %v2410_v48 = vadd.f32 1.0, %v3207_v50 }
 0x6cc   :  { %3208 = vtanh.f32 %v2379_v52  ;;  %v2332_v14 = vmul.f32 %v2316_v39, %v2292_v8 }
 0x6cd   :  { %v2426_v13 = vmul.f32 0.5, %v2410_v48 }
 0x6ce   :  { %v2348_v22 = vmul.f32 0.044715, %v2332_v14 }
 0x6cf   :  { %v2293_v45 = vpop.f32.mrf.mxu3  ;;  %v2442_v38 = vmul.f32 %v2426_v13, %v2287_v12 }
 0x6d0   :  { %v2364_v5 = vadd.f32 %v2348_v22, %v2292_v8  ;;  %v2294_v46 = vadd.f32 %v4291_v7, %v2293_v45 }
 0x6d2   :  { %v3209_v35 = vpop.eup %3208  ;;  %v2380_v24 = vmul.f32 0.7978846, %v2364_v5  ;;  %v2317_v28 = vmul.f32 %v2294_v46, %v2294_v46 }
 0x6d3   :  { %v2411_v37 = vadd.f32 1.0, %v3209_v35 }
 0x6d4   :  { %v2333_v4 = vmul.f32 %v2317_v28, %v2294_v46  ;;  %3210 = vtanh.f32 %v2380_v24 }
 0x6d5   :  { %v2427_v18 = vmul.f32 0.5, %v2411_v37 }
 0x6d6   :  { %v2349_v56 = vmul.f32 0.044715, %v2333_v4 }
 0x6d7   :  { %v2296_v1 = vpop.f32.mrf.mxu3  ;;  %v2443_v47 = vmul.f32 %v2427_v18, %v2289_v2 }
 0x6d8   :  { %v2365_v44 = vadd.f32 %v2349_v56, %v2294_v46  ;;  %v2297_v3 = vadd.f32 %v4291_v7, %v2296_v1 }
 0x6d9   :  { %v2454_v11 = vpack.c.bf16 %v2443_v47, %v2442_v38 }
 0x6da   :  { %v2381_v36 = vmul.f32 0.7978846, %v2365_v44  ;;  %v2318_v61 = vmul.f32 %v2297_v3, %v2297_v3  ;;  %v3211_v15 = vpop.eup %3210 }
 0x6db   :  { %2550 = vmatmul.bf16.gmra.mxu1 %v2454_v11  ;;  %v2412_v34 = vadd.f32 1.0, %v3211_v15 }
 0x6dc   :  { %3212 = vtanh.f32 %v2381_v36  ;;  %v2334_v33 = vmul.f32 %v2318_v61, %v2297_v3 }
 0x6dd   :  { %v2428_v31 = vmul.f32 0.5, %v2412_v34 }
 0x6de   :  { %v2350_v55 = vmul.f32 0.044715, %v2334_v33 }
 0x6df   :  { %v2298_v63 = vpop.f32.mrf.mxu3  ;;  %v2444_v49 = vmul.f32 %v2428_v31, %v2292_v8 }
 0x6e0   :  { %v2366_v59 = vadd.f32 %v2350_v55, %v2297_v3  ;;  %v2299_v21 = vadd.f32 %v4291_v7, %v2298_v63 }
 0x6e2   :  { %v3213_v10 = vpop.eup %3212  ;;  %v2382_v42 = vmul.f32 0.7978846, %v2366_v59  ;;  %v2319_v12 = vmul.f32 %v2299_v21, %v2299_v21 }
 0x6e3   :  { %v2413_v2 = vadd.f32 1.0, %v3213_v10 }
 0x6e4   :  { %v2335_v29 = vmul.f32 %v2319_v12, %v2299_v21  ;;  %3214 = vtanh.f32 %v2382_v42 }
 0x6e5   :  { %v2429_v9 = vmul.f32 0.5, %v2413_v2 }
 0x6e6   :  { %v2351_v58 = vmul.f32 0.044715, %v2335_v29 }
 0x6e7   :  { %v2301_v19 = vpop.f32.mrf.mxu3  ;;  %v2445_v20 = vmul.f32 %v2429_v9, %v2294_v46 }
 0x6e8   :  { %v2367_v17 = vadd.f32 %v2351_v58, %v2299_v21  ;;  %v2302_v25 = vadd.f32 %v4291_v7, %v2301_v19 }
 0x6e9   :  { %v2455_v43 = vpack.c.bf16 %v2445_v20, %v2444_v49 }
 0x6ea   :  { %v2383_v52 = vmul.f32 0.7978846, %v2367_v17  ;;  %v2320_v39 = vmul.f32 %v2302_v25, %v2302_v25  ;;  %v3215_v50 = vpop.eup %3214 }
 0x6eb   :  { %2555 = vmatmul.bf16.gmra.mxu1 %v2455_v43  ;;  %v2414_v48 = vadd.f32 1.0, %v3215_v50 }
 0x6ec   :  { %3216 = vtanh.f32 %v2383_v52  ;;  %v2336_v14 = vmul.f32 %v2320_v39, %v2302_v25 }
 0x6ed   :  { %v2430_v37 = vmul.f32 0.5, %v2414_v48 }
 0x6ee   :  { %v2352_v22 = vmul.f32 0.044715, %v2336_v14 }
 0x6ef   :  { %v2303_v45 = vpop.f32.mrf.mxu3  ;;  %v2446_v56 = vmul.f32 %v2430_v37, %v2297_v3  ;;  %v4312_v3 = vld [vmem:[%s4360_s8] ss:$0 sm:$0xff]  ;;  %s3428_s8 = smov [#allocation13]  }
 0x6f0   :  { %v2368_v5 = vadd.f32 %v2352_v22, %v2302_v25  ;;  %v2304_v35 = vadd.f32 %v4291_v7, %v2303_v45  ;;  %s2627_s22 = sshll.u32 %s3428_s8, 4  ;;  %s2628_s22 = int_to_ptr.vmem [resolvable:$true] %s2627_s22 }
 0x6f2   :  { %v3217_v24 = vpop.eup %3216  ;;  %v2384_v28 = vmul.f32 0.7978846, %v2368_v5  ;;  %v2321_v8 = vmul.f32 %v2304_v35, %v2304_v35 }
 0x6f3   :  { %v2415_v46 = vadd.f32 1.0, %v3217_v24 }
 0x6f4   :  { %v2337_v13 = vmul.f32 %v2321_v8, %v2304_v35  ;;  %3218 = vtanh.f32 %v2384_v28 }
 0x6f5   :  { %v2431_v4 = vmul.f32 0.5, %v2415_v46 }
 0x6f6   :  { %v2353_v18 = vmul.f32 0.044715, %v2337_v13 }
 0x6f7   :  { %v2447_v1 = vmul.f32 %v2431_v4, %v2299_v21 }
 0x6f8   :  { %v2369_v38 = vadd.f32 %v2353_v18, %v2304_v35 }
 0x6f9   :  { %v2456_v47 = vpack.c.bf16 %v2447_v1, %v2446_v56 }
 0x6fa   :  { %v2385_v44 = vmul.f32 0.7978846, %v2369_v38  ;;  %v3219_v11 = vpop.eup %3218 }
 0x6fb   :  { %2560 = vmatmul.bf16.gmra.mxu1 %v2456_v47  ;;  %v2416_v36 = vadd.f32 1.0, %v3219_v11 }
 0x6fc   :  { %3220 = vtanh.f32 %v2385_v44 }
 0x6fd   :  { %v2432_v15 = vmul.f32 0.5, %v2416_v36 }
 0x6ff   :  { %v2448_v55 = vmul.f32 %v2432_v15, %v2302_v25 }
 0x702   :  { %v3221_v61 = vpop.eup %3220 }
 0x703   :  { %v2417_v7 = vadd.f32 1.0, %v3221_v61 }
 0x705   :  { %v2433_v33 = vmul.f32 0.5, %v2417_v7 }
 0x707   :  { %v2449_v63 = vmul.f32 %v2433_v33, %v2304_v35 }
 0x709   :  { %v2457_v34 = vpack.c.bf16 %v2449_v63, %v2448_v55 }
 0x70b   :  { %2565 = vmatmul.bf16.gmra.mxu1 %v2457_v34 }
 0x718   :  { %v2531_v59 = vpop.f32.mrf.mxu1 }
 0x719   :  { %v2571_v21 = vadd.f32 %v2531_v59, %v4193_v23 }
 0x71b   :  { %v2591_v10 = vadd.f32 %v4312_v3, %v2571_v21 }
 0x71d   :  { %2607 = vst [vmem:[#allocation13] sm:$0xff] %v2591_v10 }
 0x720   :  { %v2533_v42 = vpop.f32.mrf.mxu1 }
 0x721   :  { %v2572_v12 = vadd.f32 %v2533_v42, %v4198_v40 }
 0x723   :  { %v2592_v2 = vadd.f32 %v4312_v3, %v2572_v12 }
 0x725   :  { %2608 = vst [vmem:[#allocation13 + $0x8] sm:$0xff] %v2592_v2 }
 0x728   :  { %v2536_v31 = vpop.f32.mrf.mxu1 }
 0x729   :  { %v2573_v29 = vadd.f32 %v2536_v31, %v4203_v57 }
 0x72b   :  { %v2593_v9 = vadd.f32 %v4312_v3, %v2573_v29 }
 0x72d   :  { %2609 = vst [vmem:[#allocation13 + $0x10] sm:$0xff] %v2593_v9 }
 0x730   :  { %v2538_v58 = vpop.f32.mrf.mxu1 }
 0x731   :  { %v2574_v19 = vadd.f32 %v2538_v58, %v4208_v53 }
 0x733   :  { %v2594_v23 = vadd.f32 %v4312_v3, %v2574_v19 }
 0x735   :  { %2610 = vst [vmem:[#allocation13 + $0x18] sm:$0xff] %v2594_v23 }
 0x738   :  { %v2541_v49 = vpop.f32.mrf.mxu1 }
 0x739   :  { %v2575_v20 = vadd.f32 %v2541_v49, %v4213_v32 }
 0x73b   :  { %v2595_v40 = vadd.f32 %v4312_v3, %v2575_v20 }
 0x73d   :  { %2611 = vst [vmem:[#allocation13 + $0x20] sm:$0xff] %v2595_v40 }
 0x740   :  { %v2543_v17 = vpop.f32.mrf.mxu1 }
 0x741   :  { %v2576_v25 = vadd.f32 %v2543_v17, %v4218_v30 }
 0x743   :  { %v2596_v57 = vadd.f32 %v4312_v3, %v2576_v25 }
 0x745   :  { %2612 = vst [vmem:[#allocation13 + $0x28] sm:$0xff] %v2596_v57 }
 0x748   :  { %v2546_v43 = vpop.f32.mrf.mxu1 }
 0x749   :  { %v2577_v52 = vadd.f32 %v2546_v43, %v4223_v16 }
 0x74b   :  { %v2597_v53 = vadd.f32 %v4312_v3, %v2577_v52 }
 0x74d   :  { %2613 = vst [vmem:[#allocation13 + $0x30] sm:$0xff] %v2597_v53 }
 0x750   :  { %v2548_v39 = vpop.f32.mrf.mxu1 }
 0x751   :  { %v2578_v50 = vadd.f32 %v2548_v39, %v4228_v54 }
 0x753   :  { %v2598_v32 = vadd.f32 %v4312_v3, %v2578_v50 }
 0x755   :  { %2614 = vst [vmem:[#allocation13 + $0x38] sm:$0xff] %v2598_v32 }
 0x758   :  { %v2551_v14 = vpop.f32.mrf.mxu1 }
 0x759   :  { %v2579_v22 = vadd.f32 %v2551_v14, %v4233_v6 }
 0x75b   :  { %v2599_v30 = vadd.f32 %v4312_v3, %v2579_v22 }
 0x75d   :  { %2615 = vst [vmem:[#allocation13 + $0x40] sm:$0xff] %v2599_v30 }
 0x760   :  { %v2553_v45 = vpop.f32.mrf.mxu1 }
 0x761   :  { %v2580_v48 = vadd.f32 %v2553_v45, %v4238_v51 }
 0x763   :  { %v2600_v16 = vadd.f32 %v4312_v3, %v2580_v48 }
 0x765   :  { %2616 = vst [vmem:[#allocation13 + $0x48] sm:$0xff] %v2600_v16 }
 0x768   :  { %v2556_v5 = vpop.f32.mrf.mxu1 }
 0x769   :  { %v2581_v35 = vadd.f32 %v2556_v5, %v4243_v27 }
 0x76b   :  { %v2601_v54 = vadd.f32 %v4312_v3, %v2581_v35 }
 0x76d   :  { %2617 = vst [vmem:[#allocation13 + $0x50] sm:$0xff] %v2601_v54 }
 0x770   :  { %v2558_v24 = vpop.f32.mrf.mxu1 }
 0x771   :  { %v2582_v28 = vadd.f32 %v2558_v24, %v4248_v41 }
 0x773   :  { %v2602_v6 = vadd.f32 %v4312_v3, %v2582_v28 }
 0x775   :  { %2618 = vst [vmem:[#allocation13 + $0x58] sm:$0xff] %v2602_v6 }
 0x778   :  { %v2561_v8 = vpop.f32.mrf.mxu1 }
 0x779   :  { %v2583_v46 = vadd.f32 %v2561_v8, %v4253_v62 }
 0x77b   :  { %v2603_v51 = vadd.f32 %v4312_v3, %v2583_v46 }
 0x77d   :  { %2619 = vst [vmem:[#allocation13 + $0x60] sm:$0xff] %v2603_v51 }
 0x780   :  { %v2563_v37 = vpop.f32.mrf.mxu1 }
 0x781   :  { %v2584_v13 = vadd.f32 %v2563_v37, %v4258_v60 }
 0x783   :  { %v2604_v27 = vadd.f32 %v4312_v3, %v2584_v13 }
 0x785   :  { %2620 = vst [vmem:[#allocation13 + $0x68] sm:$0xff] %v2604_v27 }
 0x788   :  { %v2566_v4 = vpop.f32.mrf.mxu1 }
 0x789   :  { %v2585_v18 = vadd.f32 %v2566_v4, %v4263_v26 }
 0x78b   :  { %v2605_v41 = vadd.f32 %v4312_v3, %v2585_v18 }
 0x78d   :  { %2621 = vst [vmem:[#allocation13 + $0x70] sm:$0xff] %v2605_v41 }
 0x790   :  { %v2568_v56 = vpop.f32.mrf.mxu1 }
 0x791   :  { %v2586_v62 = vadd.f32 %v2568_v56, %v4268_v0 }
 0x793   :  { %v2606_v60 = vadd.f32 %v4312_v3, %v2586_v62 }
 0x795   :  { %2622 = vst [vmem:[#allocation13 + $0x78] sm:$0xff] %v2606_v60 }
 0x796   :  { %2635 = dma.vmem_to_hbm [thread:$0]  %s2628_s22, 2048, %s2630_s24, [#allocation4], %s3423_s29, %s3423_s29, %s3424_s30  }
 0x797   :  { %3414 = dma.done.wait [#allocation4], 2048  }
 0x798   :  { %3415 = vsyncadd [#allocation4], 4294965248 }
 0x799   :  { %2640 = vsyncpa [#allocation3], 1 }
 0x79a   :  { %2641 = vsyncpa [#allocation6], 1 }
 0x79b   :  { %2642 = vsyncpa [#allocation9], 1 }
 0x79c   :  { %2643 = vsyncpa [#allocation12], 1 }
 0x79d   :  { %2644 = vsyncpa [#allocation4], 1 }

</bundles_post_ra>
